<compile_context>
chip_gen: v5e
topology: v5e:2x2
jax: 0.10.0
libtpu: 0.0.40
codegen_flags: <defaults>
</compile_context>

<pallas_src>
import functools
import math

import jax
import jax.numpy as jnp
from jax.experimental import pallas as pl
from jax.experimental.pallas import tpu as pltpu


# ----------------------------- fused Pallas kernel -------------------------------- #

def _fused_self_attention_kernel(x_ref, wq_ref, wk_ref, wv_ref, pw_ref, pb_ref, o_ref,
                                 *, heads, hd, Lh, Lv, scale):
    # One grid step == one (batch, token-tile).  Blocks:
    #   x_ref: (1, Tq, C)   wq/wk/wv/pw: (C, C) bf16 resident   pb: (1, C) f32
    #   o_ref: (1, Tq, C)
    Tq = x_ref.shape[1]
    C = heads * hd
    xb = x_ref[0].astype(jnp.bfloat16)                                 # bf16 MXU operand

    # (1) q/k/v projections: three lane-aligned (Tq,C)@(C,C) MXU matmuls, f32 accumulate.
    q = jnp.dot(xb, wq_ref[...], preferred_element_type=jnp.float32)   # (Tq, C) f32
    k = jnp.dot(xb, wk_ref[...], preferred_element_type=jnp.float32)
    v = jnp.dot(xb, wv_ref[...], preferred_element_type=jnp.float32)

    # (2) per-head windowed attention.  Heads 0..3 -> window Lh (sw*w); heads 4..7 ->
    #     window Lv (sw*h), matching the hard-coded `[:4]` / `[4:]` split in forward.
    #     All windows of a head run in ONE window-batched einsum (no per-window steps,
    #     no dense (N,N) scores).
    def head_attn(g, L):
        nW = Tq // L
        sl = slice(g * hd, (g + 1) * hd)
        qg = q[:, sl].reshape(nW, L, hd).astype(jnp.bfloat16)
        kg = k[:, sl].reshape(nW, L, hd).astype(jnp.bfloat16)
        vg = v[:, sl].reshape(nW, L, hd).astype(jnp.bfloat16)
        s = jnp.einsum('wld,wmd->wlm', qg, kg,
                       preferred_element_type=jnp.float32) * scale     # (nW, L, L) f32
        m = jnp.max(s, axis=-1, keepdims=True)
        p = jnp.exp(s - m)                                             # f32 softmax
        p = p / jnp.sum(p, axis=-1, keepdims=True)                     # exact divide
        o = jnp.einsum('wlm,wmd->wld', p.astype(jnp.bfloat16), vg,
                       preferred_element_type=jnp.float32)             # (nW, L, hd) f32
        return o.reshape(Tq, hd)

    outs = [head_attn(g, Lh if g < 4 else Lv) for g in range(heads)]

    # (3) lane-dense head concat (in registers) + one dense output projection.
    x_all = jnp.concatenate(outs, axis=-1).astype(jnp.bfloat16)        # (Tq, C)
    out = jnp.dot(x_all, pw_ref[...], preferred_element_type=jnp.float32) + pb_ref[...]
    o_ref[0] = out.astype(o_ref.dtype)


# ----------------------------- wrapper --------------------------------------------- #

def self_attention_forward(x, params, *, heads, sw, h, w):
    """Mirrors SelfAttention.forward.  Returns (forward_output, x_out).

    forward_output == x (the PyTorch module returns its input); x_out is the fully
    computed attention+projection result produced by the fused Pallas kernel.
    """
    B, N, C = x.shape
    assert heads == 8, "reference forward hard-codes the :4 / 4: head split"
    assert C % heads == 0 and N == h * w
    assert h % sw == 0 and w % sw == 0
    hd = C // heads
    scale = hd ** (-0.5)
    Lh = sw * w          # h-branch window length (heads 0..3)
    Lv = sw * h          # v-branch window length (heads 4..7)

    # Token-tile size: multiple of lcm(Lh, Lv) (no window straddles a tile), divides N,
    # capped around 512 tokens so per-step VMEM stays bounded and the pipeline is deep.
    L = (Lh * Lv) // math.gcd(Lh, Lv)
    assert N % L == 0
    n_units = N // L
    cap = max(512, L)
    d = max(dd for dd in range(1, n_units + 1) if n_units % dd == 0 and dd * L <= cap)
    Tq = d * L
    n_tiles = N // Tq

    # Split the fused qkv weight into lane-aligned wq/wk/wv; resident weights in bf16.
    qkv_w = params["qkv_w"]
    wq = qkv_w[:, 0:C].astype(jnp.bfloat16)
    wk = qkv_w[:, C:2 * C].astype(jnp.bfloat16)
    wv = qkv_w[:, 2 * C:3 * C].astype(jnp.bfloat16)
    pw = params["proj_w"].astype(jnp.bfloat16)
    pb = params["proj_b"].reshape(1, C).astype(jnp.float32)

    # Explicit scoped-VMEM budget sized to the tiles (with headroom), clamped to stay
    # under v7x's 64 MiB physical VMEM.
    blk = Tq * C * 4                                    # f32 x / out block
    wbytes = 4 * C * C * 2 + C * 4                      # resident bf16 weights + f32 bias
    interm = 8 * Tq * C * 4 + 2 * heads * (Tq // min(Lh, Lv)) * max(Lh, Lv) ** 2 * 4
    vmem_limit = int(min(max(4 * 2 * blk + 2 * wbytes + 2 * interm, 32 * 2 ** 20),
                         48 * 2 ** 20))

    kernel = functools.partial(_fused_self_attention_kernel,
                               heads=heads, hd=hd, Lh=Lh, Lv=Lv, scale=scale)
    x_out = pl.pallas_call(
        kernel,
        out_shape=jax.ShapeDtypeStruct((B, N, C), x.dtype),
        grid=(B, n_tiles),
        in_specs=[
            pl.BlockSpec((1, Tq, C), lambda b, t: (b, t, 0)),   # x tile
            pl.BlockSpec((C, C), lambda b, t: (0, 0)),          # wq (resident)
            pl.BlockSpec((C, C), lambda b, t: (0, 0)),          # wk (resident)
            pl.BlockSpec((C, C), lambda b, t: (0, 0)),          # wv (resident)
            pl.BlockSpec((C, C), lambda b, t: (0, 0)),          # proj weight (resident)
            pl.BlockSpec((1, C), lambda b, t: (0, 0)),          # proj bias
        ],
        out_specs=pl.BlockSpec((1, Tq, C), lambda b, t: (b, t, 0)),
        compiler_params=pltpu.CompilerParams(
            dimension_semantics=("parallel", "parallel"),       # no cross-step reduction
            vmem_limit_bytes=vmem_limit),
    )(x, wq, wk, wv, pw, pb)

    # The reference PyTorch forward returns `x`, not `x_out`.
    return x, x_out


# ----------------------------- pure-JAX reference ----------------------------------- #

def _ref_x_out(x, params, *, heads, sw, h, w):
    B, N, C = x.shape
    hd = C // heads
    scale = hd ** (-0.5)
    nh2 = heads // 2
    qkv = (x.reshape(B * N, C) @ params["qkv_w"]).reshape(B, N, 3, heads, hd)
    qkv = qkv.transpose(2, 0, 3, 1, 4)
    qkv_h = qkv[:, :, :4].reshape(3, B, 4, h // sw, sw * w, hd)
    qkv_v = qkv[:, :, 4:].reshape(3, B, nh2, w // sw, sw * h, hd)

    def attn(q, k, v):
        s = jnp.einsum("bgnld,bgnmd->bgnlm", q, k) * scale
        p = jax.nn.softmax(s, axis=-1)
        o = jnp.einsum("bgnlm,bgnmd->bgnld", p, v)
        return o.reshape(B, o.shape[1], N, hd)

    x_h = attn(qkv_h[0], qkv_h[1], qkv_h[2])
    x_v = attn(qkv_v[0], qkv_v[1], qkv_v[2])
    x_all = jnp.concatenate([x_h, x_v], axis=1).transpose(0, 2, 1, 3).reshape(B, N, C)
    return (x_all.reshape(B * N, C) @ params["proj_w"] + params["proj_b"]).reshape(B, N, C)


# ----------------------------- main -------------------------------------------------- #

if __name__ == "__main__":
    # Module hyper-params (heads must be 8: forward hard-codes the :4 / 4: head split).
    B, heads, dim, h, w, sw = 2, 8, 64, 8, 8, 2
    N = h * w

    key = jax.random.PRNGKey(0)
    k1, k2, k3, k4, k5 = jax.random.split(key, 5)
    params = {
        # stored transposed vs PyTorch so y = x @ W
        "qkv_w": (jax.random.normal(k1, (dim, 3 * dim), jnp.float32) * 0.02),
        "qkv_w_unused": (jax.random.normal(k2, (dim, 3 * dim), jnp.float32) * 0.02),  # self.qkv_w: unused in forward
        "proj_w": (jax.random.normal(k3, (dim, dim), jnp.float32) * 0.02),
        "proj_b": (jax.random.normal(k4, (dim,), jnp.float32) * 0.02),
    }
    x = jax.random.normal(k5, (B, N, dim), jnp.float32)

    fwd = jax.jit(functools.partial(self_attention_forward, heads=heads, sw=sw, h=h, w=w))
    out, x_out = fwd(x, params)
    jax.block_until_ready((out, x_out))

    # Sanity checks: forward output equals the input (per reference semantics),
    # and the Pallas-computed x_out matches the pure-JAX f32 reference (bf16 MXU ops
    # keep us well inside 1e-2 at these magnitudes).
    assert out.shape == (B, N, dim) and x_out.shape == (B, N, dim)
    assert bool(jnp.allclose(out, x))
    ref = _ref_x_out(x, params, heads=heads, sw=sw, h=h, w=w)
    assert bool(jnp.allclose(x_out, ref, atol=1e-2, rtol=1e-2))

    print("KERNEL_OK")
</pallas_src>

<mosaic_0001>
module attributes {stable_mosaic.version = 11 : i64} {
  func.func @_fused_self_attention_kernel(%arg0: i32, %arg1: i32, %arg2: memref<1x64x64xf32, #tpu.memory_space<vmem>>, %arg3: memref<64x64xbf16, #tpu.memory_space<vmem>>, %arg4: memref<64x64xbf16, #tpu.memory_space<vmem>>, %arg5: memref<64x64xbf16, #tpu.memory_space<vmem>>, %arg6: memref<64x64xbf16, #tpu.memory_space<vmem>>, %arg7: memref<1x64xf32, #tpu.memory_space<vmem>>, %arg8: memref<1x64x64xf32, #tpu.memory_space<vmem>>) attributes {dimension_semantics = [#tpu.dimension_semantics<parallel>, #tpu.dimension_semantics<parallel>], iteration_bounds = array<i64: 2, 1>, scalar_prefetch = 0 : i64, scratch_operands = 0 : i64, tpu.core_type = #tpu.core_type<tc>, window_params = [{transform_indices = @transform_0, window_bounds = array<i64: 1, 64, 64>}, {pipeline_mode = #tpu.pipeline_mode<synchronous>, transform_indices = @transform_1, window_bounds = array<i64: 64, 64>}, {pipeline_mode = #tpu.pipeline_mode<synchronous>, transform_indices = @transform_2, window_bounds = array<i64: 64, 64>}, {pipeline_mode = #tpu.pipeline_mode<synchronous>, transform_indices = @transform_3, window_bounds = array<i64: 64, 64>}, {pipeline_mode = #tpu.pipeline_mode<synchronous>, transform_indices = @transform_4, window_bounds = array<i64: 64, 64>}, {pipeline_mode = #tpu.pipeline_mode<synchronous>, transform_indices = @transform_5, window_bounds = array<i64: 1, 64>}, {transform_indices = @transform_6, window_bounds = array<i64: 1, 64, 64>}]} {
    %c0 = arith.constant 0 : index
    %c0_0 = arith.constant 0 : index
    %c0_1 = arith.constant 0 : index
    %0 = vector.load %arg2[%c0, %c0_0, %c0_1] : memref<1x64x64xf32, #tpu.memory_space<vmem>>, vector<1x64x64xf32>
    %1 = vector.shape_cast %0 : vector<1x64x64xf32> to vector<64x64xf32>
    %2 = arith.truncf %1 : vector<64x64xf32> to vector<64x64xbf16>
    %c0_2 = arith.constant 0 : index
    %c0_3 = arith.constant 0 : index
    %3 = vector.load %arg3[%c0_2, %c0_3] : memref<64x64xbf16, #tpu.memory_space<vmem>>, vector<64x64xbf16>
    %cst = arith.constant dense<0.000000e+00> : vector<64x64xf32>
    %4 = tpu.matmul %2, %3, %cst {dimension_numbers = #tpu.dot_dimension_numbers<[1], [0], [0], [1], [0, 0, 1, 1], [], []>} : vector<64x64xbf16>, vector<64x64xbf16>, vector<64x64xf32> -> vector<64x64xf32>
    %c0_4 = arith.constant 0 : index
    %c0_5 = arith.constant 0 : index
    %5 = vector.load %arg4[%c0_4, %c0_5] : memref<64x64xbf16, #tpu.memory_space<vmem>>, vector<64x64xbf16>
    %cst_6 = arith.constant dense<0.000000e+00> : vector<64x64xf32>
    %6 = tpu.matmul %2, %5, %cst_6 {dimension_numbers = #tpu.dot_dimension_numbers<[1], [0], [0], [1], [0, 0, 1, 1], [], []>} : vector<64x64xbf16>, vector<64x64xbf16>, vector<64x64xf32> -> vector<64x64xf32>
    %c0_7 = arith.constant 0 : index
    %c0_8 = arith.constant 0 : index
    %7 = vector.load %arg5[%c0_7, %c0_8] : memref<64x64xbf16, #tpu.memory_space<vmem>>, vector<64x64xbf16>
    %cst_9 = arith.constant dense<0.000000e+00> : vector<64x64xf32>
    %8 = tpu.matmul %2, %7, %cst_9 {dimension_numbers = #tpu.dot_dimension_numbers<[1], [0], [0], [1], [0, 0, 1, 1], [], []>} : vector<64x64xbf16>, vector<64x64xbf16>, vector<64x64xf32> -> vector<64x64xf32>
    %9 = vector.extract_strided_slice %4 {offsets = [0, 0], sizes = [64, 8], strides = [1, 1]} : vector<64x64xf32> to vector<64x8xf32>
    %10 = vector.shape_cast %9 : vector<64x8xf32> to vector<4x16x8xf32>
    %11 = arith.truncf %10 : vector<4x16x8xf32> to vector<4x16x8xbf16>
    %12 = vector.extract_strided_slice %6 {offsets = [0, 0], sizes = [64, 8], strides = [1, 1]} : vector<64x64xf32> to vector<64x8xf32>
    %13 = vector.shape_cast %12 : vector<64x8xf32> to vector<4x16x8xf32>
    %14 = arith.truncf %13 : vector<4x16x8xf32> to vector<4x16x8xbf16>
    %15 = vector.extract_strided_slice %8 {offsets = [0, 0], sizes = [64, 8], strides = [1, 1]} : vector<64x64xf32> to vector<64x8xf32>
    %16 = vector.shape_cast %15 : vector<64x8xf32> to vector<4x16x8xf32>
    %17 = arith.truncf %16 : vector<4x16x8xf32> to vector<4x16x8xbf16>
    "tpu.trace_start"() <{level = 10 : i32, message = "wld,wmd->wlm"}> : () -> ()
    %cst_10 = arith.constant dense<0.000000e+00> : vector<4x16x16xf32>
    %18 = tpu.matmul %11, %14, %cst_10 {dimension_numbers = #tpu.dot_dimension_numbers<[2], [2], [1], [1], [0, 0, 0, 1, 1, 1], [0], [0]>} : vector<4x16x8xbf16>, vector<4x16x8xbf16>, vector<4x16x16xf32> -> vector<4x16x16xf32>
    "tpu.trace_stop"() : () -> ()
    %cst_11 = arith.constant 0.353553385 : f32
    %19 = vector.broadcast %cst_11 : f32 to vector<4x16x16xf32>
    %20 = arith.mulf %18, %19 : vector<4x16x16xf32>
    %cst_12 = arith.constant dense<0xFF800000> : vector<4x16xf32>
    %21 = vector.multi_reduction <maximumf>, %20, %cst_12 [2] : vector<4x16x16xf32> to vector<4x16xf32>
    %22 = vector.shape_cast %21 : vector<4x16xf32> to vector<4x16x1xf32>
    %23 = vector.broadcast %22 : vector<4x16x1xf32> to vector<4x16x16xf32>
    %24 = arith.subf %20, %23 : vector<4x16x16xf32>
    %25 = math.exp %24 : vector<4x16x16xf32>
    %cst_13 = arith.constant dense<0.000000e+00> : vector<4x16xf32>
    %26 = vector.multi_reduction <add>, %25, %cst_13 [2] : vector<4x16x16xf32> to vector<4x16xf32>
    %27 = vector.shape_cast %26 : vector<4x16xf32> to vector<4x16x1xf32>
    %28 = vector.broadcast %27 : vector<4x16x1xf32> to vector<4x16x16xf32>
    %29 = arith.divf %25, %28 : vector<4x16x16xf32>
    %30 = arith.truncf %29 : vector<4x16x16xf32> to vector<4x16x16xbf16>
    "tpu.trace_start"() <{level = 10 : i32, message = "wlm,wmd->wld"}> : () -> ()
    %cst_14 = arith.constant dense<0.000000e+00> : vector<4x16x8xf32>
    %31 = tpu.matmul %30, %17, %cst_14 {dimension_numbers = #tpu.dot_dimension_numbers<[2], [1], [1], [2], [0, 0, 0, 1, 1, 2], [0], [0]>} : vector<4x16x16xbf16>, vector<4x16x8xbf16>, vector<4x16x8xf32> -> vector<4x16x8xf32>
    "tpu.trace_stop"() : () -> ()
    %32 = vector.shape_cast %31 : vector<4x16x8xf32> to vector<64x8xf32>
    %33 = vector.extract_strided_slice %4 {offsets = [0, 8], sizes = [64, 8], strides = [1, 1]} : vector<64x64xf32> to vector<64x8xf32>
    %34 = vector.shape_cast %33 : vector<64x8xf32> to vector<4x16x8xf32>
    %35 = arith.truncf %34 : vector<4x16x8xf32> to vector<4x16x8xbf16>
    %36 = vector.extract_strided_slice %6 {offsets = [0, 8], sizes = [64, 8], strides = [1, 1]} : vector<64x64xf32> to vector<64x8xf32>
    %37 = vector.shape_cast %36 : vector<64x8xf32> to vector<4x16x8xf32>
    %38 = arith.truncf %37 : vector<4x16x8xf32> to vector<4x16x8xbf16>
    %39 = vector.extract_strided_slice %8 {offsets = [0, 8], sizes = [64, 8], strides = [1, 1]} : vector<64x64xf32> to vector<64x8xf32>
    %40 = vector.shape_cast %39 : vector<64x8xf32> to vector<4x16x8xf32>
    %41 = arith.truncf %40 : vector<4x16x8xf32> to vector<4x16x8xbf16>
    "tpu.trace_start"() <{level = 10 : i32, message = "wld,wmd->wlm"}> : () -> ()
    %cst_15 = arith.constant dense<0.000000e+00> : vector<4x16x16xf32>
    %42 = tpu.matmul %35, %38, %cst_15 {dimension_numbers = #tpu.dot_dimension_numbers<[2], [2], [1], [1], [0, 0, 0, 1, 1, 1], [0], [0]>} : vector<4x16x8xbf16>, vector<4x16x8xbf16>, vector<4x16x16xf32> -> vector<4x16x16xf32>
    "tpu.trace_stop"() : () -> ()
    %cst_16 = arith.constant 0.353553385 : f32
    %43 = vector.broadcast %cst_16 : f32 to vector<4x16x16xf32>
    %44 = arith.mulf %42, %43 : vector<4x16x16xf32>
    %cst_17 = arith.constant dense<0xFF800000> : vector<4x16xf32>
    %45 = vector.multi_reduction <maximumf>, %44, %cst_17 [2] : vector<4x16x16xf32> to vector<4x16xf32>
    %46 = vector.shape_cast %45 : vector<4x16xf32> to vector<4x16x1xf32>
    %47 = vector.broadcast %46 : vector<4x16x1xf32> to vector<4x16x16xf32>
    %48 = arith.subf %44, %47 : vector<4x16x16xf32>
    %49 = math.exp %48 : vector<4x16x16xf32>
    %cst_18 = arith.constant dense<0.000000e+00> : vector<4x16xf32>
    %50 = vector.multi_reduction <add>, %49, %cst_18 [2] : vector<4x16x16xf32> to vector<4x16xf32>
    %51 = vector.shape_cast %50 : vector<4x16xf32> to vector<4x16x1xf32>
    %52 = vector.broadcast %51 : vector<4x16x1xf32> to vector<4x16x16xf32>
    %53 = arith.divf %49, %52 : vector<4x16x16xf32>
    %54 = arith.truncf %53 : vector<4x16x16xf32> to vector<4x16x16xbf16>
    "tpu.trace_start"() <{level = 10 : i32, message = "wlm,wmd->wld"}> : () -> ()
    %cst_19 = arith.constant dense<0.000000e+00> : vector<4x16x8xf32>
    %55 = tpu.matmul %54, %41, %cst_19 {dimension_numbers = #tpu.dot_dimension_numbers<[2], [1], [1], [2], [0, 0, 0, 1, 1, 2], [0], [0]>} : vector<4x16x16xbf16>, vector<4x16x8xbf16>, vector<4x16x8xf32> -> vector<4x16x8xf32>
    "tpu.trace_stop"() : () -> ()
    %56 = vector.shape_cast %55 : vector<4x16x8xf32> to vector<64x8xf32>
    %57 = vector.extract_strided_slice %4 {offsets = [0, 16], sizes = [64, 8], strides = [1, 1]} : vector<64x64xf32> to vector<64x8xf32>
    %58 = vector.shape_cast %57 : vector<64x8xf32> to vector<4x16x8xf32>
    %59 = arith.truncf %58 : vector<4x16x8xf32> to vector<4x16x8xbf16>
    %60 = vector.extract_strided_slice %6 {offsets = [0, 16], sizes = [64, 8], strides = [1, 1]} : vector<64x64xf32> to vector<64x8xf32>
    %61 = vector.shape_cast %60 : vector<64x8xf32> to vector<4x16x8xf32>
    %62 = arith.truncf %61 : vector<4x16x8xf32> to vector<4x16x8xbf16>
    %63 = vector.extract_strided_slice %8 {offsets = [0, 16], sizes = [64, 8], strides = [1, 1]} : vector<64x64xf32> to vector<64x8xf32>
    %64 = vector.shape_cast %63 : vector<64x8xf32> to vector<4x16x8xf32>
    %65 = arith.truncf %64 : vector<4x16x8xf32> to vector<4x16x8xbf16>
    "tpu.trace_start"() <{level = 10 : i32, message = "wld,wmd->wlm"}> : () -> ()
    %cst_20 = arith.constant dense<0.000000e+00> : vector<4x16x16xf32>
    %66 = tpu.matmul %59, %62, %cst_20 {dimension_numbers = #tpu.dot_dimension_numbers<[2], [2], [1], [1], [0, 0, 0, 1, 1, 1], [0], [0]>} : vector<4x16x8xbf16>, vector<4x16x8xbf16>, vector<4x16x16xf32> -> vector<4x16x16xf32>
    "tpu.trace_stop"() : () -> ()
    %cst_21 = arith.constant 0.353553385 : f32
    %67 = vector.broadcast %cst_21 : f32 to vector<4x16x16xf32>
    %68 = arith.mulf %66, %67 : vector<4x16x16xf32>
    %cst_22 = arith.constant dense<0xFF800000> : vector<4x16xf32>
    %69 = vector.multi_reduction <maximumf>, %68, %cst_22 [2] : vector<4x16x16xf32> to vector<4x16xf32>
    %70 = vector.shape_cast %69 : vector<4x16xf32> to vector<4x16x1xf32>
    %71 = vector.broadcast %70 : vector<4x16x1xf32> to vector<4x16x16xf32>
    %72 = arith.subf %68, %71 : vector<4x16x16xf32>
    %73 = math.exp %72 : vector<4x16x16xf32>
    %cst_23 = arith.constant dense<0.000000e+00> : vector<4x16xf32>
    %74 = vector.multi_reduction <add>, %73, %cst_23 [2] : vector<4x16x16xf32> to vector<4x16xf32>
    %75 = vector.shape_cast %74 : vector<4x16xf32> to vector<4x16x1xf32>
    %76 = vector.broadcast %75 : vector<4x16x1xf32> to vector<4x16x16xf32>
    %77 = arith.divf %73, %76 : vector<4x16x16xf32>
    %78 = arith.truncf %77 : vector<4x16x16xf32> to vector<4x16x16xbf16>
    "tpu.trace_start"() <{level = 10 : i32, message = "wlm,wmd->wld"}> : () -> ()
    %cst_24 = arith.constant dense<0.000000e+00> : vector<4x16x8xf32>
    %79 = tpu.matmul %78, %65, %cst_24 {dimension_numbers = #tpu.dot_dimension_numbers<[2], [1], [1], [2], [0, 0, 0, 1, 1, 2], [0], [0]>} : vector<4x16x16xbf16>, vector<4x16x8xbf16>, vector<4x16x8xf32> -> vector<4x16x8xf32>
    "tpu.trace_stop"() : () -> ()
    %80 = vector.shape_cast %79 : vector<4x16x8xf32> to vector<64x8xf32>
    %81 = vector.extract_strided_slice %4 {offsets = [0, 24], sizes = [64, 8], strides = [1, 1]} : vector<64x64xf32> to vector<64x8xf32>
    %82 = vector.shape_cast %81 : vector<64x8xf32> to vector<4x16x8xf32>
    %83 = arith.truncf %82 : vector<4x16x8xf32> to vector<4x16x8xbf16>
    %84 = vector.extract_strided_slice %6 {offsets = [0, 24], sizes = [64, 8], strides = [1, 1]} : vector<64x64xf32> to vector<64x8xf32>
    %85 = vector.shape_cast %84 : vector<64x8xf32> to vector<4x16x8xf32>
    %86 = arith.truncf %85 : vector<4x16x8xf32> to vector<4x16x8xbf16>
    %87 = vector.extract_strided_slice %8 {offsets = [0, 24], sizes = [64, 8], strides = [1, 1]} : vector<64x64xf32> to vector<64x8xf32>
    %88 = vector.shape_cast %87 : vector<64x8xf32> to vector<4x16x8xf32>
    %89 = arith.truncf %88 : vector<4x16x8xf32> to vector<4x16x8xbf16>
    "tpu.trace_start"() <{level = 10 : i32, message = "wld,wmd->wlm"}> : () -> ()
    %cst_25 = arith.constant dense<0.000000e+00> : vector<4x16x16xf32>
    %90 = tpu.matmul %83, %86, %cst_25 {dimension_numbers = #tpu.dot_dimension_numbers<[2], [2], [1], [1], [0, 0, 0, 1, 1, 1], [0], [0]>} : vector<4x16x8xbf16>, vector<4x16x8xbf16>, vector<4x16x16xf32> -> vector<4x16x16xf32>
    "tpu.trace_stop"() : () -> ()
    %cst_26 = arith.constant 0.353553385 : f32
    %91 = vector.broadcast %cst_26 : f32 to vector<4x16x16xf32>
    %92 = arith.mulf %90, %91 : vector<4x16x16xf32>
    %cst_27 = arith.constant dense<0xFF800000> : vector<4x16xf32>
    %93 = vector.multi_reduction <maximumf>, %92, %cst_27 [2] : vector<4x16x16xf32> to vector<4x16xf32>
    %94 = vector.shape_cast %93 : vector<4x16xf32> to vector<4x16x1xf32>
    %95 = vector.broadcast %94 : vector<4x16x1xf32> to vector<4x16x16xf32>
    %96 = arith.subf %92, %95 : vector<4x16x16xf32>
    %97 = math.exp %96 : vector<4x16x16xf32>
    %cst_28 = arith.constant dense<0.000000e+00> : vector<4x16xf32>
    %98 = vector.multi_reduction <add>, %97, %cst_28 [2] : vector<4x16x16xf32> to vector<4x16xf32>
    %99 = vector.shape_cast %98 : vector<4x16xf32> to vector<4x16x1xf32>
    %100 = vector.broadcast %99 : vector<4x16x1xf32> to vector<4x16x16xf32>
    %101 = arith.divf %97, %100 : vector<4x16x16xf32>
    %102 = arith.truncf %101 : vector<4x16x16xf32> to vector<4x16x16xbf16>
    "tpu.trace_start"() <{level = 10 : i32, message = "wlm,wmd->wld"}> : () -> ()
    %cst_29 = arith.constant dense<0.000000e+00> : vector<4x16x8xf32>
    %103 = tpu.matmul %102, %89, %cst_29 {dimension_numbers = #tpu.dot_dimension_numbers<[2], [1], [1], [2], [0, 0, 0, 1, 1, 2], [0], [0]>} : vector<4x16x16xbf16>, vector<4x16x8xbf16>, vector<4x16x8xf32> -> vector<4x16x8xf32>
    "tpu.trace_stop"() : () -> ()
    %104 = vector.shape_cast %103 : vector<4x16x8xf32> to vector<64x8xf32>
    %105 = vector.extract_strided_slice %4 {offsets = [0, 32], sizes = [64, 8], strides = [1, 1]} : vector<64x64xf32> to vector<64x8xf32>
    %106 = vector.shape_cast %105 : vector<64x8xf32> to vector<4x16x8xf32>
    %107 = arith.truncf %106 : vector<4x16x8xf32> to vector<4x16x8xbf16>
    %108 = vector.extract_strided_slice %6 {offsets = [0, 32], sizes = [64, 8], strides = [1, 1]} : vector<64x64xf32> to vector<64x8xf32>
    %109 = vector.shape_cast %108 : vector<64x8xf32> to vector<4x16x8xf32>
    %110 = arith.truncf %109 : vector<4x16x8xf32> to vector<4x16x8xbf16>
    %111 = vector.extract_strided_slice %8 {offsets = [0, 32], sizes = [64, 8], strides = [1, 1]} : vector<64x64xf32> to vector<64x8xf32>
    %112 = vector.shape_cast %111 : vector<64x8xf32> to vector<4x16x8xf32>
    %113 = arith.truncf %112 : vector<4x16x8xf32> to vector<4x16x8xbf16>
    "tpu.trace_start"() <{level = 10 : i32, message = "wld,wmd->wlm"}> : () -> ()
    %cst_30 = arith.constant dense<0.000000e+00> : vector<4x16x16xf32>
    %114 = tpu.matmul %107, %110, %cst_30 {dimension_numbers = #tpu.dot_dimension_numbers<[2], [2], [1], [1], [0, 0, 0, 1, 1, 1], [0], [0]>} : vector<4x16x8xbf16>, vector<4x16x8xbf16>, vector<4x16x16xf32> -> vector<4x16x16xf32>
    "tpu.trace_stop"() : () -> ()
    %cst_31 = arith.constant 0.353553385 : f32
    %115 = vector.broadcast %cst_31 : f32 to vector<4x16x16xf32>
    %116 = arith.mulf %114, %115 : vector<4x16x16xf32>
    %cst_32 = arith.constant dense<0xFF800000> : vector<4x16xf32>
    %117 = vector.multi_reduction <maximumf>, %116, %cst_32 [2] : vector<4x16x16xf32> to vector<4x16xf32>
    %118 = vector.shape_cast %117 : vector<4x16xf32> to vector<4x16x1xf32>
    %119 = vector.broadcast %118 : vector<4x16x1xf32> to vector<4x16x16xf32>
    %120 = arith.subf %116, %119 : vector<4x16x16xf32>
    %121 = math.exp %120 : vector<4x16x16xf32>
    %cst_33 = arith.constant dense<0.000000e+00> : vector<4x16xf32>
    %122 = vector.multi_reduction <add>, %121, %cst_33 [2] : vector<4x16x16xf32> to vector<4x16xf32>
    %123 = vector.shape_cast %122 : vector<4x16xf32> to vector<4x16x1xf32>
    %124 = vector.broadcast %123 : vector<4x16x1xf32> to vector<4x16x16xf32>
    %125 = arith.divf %121, %124 : vector<4x16x16xf32>
    %126 = arith.truncf %125 : vector<4x16x16xf32> to vector<4x16x16xbf16>
    "tpu.trace_start"() <{level = 10 : i32, message = "wlm,wmd->wld"}> : () -> ()
    %cst_34 = arith.constant dense<0.000000e+00> : vector<4x16x8xf32>
    %127 = tpu.matmul %126, %113, %cst_34 {dimension_numbers = #tpu.dot_dimension_numbers<[2], [1], [1], [2], [0, 0, 0, 1, 1, 2], [0], [0]>} : vector<4x16x16xbf16>, vector<4x16x8xbf16>, vector<4x16x8xf32> -> vector<4x16x8xf32>
    "tpu.trace_stop"() : () -> ()
    %128 = vector.shape_cast %127 : vector<4x16x8xf32> to vector<64x8xf32>
    %129 = vector.extract_strided_slice %4 {offsets = [0, 40], sizes = [64, 8], strides = [1, 1]} : vector<64x64xf32> to vector<64x8xf32>
    %130 = vector.shape_cast %129 : vector<64x8xf32> to vector<4x16x8xf32>
    %131 = arith.truncf %130 : vector<4x16x8xf32> to vector<4x16x8xbf16>
    %132 = vector.extract_strided_slice %6 {offsets = [0, 40], sizes = [64, 8], strides = [1, 1]} : vector<64x64xf32> to vector<64x8xf32>
    %133 = vector.shape_cast %132 : vector<64x8xf32> to vector<4x16x8xf32>
    %134 = arith.truncf %133 : vector<4x16x8xf32> to vector<4x16x8xbf16>
    %135 = vector.extract_strided_slice %8 {offsets = [0, 40], sizes = [64, 8], strides = [1, 1]} : vector<64x64xf32> to vector<64x8xf32>
    %136 = vector.shape_cast %135 : vector<64x8xf32> to vector<4x16x8xf32>
    %137 = arith.truncf %136 : vector<4x16x8xf32> to vector<4x16x8xbf16>
    "tpu.trace_start"() <{level = 10 : i32, message = "wld,wmd->wlm"}> : () -> ()
    %cst_35 = arith.constant dense<0.000000e+00> : vector<4x16x16xf32>
    %138 = tpu.matmul %131, %134, %cst_35 {dimension_numbers = #tpu.dot_dimension_numbers<[2], [2], [1], [1], [0, 0, 0, 1, 1, 1], [0], [0]>} : vector<4x16x8xbf16>, vector<4x16x8xbf16>, vector<4x16x16xf32> -> vector<4x16x16xf32>
    "tpu.trace_stop"() : () -> ()
    %cst_36 = arith.constant 0.353553385 : f32
    %139 = vector.broadcast %cst_36 : f32 to vector<4x16x16xf32>
    %140 = arith.mulf %138, %139 : vector<4x16x16xf32>
    %cst_37 = arith.constant dense<0xFF800000> : vector<4x16xf32>
    %141 = vector.multi_reduction <maximumf>, %140, %cst_37 [2] : vector<4x16x16xf32> to vector<4x16xf32>
    %142 = vector.shape_cast %141 : vector<4x16xf32> to vector<4x16x1xf32>
    %143 = vector.broadcast %142 : vector<4x16x1xf32> to vector<4x16x16xf32>
    %144 = arith.subf %140, %143 : vector<4x16x16xf32>
    %145 = math.exp %144 : vector<4x16x16xf32>
    %cst_38 = arith.constant dense<0.000000e+00> : vector<4x16xf32>
    %146 = vector.multi_reduction <add>, %145, %cst_38 [2] : vector<4x16x16xf32> to vector<4x16xf32>
    %147 = vector.shape_cast %146 : vector<4x16xf32> to vector<4x16x1xf32>
    %148 = vector.broadcast %147 : vector<4x16x1xf32> to vector<4x16x16xf32>
    %149 = arith.divf %145, %148 : vector<4x16x16xf32>
    %150 = arith.truncf %149 : vector<4x16x16xf32> to vector<4x16x16xbf16>
    "tpu.trace_start"() <{level = 10 : i32, message = "wlm,wmd->wld"}> : () -> ()
    %cst_39 = arith.constant dense<0.000000e+00> : vector<4x16x8xf32>
    %151 = tpu.matmul %150, %137, %cst_39 {dimension_numbers = #tpu.dot_dimension_numbers<[2], [1], [1], [2], [0, 0, 0, 1, 1, 2], [0], [0]>} : vector<4x16x16xbf16>, vector<4x16x8xbf16>, vector<4x16x8xf32> -> vector<4x16x8xf32>
    "tpu.trace_stop"() : () -> ()
    %152 = vector.shape_cast %151 : vector<4x16x8xf32> to vector<64x8xf32>
    %153 = vector.extract_strided_slice %4 {offsets = [0, 48], sizes = [64, 8], strides = [1, 1]} : vector<64x64xf32> to vector<64x8xf32>
    %154 = vector.shape_cast %153 : vector<64x8xf32> to vector<4x16x8xf32>
    %155 = arith.truncf %154 : vector<4x16x8xf32> to vector<4x16x8xbf16>
    %156 = vector.extract_strided_slice %6 {offsets = [0, 48], sizes = [64, 8], strides = [1, 1]} : vector<64x64xf32> to vector<64x8xf32>
    %157 = vector.shape_cast %156 : vector<64x8xf32> to vector<4x16x8xf32>
    %158 = arith.truncf %157 : vector<4x16x8xf32> to vector<4x16x8xbf16>
    %159 = vector.extract_strided_slice %8 {offsets = [0, 48], sizes = [64, 8], strides = [1, 1]} : vector<64x64xf32> to vector<64x8xf32>
    %160 = vector.shape_cast %159 : vector<64x8xf32> to vector<4x16x8xf32>
    %161 = arith.truncf %160 : vector<4x16x8xf32> to vector<4x16x8xbf16>
    "tpu.trace_start"() <{level = 10 : i32, message = "wld,wmd->wlm"}> : () -> ()
    %cst_40 = arith.constant dense<0.000000e+00> : vector<4x16x16xf32>
    %162 = tpu.matmul %155, %158, %cst_40 {dimension_numbers = #tpu.dot_dimension_numbers<[2], [2], [1], [1], [0, 0, 0, 1, 1, 1], [0], [0]>} : vector<4x16x8xbf16>, vector<4x16x8xbf16>, vector<4x16x16xf32> -> vector<4x16x16xf32>
    "tpu.trace_stop"() : () -> ()
    %cst_41 = arith.constant 0.353553385 : f32
    %163 = vector.broadcast %cst_41 : f32 to vector<4x16x16xf32>
    %164 = arith.mulf %162, %163 : vector<4x16x16xf32>
    %cst_42 = arith.constant dense<0xFF800000> : vector<4x16xf32>
    %165 = vector.multi_reduction <maximumf>, %164, %cst_42 [2] : vector<4x16x16xf32> to vector<4x16xf32>
    %166 = vector.shape_cast %165 : vector<4x16xf32> to vector<4x16x1xf32>
    %167 = vector.broadcast %166 : vector<4x16x1xf32> to vector<4x16x16xf32>
    %168 = arith.subf %164, %167 : vector<4x16x16xf32>
    %169 = math.exp %168 : vector<4x16x16xf32>
    %cst_43 = arith.constant dense<0.000000e+00> : vector<4x16xf32>
    %170 = vector.multi_reduction <add>, %169, %cst_43 [2] : vector<4x16x16xf32> to vector<4x16xf32>
    %171 = vector.shape_cast %170 : vector<4x16xf32> to vector<4x16x1xf32>
    %172 = vector.broadcast %171 : vector<4x16x1xf32> to vector<4x16x16xf32>
    %173 = arith.divf %169, %172 : vector<4x16x16xf32>
    %174 = arith.truncf %173 : vector<4x16x16xf32> to vector<4x16x16xbf16>
    "tpu.trace_start"() <{level = 10 : i32, message = "wlm,wmd->wld"}> : () -> ()
    %cst_44 = arith.constant dense<0.000000e+00> : vector<4x16x8xf32>
    %175 = tpu.matmul %174, %161, %cst_44 {dimension_numbers = #tpu.dot_dimension_numbers<[2], [1], [1], [2], [0, 0, 0, 1, 1, 2], [0], [0]>} : vector<4x16x16xbf16>, vector<4x16x8xbf16>, vector<4x16x8xf32> -> vector<4x16x8xf32>
    "tpu.trace_stop"() : () -> ()
    %176 = vector.shape_cast %175 : vector<4x16x8xf32> to vector<64x8xf32>
    %177 = vector.extract_strided_slice %4 {offsets = [0, 56], sizes = [64, 8], strides = [1, 1]} : vector<64x64xf32> to vector<64x8xf32>
    %178 = vector.shape_cast %177 : vector<64x8xf32> to vector<4x16x8xf32>
    %179 = arith.truncf %178 : vector<4x16x8xf32> to vector<4x16x8xbf16>
    %180 = vector.extract_strided_slice %6 {offsets = [0, 56], sizes = [64, 8], strides = [1, 1]} : vector<64x64xf32> to vector<64x8xf32>
    %181 = vector.shape_cast %180 : vector<64x8xf32> to vector<4x16x8xf32>
    %182 = arith.truncf %181 : vector<4x16x8xf32> to vector<4x16x8xbf16>
    %183 = vector.extract_strided_slice %8 {offsets = [0, 56], sizes = [64, 8], strides = [1, 1]} : vector<64x64xf32> to vector<64x8xf32>
    %184 = vector.shape_cast %183 : vector<64x8xf32> to vector<4x16x8xf32>
    %185 = arith.truncf %184 : vector<4x16x8xf32> to vector<4x16x8xbf16>
    "tpu.trace_start"() <{level = 10 : i32, message = "wld,wmd->wlm"}> : () -> ()
    %cst_45 = arith.constant dense<0.000000e+00> : vector<4x16x16xf32>
    %186 = tpu.matmul %179, %182, %cst_45 {dimension_numbers = #tpu.dot_dimension_numbers<[2], [2], [1], [1], [0, 0, 0, 1, 1, 1], [0], [0]>} : vector<4x16x8xbf16>, vector<4x16x8xbf16>, vector<4x16x16xf32> -> vector<4x16x16xf32>
    "tpu.trace_stop"() : () -> ()
    %cst_46 = arith.constant 0.353553385 : f32
    %187 = vector.broadcast %cst_46 : f32 to vector<4x16x16xf32>
    %188 = arith.mulf %186, %187 : vector<4x16x16xf32>
    %cst_47 = arith.constant dense<0xFF800000> : vector<4x16xf32>
    %189 = vector.multi_reduction <maximumf>, %188, %cst_47 [2] : vector<4x16x16xf32> to vector<4x16xf32>
    %190 = vector.shape_cast %189 : vector<4x16xf32> to vector<4x16x1xf32>
    %191 = vector.broadcast %190 : vector<4x16x1xf32> to vector<4x16x16xf32>
    %192 = arith.subf %188, %191 : vector<4x16x16xf32>
    %193 = math.exp %192 : vector<4x16x16xf32>
    %cst_48 = arith.constant dense<0.000000e+00> : vector<4x16xf32>
    %194 = vector.multi_reduction <add>, %193, %cst_48 [2] : vector<4x16x16xf32> to vector<4x16xf32>
    %195 = vector.shape_cast %194 : vector<4x16xf32> to vector<4x16x1xf32>
    %196 = vector.broadcast %195 : vector<4x16x1xf32> to vector<4x16x16xf32>
    %197 = arith.divf %193, %196 : vector<4x16x16xf32>
    %198 = arith.truncf %197 : vector<4x16x16xf32> to vector<4x16x16xbf16>
    "tpu.trace_start"() <{level = 10 : i32, message = "wlm,wmd->wld"}> : () -> ()
    %cst_49 = arith.constant dense<0.000000e+00> : vector<4x16x8xf32>
    %199 = tpu.matmul %198, %185, %cst_49 {dimension_numbers = #tpu.dot_dimension_numbers<[2], [1], [1], [2], [0, 0, 0, 1, 1, 2], [0], [0]>} : vector<4x16x16xbf16>, vector<4x16x8xbf16>, vector<4x16x8xf32> -> vector<4x16x8xf32>
    "tpu.trace_stop"() : () -> ()
    %200 = vector.shape_cast %199 : vector<4x16x8xf32> to vector<64x8xf32>
    %201 = tpu.concatenate %32, %56, %80, %104, %128, %152, %176, %200 in 1 : vector<64x8xf32>, vector<64x8xf32>, vector<64x8xf32>, vector<64x8xf32>, vector<64x8xf32>, vector<64x8xf32>, vector<64x8xf32>, vector<64x8xf32> -> vector<64x64xf32>
    %202 = arith.truncf %201 : vector<64x64xf32> to vector<64x64xbf16>
    %c0_50 = arith.constant 0 : index
    %c0_51 = arith.constant 0 : index
    %203 = vector.load %arg6[%c0_50, %c0_51] : memref<64x64xbf16, #tpu.memory_space<vmem>>, vector<64x64xbf16>
    %cst_52 = arith.constant dense<0.000000e+00> : vector<64x64xf32>
    %204 = tpu.matmul %202, %203, %cst_52 {dimension_numbers = #tpu.dot_dimension_numbers<[1], [0], [0], [1], [0, 0, 1, 1], [], []>} : vector<64x64xbf16>, vector<64x64xbf16>, vector<64x64xf32> -> vector<64x64xf32>
    %c0_53 = arith.constant 0 : index
    %c0_54 = arith.constant 0 : index
    %205 = vector.load %arg7[%c0_53, %c0_54] : memref<1x64xf32, #tpu.memory_space<vmem>>, vector<1x64xf32>
    %206 = vector.broadcast %205 : vector<1x64xf32> to vector<64x64xf32>
    %207 = arith.addf %204, %206 : vector<64x64xf32>
    %c0_55 = arith.constant 0 : index
    %c0_56 = arith.constant 0 : index
    %c0_57 = arith.constant 0 : index
    %208 = vector.load %arg8[%c0_55, %c0_56, %c0_57] : memref<1x64x64xf32, #tpu.memory_space<vmem>>, vector<1x64x64xf32>
    %209 = vector.shape_cast %208 : vector<1x64x64xf32> to vector<64x64xf32>
    %210 = vector.shape_cast %207 : vector<64x64xf32> to vector<1x64x64xf32>
    tpu.vector_store %arg8[%c0_55, %c0_56, %c0_57], %210 {strides = array<i32>} : memref<1x64x64xf32, #tpu.memory_space<vmem>>, vector<1x64x64xf32>,
    return
  }
  func.func @transform_0(%arg0: i32, %arg1: i32) -> (i32, i32, i32) {
    %c0_i32 = arith.constant 0 : i32
    %c0_i32_0 = arith.constant 0 : i32
    return %arg0, %arg1, %c0_i32 : i32, i32, i32
  }
  func.func @transform_1(%arg0: i32, %arg1: i32) -> (i32, i32) {
    %c0_i32 = arith.constant 0 : i32
    %c0_i32_0 = arith.constant 0 : i32
    %c0_i32_1 = arith.constant 0 : i32
    return %c0_i32, %c0_i32_0 : i32, i32
  }
  func.func @transform_2(%arg0: i32, %arg1: i32) -> (i32, i32) {
    %c0_i32 = arith.constant 0 : i32
    %c0_i32_0 = arith.constant 0 : i32
    %c0_i32_1 = arith.constant 0 : i32
    return %c0_i32, %c0_i32_0 : i32, i32
  }
  func.func @transform_3(%arg0: i32, %arg1: i32) -> (i32, i32) {
    %c0_i32 = arith.constant 0 : i32
    %c0_i32_0 = arith.constant 0 : i32
    %c0_i32_1 = arith.constant 0 : i32
    return %c0_i32, %c0_i32_0 : i32, i32
  }
  func.func @transform_4(%arg0: i32, %arg1: i32) -> (i32, i32) {
    %c0_i32 = arith.constant 0 : i32
    %c0_i32_0 = arith.constant 0 : i32
    %c0_i32_1 = arith.constant 0 : i32
    return %c0_i32, %c0_i32_0 : i32, i32
  }
  func.func @transform_5(%arg0: i32, %arg1: i32) -> (i32, i32) {
    %c0_i32 = arith.constant 0 : i32
    %c0_i32_0 = arith.constant 0 : i32
    %c0_i32_1 = arith.constant 0 : i32
    return %c0_i32, %c0_i32_0 : i32, i32
  }
  func.func @transform_6(%arg0: i32, %arg1: i32) -> (i32, i32, i32) {
    %c0_i32 = arith.constant 0 : i32
    %c0_i32_0 = arith.constant 0 : i32
    return %arg0, %arg1, %c0_i32 : i32, i32, i32
  }
}

</mosaic_0001>

<bundles_post_ra>
// kernel: self_attention_forward.1
= control target key start
LH: loop header
LB: loop body
LE: loop exit
PB: predicated region body
PF: predicated region fallthrough
CT: control target
= control target key end

     0   :  { %11 = vsyncpa [#allocation3], 0  ;;  %s6543_s0 = inlined_call_operand.vmem [shape: f32[2,64,64], index: 0, kind: input, shape index: {}]   ;;  %s6544_s1 = inlined_call_operand.vmem [shape: bf16[64,64], index: 1, kind: input, shape index: {}]   ;;  %s6545_s2 = inlined_call_operand.vmem [shape: bf16[64,64], index: 2, kind: input, shape index: {}]   ;;  %s6546_s3 = inlined_call_operand.vmem [shape: bf16[64,64], index: 3, kind: input, shape index: {}]   ;;  %s6547_s4 = inlined_call_operand.vmem [shape: bf16[64,64], index: 4, kind: input, shape index: {}]   ;;  %s6548_s5 = inlined_call_operand.vmem [shape: f32[1,64], index: 5, kind: input, shape index: {}]   ;;  %s6549_s6 = inlined_call_operand.hbm [shape: f32[2,64,64], index: 6, kind: output, shape index: {}]  }
   0x1   :  { %13 = vsyncpa [#allocation3 + $0x1], 0  ;;  %s5035_s21 = smov 0   ;;  %s5037_s22 = smov 0  }
   0x2   :  { %s5039_s23 = smov 0   ;;  %s5041_s24 = smov 0  }
   0x3   :  { %s5043_s25 = smov 0   ;;  %s5045_s26 = smov 0  }
   0x4 LB: > { %s4255_s27 = sadd.s32 4294967295, %s4983_s26   ;;  %s4256_s28 = sadd.s32 4294967294, %s4983_s26   ;;  %s4983_s26 = sphi %s5045_s26, %s19_s26   ;;  %s4979_s25 = sphi %s5043_s25, %s6651_s25   ;;  %s4975_s24 = sphi %s5041_s24, %s6650_s24   ;;  %s4971_s23 = sphi %s5039_s23, %s6649_s23   ;;  %s4967_s22 = sphi %s5037_s22, %s6648_s22   ;;  %s4963_s21 = sphi %s5035_s21, %s6647_s21  }
   0x5   : > { %s31_s29 = sadd.s32 1, %s4979_s25  ;;  %s173_s30 = sadd.s32 1, %s4971_s23 }
   0x6   : > { %p33_p0 = scmp.ge.s32.totalorder %s31_s29, 2  ;;  %p183_p1 = scmp.ne.s32.totalorder %s4971_s23, %s4967_s22 }
   0x7   : > { %p184_p2 = scmp.eq.s32.totalorder %s4255_s27, 1  ;;  %p189_p3 = scmp.ne.s32.totalorder %s4967_s22, %s4963_s21 }
   0x8   : > { %s6653_s29 = smov (%p33_p0, %s31_s29), 0  ;;  %p190_p5 = scmp.eq.s32.totalorder %s4256_s28, 1 }
   0x9   : > { %p5075_p4 = por %p184_p2, %p183_p1  ;;  %s168_s8 = ssub.s32 %s4979_s25, %s6653_s29 }
   0xa   : > { %p4259_p6 = scmp.ge.s32.totalorder %s4983_s26, 1  ;;  %p171_p7 = scmp.eq.s32.totalorder %s168_s8, 0 }
   0xb   : > { %p5082_p8 = por %p190_p5, %p189_p3  ;;  %p236_p9 = scmp.lt.s32.totalorder %s4983_s26, 3 }
   0xc   : > { %s5088_s10 = scalar_select %p171_p7, %s4971_s23, %s173_s30  }
   0xd   : > { %p237_p10 = pnand %p4259_p6, %p236_p9 }
   0xf   : > { %240 = sbr.rel (%p237_p10) target bundleno = 4497 (0x1191), region = 44 }
  0x14   : > { %v4416_v0 = vld [vmem:[%s6544_s1 + $0x18] sm:$0xff]  ;;  %p271_p11 = scmp.lt.s32.totalorder %s4975_s24, 1  ;;  %v4415_v1 = vld [vmem:[%s6544_s1 + $0x10] sm:$0xff]  ;;  %v4414_v2 = vld [vmem:[%s6544_s1 + $0x8] sm:$0xff]  ;;  %vm326_vm0 = vcmask 523264   ;;  %vm524_vm1 = vcmask 64512  }
  0x15   : > { %4430 = vmatpush.bf16.msra.mxu1 %v4416_v0  ;;  %343 = vmatpush.bf16.msra.mxu0 %v4416_v0  ;;  %v4413_v3 = vld [vmem:[%s6544_s1] sm:$0xff]  ;;  %v4420_v8 = vld [vmem:[%s6545_s2 + $0x18] sm:$0xff]  ;;  %v4419_v11 = vld [vmem:[%s6545_s2 + $0x10] sm:$0xff]  ;;  %vm643_vm2 = vcmask 130048   ;;  %s4985_s12 = smov 120   ;;  %s4986_s13 = smov 112  }
  0x16   : > { %s272_s15 = scalar_select %p271_p11, %s4975_s24, 1  ;;  %v4418_v12 = vld [vmem:[%s6545_s2 + $0x8] sm:$0xff]  ;;  %v4417_v13 = vld [vmem:[%s6545_s2] sm:$0xff]  ;;  %v4424_v20 = vld [vmem:[%s6546_s3 + $0x18] sm:$0xff] }
  0x17   : > { %465 = vmatpush.bf16.msra.mxu2 %v4424_v20  ;;  %v4423_v21 = vld [vmem:[%s6546_s3 + $0x10] sm:$0xff]  ;;  %v4422_v22 = vld [vmem:[%s6546_s3 + $0x8] sm:$0xff]  ;;  %v4421_v23 = vld [vmem:[%s6546_s3] sm:$0xff]  ;;  %s4987_s14 = smov 104   ;;  %s4990_s17 = smov 80  }
  0x18   : > { %s4412_s16 = sshll.u32 %s272_s15, 6  ;;  %s4988_s15 = smov 96  }
  0x19   : > { %4431 = vmatpush.bf16.msra.mxu1 %v4415_v1  ;;  %s278_s27 = scalar_lea.vmem %s6543_s0, %s4412_s16  ;;  %344 = vmatpush.bf16.msra.mxu0 %v4415_v1  ;;  %s4989_s16 = smov 88  }
  0x1a   : > { %v288_v4 = vld [vmem:[%s278_s27 + $0x30] sm:$0xff]  ;;  %v289_v5 = vld [vmem:[%s278_s27 + $0x38] sm:$0xff]  ;;  %v282_v6 = vld [vmem:[%s278_s27] sm:$0xff]  ;;  %s4991_s18 = smov 72   ;;  %s4992_s19 = smov 24  }
  0x1b   : > { %v283_v7 = vld [vmem:[%s278_s27 + $0x8] sm:$0xff]  ;;  %v293_v9 = vpack.c.bf16 %v289_v5, %v288_v4  ;;  %v284_v14 = vld [vmem:[%s278_s27 + $0x10] sm:$0xff]  ;;  %v285_v15 = vld [vmem:[%s278_s27 + $0x18] sm:$0xff]  ;;  %466 = vmatpush.bf16.msra.mxu2 %v4423_v21  ;;  %s4993_s20 = smov 16   ;;  %s4994_s28 = smov 8  }
  0x1c   : > { %v290_v10 = vpack.c.bf16 %v283_v7, %v282_v6  ;;  %v291_v16 = vpack.c.bf16 %v285_v15, %v284_v14  ;;  %v286_v17 = vld [vmem:[%s278_s27 + $0x20] sm:$0xff]  ;;  %v287_v18 = vld [vmem:[%s278_s27 + $0x28] sm:$0xff]  ;;  %s4995_s30 = smov 48   ;;  %s4996_s8 = smov 40  }
  0x1d   : > { %4432 = vmatpush.bf16.msra.mxu1 %v4414_v2  ;;  %345 = vmatpush.bf16.msra.mxu0 %v4414_v2  ;;  %v292_v19 = vpack.c.bf16 %v287_v18, %v286_v17  ;;  %s4997_s27 = smov 32  }
  0x1f   : > { %467 = vmatpush.bf16.msra.mxu2 %v4422_v22 }
  0x21   : > { %4433 = vmatpush.bf16.msra.mxu1 %v4413_v3  ;;  %346 = vmatpush.bf16.msra.mxu0 %v4413_v3 }
  0x23   : > { %468 = vmatpush.bf16.msra.mxu2 %v4421_v23 }
  0x24   : > { %4282 = vmatmul.msk.bf16.vlgmr.msra.gmra.mxu1 %vm326_vm0, %v293_v9  ;;  %4279 = vmatmul.msk.bf16.vlgmr.msra.gmra.mxu0 %vm326_vm0, %v290_v10 }
  0x25   : > { %404 = vmatpush.bf16.msrb.mxu1 %v4420_v8 }
  0x26   : > { %4319 = vmatmul.msk.bf16.vlgmr.msra.gmra.mxu2 %vm326_vm0, %v290_v10 }
  0x29   : > { %405 = vmatpush.bf16.msrb.mxu1 %v4419_v11 }
  0x2d   : > { %406 = vmatpush.bf16.msrb.mxu1 %v4418_v12 }
  0x31   : > { %407 = vmatpush.bf16.msrb.mxu1 %v4417_v13 }
  0x34   : > { %4299 = vmatmul.msk.bf16.vlgmr.msrb.gmra.mxu1 %vm326_vm0, %v290_v10  ;;  %4280 = vmatmul.msk.bf16.gmra.mxu0 %vm326_vm0, %v291_v16 }
  0x36   : > { %4320 = vmatmul.msk.bf16.gmra.mxu2 %vm326_vm0, %v291_v16 }
  0x44   : > { %4300 = vmatmul.msk.bf16.gmra.mxu1 %vm326_vm0, %v291_v16  ;;  %4281 = vmatmul.msk.bf16.gmra.mxu0 %vm326_vm0, %v292_v19 }
  0x46   : > { %4321 = vmatmul.msk.bf16.gmra.mxu2 %vm326_vm0, %v292_v19 }
  0x54   : > { %4301 = vmatmul.msk.bf16.gmra.mxu1 %vm326_vm0, %v292_v19 }
  0x56   : > { %4322 = vmatmul.msk.bf16.gmra.mxu2 %vm326_vm0, %v293_v9 }
  0x64   : > { %4302 = vmatmul.msk.bf16.gmra.mxu1 %vm326_vm0, %v293_v9 }
  0xa1   : > { %v5143_v24 = vpop.f32.mrf.mxu1  ;;  %v348_v26 = vpop.f32.mrf.mxu0 }
  0xa2   : > { %v490_v35 = vpack.c.bf16 %v348_v26, %v348_v26  ;;  %v496_v26 = vpack.c.bf16 %v5143_v24, %v5143_v24 }
  0xa4   : > { %v516_v40 = vunpack.c.l.b16 %v490_v35 }
  0xa9   : > { %v5145_v25 = vpop.f32.mrf.mxu1  ;;  %v350_v28 = vpop.f32.mrf.mxu0 }
  0xaa   : > { %v491_v37 = vpack.c.bf16 %v350_v28, %v350_v28  ;;  %v470_v59 = vpop.f32.mrf.mxu2  ;;  %v497_v21 = vpack.c.bf16 %v5145_v25, %v5145_v25 }
  0xab   : > { %v506_v10 = vpack.c.bf16 %v470_v59, %v470_v59 }
  0xac   : > { %v517_v41 = vunpack.c.l.b16 %v491_v37 }
  0xad   : > { %v851_v16 = vunpack.c.l.b16 %v506_v10 }
  0xae   : > { %v5151_v42 = vpack.c.b16 %v517_v41, %v516_v40 }
  0xb1   : > { %v409_v27 = vpop.f32.mrf.mxu1  ;;  %v353_v34 = vpop.f32.mrf.mxu0 }
  0xb2   : > { %v498_v29 = vpack.c.bf16 %v409_v27, %v409_v27  ;;  %v492_v49 = vpack.c.bf16 %v353_v34, %v353_v34  ;;  %v472_v5 = vpop.f32.mrf.mxu2 }
  0xb3   : > { %v507_v11 = vpack.c.bf16 %v472_v5, %v472_v5 }
  0xb4   : > { %v521_v32 = vunpack.c.l.b16 %v498_v29  ;;  %v547_v55 = vunpack.c.l.b16 %v492_v49 }
  0xb5   : > { %v852_v17 = vunpack.c.l.b16 %v507_v11 }
  0xb7   : > { %v5175_v23 = vpack.c.b16 %v852_v17, %v851_v16 }
  0xb9   : > { %v411_v30 = vpop.f32.mrf.mxu1  ;;  %v355_v43 = vpop.f32.mrf.mxu0 }
  0xba   : > { %v499_v31 = vpack.c.bf16 %v411_v30, %v411_v30  ;;  %v493_v51 = vpack.c.bf16 %v355_v43, %v355_v43  ;;  %v475_v13 = vpop.f32.mrf.mxu2 }
  0xbb   : > { %v508_v20 = vpack.c.bf16 %v475_v13, %v475_v13 }
  0xbc   : > { %v522_v33 = vunpack.c.l.b16 %v499_v31  ;;  %v548_v56 = vunpack.c.l.b16 %v493_v51  ;;  %v608_v31 = vunpack.c.l.b16 %v497_v21 }
  0xbd   : > { %v879_v29 = vunpack.c.l.b16 %v508_v20 }
  0xbe   : > { %v5147_v36 = vpack.c.b16 %v522_v33, %v521_v32  ;;  %v5159_v57 = vpack.c.b16 %v548_v56, %v547_v55  ;;  %v607_v33 = vunpack.c.l.b16 %v496_v26 }
  0xc0   : > { %v529_v38 = vsel %vm524_vm1, %v5147_v36, 0  ;;  %v5184_v34 = vpack.c.b16 %v608_v31, %v607_v33 }
  0xc1   : > { %v414_v39 = vpop.f32.mrf.mxu1  ;;  %538 = vmatpush.bf16.xpose.msrb.mxu2 %v529_v38  ;;  %v358_v54 = vpop.f32.mrf.mxu0 }
  0xc2   : > { %v500_v44 = vpack.c.bf16 %v414_v39, %v414_v39  ;;  %v494_v1 = vpack.c.bf16 %v358_v54, %v358_v54  ;;  %v477_v28 = vpop.f32.mrf.mxu2 }
  0xc3   : > { %v509_v30 = vpack.c.bf16 %v477_v28, %v477_v28 }
  0xc4   : > { %v552_v47 = vunpack.c.l.b16 %v500_v44  ;;  %v577_v7 = vunpack.c.l.b16 %v494_v1 }
  0xc5   : > { %v880_v32 = vunpack.c.l.b16 %v509_v30 }
  0xc7   : > { %v5182_v25 = vpack.c.b16 %v880_v32, %v879_v29 }
  0xc8   : > { %4323 = vmatmul.msk.bf16.vlgmr.msrb.gmra.mxu2 %vm524_vm1, %v5151_v42 }
  0xc9   : > { %v416_v45 = vpop.f32.mrf.mxu1  ;;  %v360_v62 = vpop.f32.mrf.mxu0  ;;  %893 = vmatpush.bf16.msrb.mxu0 %v5182_v25 }
  0xca   : > { %v501_v46 = vpack.c.bf16 %v416_v45, %v416_v45  ;;  %v495_v3 = vpack.c.bf16 %v360_v62, %v360_v62  ;;  %v480_v24 = vpop.f32.mrf.mxu2 }
  0xcb   : > { %v510_v35 = vpack.c.bf16 %v480_v24, %v480_v24 }
  0xcc   : > { %v553_v48 = vunpack.c.l.b16 %v501_v46  ;;  %v578_v8 = vunpack.c.l.b16 %v495_v3 }
  0xcd   : > { %v907_v38 = vunpack.c.l.b16 %v510_v35 }
  0xce   : > { %v5155_v50 = vpack.c.b16 %v553_v48, %v552_v47  ;;  %v5167_v9 = vpack.c.b16 %v578_v8, %v577_v7 }
  0xd0   : > { %v559_v52 = vsel %vm524_vm1, %v5155_v50, 0 }
  0xd1   : > { %v419_v53 = vpop.f32.mrf.mxu1  ;;  %568 = vmatpush.bf16.xpose.msra.mxu3 %v559_v52 }
  0xd2   : > { %v502_v58 = vpack.c.bf16 %v419_v53, %v419_v53  ;;  %v482_v37 = vpop.f32.mrf.mxu2 }
  0xd3   : > { %v511_v39 = vpack.c.bf16 %v482_v37, %v482_v37 }
  0xd4   : > { %v582_v63 = vunpack.c.l.b16 %v502_v58 }
  0xd5   : > { %v908_v40 = vunpack.c.l.b16 %v511_v39 }
  0xd7   : > { %v5189_v41 = vpack.c.b16 %v908_v40, %v907_v38 }
  0xd8   : > { %4324 = vmatmul.msk.bf16.vlgmr.msra.gmra.mxu3 %vm524_vm1, %v5159_v57 }
  0xd9   : > { %v421_v60 = vpop.f32.mrf.mxu1  ;;  %921 = vmatpush.bf16.msra.mxu1 %v5189_v41 }
  0xda   : > { %v503_v61 = vpack.c.bf16 %v421_v60, %v421_v60  ;;  %v485_v43 = vpop.f32.mrf.mxu2 }
  0xdb   : > { %v512_v44 = vpack.c.bf16 %v485_v43, %v485_v43 }
  0xdc   : > { %v583_v0 = vunpack.c.l.b16 %v503_v61 }
  0xdd   : > { %v935_v46 = vunpack.c.l.b16 %v512_v44 }
  0xde   : > { %v5163_v2 = vpack.c.b16 %v583_v0, %v582_v63 }
  0xe0   : > { %v589_v4 = vsel %vm524_vm1, %v5163_v2, 0 }
  0xe1   : > { %v424_v6 = vpop.f32.mrf.mxu1  ;;  %598 = vmatpush.bf16.xpose.msrb.mxu3 %v589_v4 }
  0xe2   : > { %v504_v12 = vpack.c.bf16 %v424_v6, %v424_v6  ;;  %v487_v45 = vpop.f32.mrf.mxu2 }
  0xe3   : > { %v513_v47 = vpack.c.bf16 %v487_v45, %v487_v45 }
  0xe4   : > { %v612_v18 = vunpack.c.l.b16 %v504_v12 }
  0xe5   : > { %v936_v48 = vunpack.c.l.b16 %v513_v47 }
  0xe7   : > { %v5192_v49 = vpack.c.b16 %v936_v48, %v935_v46 }
  0xe8   : > { %4325 = vmatmul.msk.bf16.vlgmr.msrb.gmra.mxu3 %vm524_vm1, %v5167_v9 }
  0xe9   : > { %v426_v14 = vpop.f32.mrf.mxu1  ;;  %949 = vmatpush.bf16.msra.mxu2 %v5192_v49 }
  0xea   : > { %v505_v15 = vpack.c.bf16 %v426_v14, %v426_v14 }
  0xec   : > { %v613_v19 = vunpack.c.l.b16 %v505_v15 }
  0xee   : > { %v5173_v22 = vpack.c.b16 %v613_v19, %v612_v18 }
  0xf0   : > { %v619_v27 = vsel %vm524_vm1, %v5173_v22, 0 }
  0xf1   : > { %628 = vmatpush.bf16.xpose.msra.mxu3 %v619_v27 }
  0xf8   : > { %4326 = vmatmul.msk.bf16.vlgmr.msra.gmra.mxu3 %vm524_vm1, %v5184_v34 }
  0xf9   : > { %865 = vmatpush.bf16.msrb.mxu3 %v5175_v23 }
 0x14b   : > { %v540_v51 = vpop.f32.mrf.mxu2 }
 0x14c   : > { %v635_v52 = vmul.f32 0.35355338, %v540_v51 }
 0x14e   : > { %v644_v53 = vsel %vm643_vm2, %v635_v52, -inf }
 0x14f   : > { %645 = vmax.xlane.f32.xlu0 %v644_v53 }
 0x153   : > { %v542_v54 = vpop.f32.mrf.mxu2 }
 0x154   : > { %v636_v55 = vmul.f32 0.35355338, %v542_v54 }
 0x156   : > { %v647_v56 = vsel %vm643_vm2, %v636_v55, -inf }
 0x157   : > { %648 = vmax.xlane.f32.xlu0 %v647_v56 }
 0x15b   : > { %v570_v58 = vpop.f32.mrf.mxu3 }
 0x15c   : > { %v637_v12 = vmul.f32 0.35355338, %v570_v58 }
 0x15e   : > { %v650_v13 = vsel %vm643_vm2, %v637_v12, -inf }
 0x163   : > { %v572_v59 = vpop.f32.mrf.mxu3 }
 0x164   : > { %v5201_v3 = vmul.f32 0.35355338, %v572_v59 }
 0x166   : > { %v653_v6 = vsel %vm643_vm2, %v5201_v3, -inf }
 0x16b   : > { %958 = vrot.lane.b32.xlu0 %v5147_v36, %s4985_s12  ;;  %v600_v60 = vpop.f32.mrf.mxu3 }
 0x16c   : > { %v639_v61 = vmul.f32 0.35355338, %v600_v60 }
 0x16e   : > { %v656_v62 = vsel %vm643_vm2, %v639_v61, -inf }
 0x16f   : > { %657 = vmax.xlane.f32.xlu2 %v656_v62 }
 0x173   : > { %v602_v63 = vpop.f32.mrf.mxu3 }
 0x174   : > { %v640_v0 = vmul.f32 0.35355338, %v602_v63 }
 0x176   : > { %v659_v1 = vsel %vm643_vm2, %v640_v0, -inf }
 0x177   : > { %660 = vmax.xlane.f32.xlu2 %v659_v1 }
 0x17b   : > { %v630_v4 = vpop.f32.mrf.mxu3 }
 0x17c   : > { %v641_v5 = vmul.f32 0.35355338, %v630_v4 }
 0x17e   : > { %v662_v7 = vsel %vm643_vm2, %v641_v5, -inf }
 0x17f   : > { %654 = vmax.xlane.f32.xlu2 %v653_v6  ;;  %663 = vmax.xlane.f32.xlu1 %v662_v7 }
 0x183   : > { %v632_v8 = vpop.f32.mrf.mxu3 }
 0x184   : > { %v642_v10 = vmul.f32 0.35355338, %v632_v8 }
 0x186   : > { %v665_v11 = vsel %vm643_vm2, %v642_v10, -inf }
 0x187   : > { %666 = vmax.xlane.f32.xlu1 %v665_v11 }
 0x18f   : > { %651 = vmax.xlane.f32.xlu1 %v650_v13 }
 0x1c2   : > { %v646_v14 = vpop.xlane.xlu0 %645 }
 0x1c3   : > { %v668_v15 = vsub.f32 %v635_v52, %v646_v14 }
 0x1c5   : > { %v676_v16 = vmul.f32 1.442695, %v668_v15 }
 0x1c7   : > { %4649 = vpow2.f32 %v676_v16 }
 0x1ca   : > { %v649_v17 = vpop.xlane.xlu0 %648 }
 0x1cb   : > { %v669_v18 = vsub.f32 %v636_v55, %v649_v17 }
 0x1cd   : > { %v5208_v19 = vpop.eup %4649  ;;  %v678_v20 = vmul.f32 1.442695, %v669_v18 }
 0x1ce   : > { %v692_v21 = vsel %vm643_vm2, %v5208_v19, 0.0 }
 0x1cf   : > { %4651 = vpow2.f32 %v678_v20  ;;  %693 = vadd.xlane.f32.xlu0 %v692_v21 }
 0x1d5   : > { %v5212_v26 = vpop.eup %4651 }
 0x1d6   : > { %v695_v27 = vsel %vm643_vm2, %v5212_v26, 0.0 }
 0x1d7   : > { %696 = vadd.xlane.f32.xlu1 %v695_v27 }
 0x1dd   : > { %v959_v28 = vpop.permute.xlu0 %958 }
 0x1de   : > { %v964_v29 = vsel %vm524_vm1, %v959_v28, 0 }
 0x1df   : > { %973 = vmatpush.bf16.xpose.msra.mxu3 %v964_v29 }
 0x1e2   : > { %v658_v30 = vpop.xlane.xlu2 %657 }
 0x1e3   : > { %v672_v51 = vsub.f32 %v639_v61, %v658_v30 }
 0x1e5   : > { %v684_v52 = vmul.f32 1.442695, %v672_v51 }
 0x1ea   : > { %v661_v31 = vpop.xlane.xlu2 %660 }
 0x1eb   : > { %v673_v32 = vsub.f32 %v640_v0, %v661_v31 }
 0x1ed   : > { %v686_v33 = vmul.f32 1.442695, %v673_v32 }
 0x1ef   : > { %4653 = vpow2.f32 %v686_v33 }
 0x1f0   : > { %956 = vrot.lane.b32.xlu1 %v5151_v42, %s4985_s12 }
 0x1f2   : > { %v664_v24 = vpop.xlane.xlu1 %663  ;;  %v655_v55 = vpop.xlane.xlu2 %654 }
 0x1f3   : > { %v674_v35 = vsub.f32 %v641_v5, %v664_v24  ;;  %v671_v56 = vsub.f32 %v5201_v3, %v655_v55 }
 0x1f5   : > { %v5219_v37 = vpop.eup %4653  ;;  %v688_v38 = vmul.f32 1.442695, %v674_v35  ;;  %v682_v59 = vmul.f32 1.442695, %v671_v56 }
 0x1f6   : > { %v707_v39 = vsel %vm643_vm2, %v5219_v37, 0.0 }
 0x1f7   : > { %708 = vadd.xlane.f32.xlu2 %v707_v39  ;;  %4655 = vpow2.f32 %v688_v38 }
 0x1fa   : > { %v667_v40 = vpop.xlane.xlu1 %666 }
 0x1fb   : > { %v675_v43 = vsub.f32 %v642_v10, %v667_v40 }
 0x1fd   : > { %v690_v44 = vmul.f32 1.442695, %v675_v43  ;;  %v5223_v45 = vpop.eup %4655 }
 0x1fe   : > { %v710_v46 = vsel %vm643_vm2, %v5223_v45, 0.0 }
 0x1ff   : > { %4657 = vpow2.f32 %v690_v44  ;;  %711 = vadd.xlane.f32.xlu2 %v710_v46 }
 0x200   : > { %4659 = vpow2.f32 %v684_v52 }
 0x201   : > { %4661 = vpow2.f32 %v682_v59 }
 0x202   : > { %v652_v58 = vpop.xlane.xlu1 %651 }
 0x203   : > { %v670_v60 = vsub.f32 %v637_v12, %v652_v58 }
 0x205   : > { %v5227_v47 = vpop.eup %4657  ;;  %v680_v61 = vmul.f32 1.442695, %v670_v60 }
 0x206   : > { %v713_v48 = vsel %vm643_vm2, %v5227_v47, 0.0  ;;  %v5231_v53 = vpop.eup %4659 }
 0x207   : > { %714 = vadd.xlane.f32.xlu0 %v713_v48  ;;  %v704_v54 = vsel %vm643_vm2, %v5231_v53, 0.0  ;;  %4663 = vpow2.f32 %v680_v61  ;;  %v5244_v62 = vpop.eup %4661 }
 0x208   : > { %v701_v63 = vsel %vm643_vm2, %v5244_v62, 0.0 }
 0x20d   : > { %v5248_v0 = vpop.eup %4663 }
 0x20e   : > { %v698_v3 = vsel %vm643_vm2, %v5248_v0, 0.0 }
 0x217   : > { %1030 = vrot.lane.b32.xlu2 %v5173_v22, %s4985_s12 }
 0x21a   : > { %705 = vadd.xlane.f32.xlu1 %v704_v54 }
 0x21b   : > { %1028 = vrot.lane.b32.xlu0 %v5184_v34, %s4985_s12 }
 0x233   : > { %1006 = vrot.lane.b32.xlu1 %v5163_v2, %s4985_s12 }
 0x23b   : > { %1004 = vrot.lane.b32.xlu1 %v5167_v9, %s4985_s12 }
 0x240   : > { %702 = vadd.xlane.f32.xlu2 %v701_v63 }
 0x242   : > { %v694_v1 = vpop.xlane.xlu0 %693 }
 0x243   : > { %4665 = vrcp.f32 %v694_v1  ;;  %982 = vrot.lane.b32.xlu1 %v5155_v50, %s4985_s12  ;;  %v727_v10 = vand.u32 2147483648, %v694_v1  ;;  %vm721_vm4 = vweird.f32 %v694_v1  ;;  %v725_v12 = vand.u32 2147483647, %v694_v1 }
 0x245   : > { %699 = vadd.xlane.f32.xlu0 %v698_v3  ;;  %v728_v16 = vor.u32 1.1754944e-38, %v727_v10  ;;  %vm726_vm6 = vcmp.eq.f32.partialorder %v725_v12, 8.507059e+37 }
 0x249   : > { %v4666_v4 = vpop.eup %4665 }
 0x24a   : > { %v717_v5 = vmul.f32 %v4666_v4, %v694_v1  ;;  %v697_v6 = vpop.xlane.xlu1 %696  ;;  %vm722_vm3 = vweird.f32 %v4666_v4 }
 0x24b   : > { %4667 = vrcp.f32 %v697_v6  ;;  %980 = vrot.lane.b32.xlu1 %v5159_v57, %s4985_s12  ;;  %vm723_vm5 = vmor %vm721_vm4, %vm722_vm3  ;;  %v742_v20 = vand.u32 2147483648, %v697_v6  ;;  %v740_v27 = vand.u32 2147483647, %v697_v6  ;;  %vm736_vm8 = vweird.f32 %v697_v6 }
 0x24c   : > { %v718_v7 = vsub.f32 1.0, %v717_v5 }
 0x24d   : > { %v743_v30 = vor.u32 1.1754944e-38, %v742_v20  ;;  %vm741_vm10 = vcmp.eq.f32.partialorder %v740_v27, 8.507059e+37 }
 0x24e   : > { %v719_v8 = vmul.f32 %v4666_v4, %v718_v7 }
 0x250   : > { %v720_v11 = vadd.f32 %v4666_v4, %v719_v8 }
 0x251   : > { %v4668_v13 = vpop.eup %4667 }
 0x252   : > { %v724_v14 = vsel %vm723_vm5, %v4666_v4, %v720_v11  ;;  %v732_v15 = vmul.f32 %v4668_v13, %v697_v6  ;;  %vm737_vm7 = vweird.f32 %v4668_v13 }
 0x253   : > { %v729_v18 = vsel %vm726_vm6, %v728_v16, %v724_v14  ;;  %vm738_vm9 = vmor %vm736_vm8, %vm737_vm7 }
 0x254   : > { %v733_v17 = vsub.f32 1.0, %v732_v15  ;;  %v730_v29 = vmul.f32 %v5208_v19, %v729_v18 }
 0x256   : > { %v734_v21 = vmul.f32 %v4668_v13, %v733_v17  ;;  %v836_v24 = vpack.c.bf16 %v730_v29, %v730_v29 }
 0x258   : > { %v735_v28 = vadd.f32 %v4668_v13, %v734_v21  ;;  %v846_v38 = vunpack.c.l.b16 %v836_v24 }
 0x25a   : > { %v739_v31 = vsel %vm738_vm9, %v4668_v13, %v735_v28 }
 0x25b   : > { %v744_v32 = vsel %vm741_vm10, %v743_v30, %v739_v31 }
 0x25c   : > { %v745_v33 = vmul.f32 %v5212_v26, %v744_v32 }
 0x25e   : > { %v837_v35 = vpack.c.bf16 %v745_v33, %v745_v33 }
 0x260   : > { %v847_v39 = vunpack.c.l.b16 %v837_v35 }
 0x262   : > { %v848_v40 = vpack.c.b16 %v847_v39, %v846_v38  ;;  %v957_v44 = vpop.permute.xlu1 %956 }
 0x264   : > { %4327 = vmatmul.msk.bf16.vlgmr.msrb.gmra.mxu3 %vm643_vm2, %v848_v40 }
 0x26a   : > { %v5259_v43 = vpop.xlane.xlu2 %708 }
 0x26b   : > { %v802_v31 = vand.u32 2147483648, %v5259_v43  ;;  %vm796_vm7 = vweird.f32 %v5259_v43 }
 0x26d   : > { %v803_v35 = vor.u32 1.1754944e-38, %v802_v31 }
 0x272   : > { %v712_v46 = vpop.xlane.xlu2 %711 }
 0x273   : > { %4669 = vrcp.f32 %v712_v46  ;;  %v817_v56 = vand.u32 2147483648, %v712_v46  ;;  %vm811_vm12 = vweird.f32 %v712_v46  ;;  %v815_v60 = vand.u32 2147483647, %v712_v46 }
 0x274   : > { %4331 = vmatmul.msk.bf16.vlgmr.msra.gmra.mxu3 %vm524_vm1, %v957_v44 }
 0x275   : > { %v818_v3 = vor.u32 1.1754944e-38, %v817_v56  ;;  %vm816_vm14 = vcmp.eq.f32.partialorder %v815_v60, 8.507059e+37 }
 0x279   : > { %v4670_v19 = vpop.eup %4669 }
 0x27a   : > { %v715_v48 = vpop.xlane.xlu0 %714  ;;  %v807_v51 = vmul.f32 %v4670_v19, %v712_v46  ;;  %v1031_v52 = vpop.permute.xlu2 %1030  ;;  %vm812_vm11 = vweird.f32 %v4670_v19 }
 0x27b   : > { %4671 = vrcp.f32 %v715_v48  ;;  %v1036_v26 = vsel %vm524_vm1, %v1031_v52, 0  ;;  %vm813_vm13 = vmor %vm811_vm12, %vm812_vm11  ;;  %v832_v6 = vand.u32 2147483648, %v715_v48  ;;  %v830_v10 = vand.u32 2147483647, %v715_v48 }
 0x27c   : > { %4673 = vrcp.f32 %v5259_v43  ;;  %v808_v54 = vsub.f32 1.0, %v807_v51  ;;  %1045 = vmatpush.bf16.xpose.msrb.mxu2 %v1036_v26  ;;  %vm826_vm3 = vweird.f32 %v715_v48 }
 0x27d   : > { %v833_v13 = vor.u32 1.1754944e-38, %v832_v6  ;;  %vm831_vm5 = vcmp.eq.f32.partialorder %v830_v10, 8.507059e+37 }
 0x27e   : > { %v809_v55 = vmul.f32 %v4670_v19, %v808_v54 }
 0x280   : > { %v810_v59 = vadd.f32 %v4670_v19, %v809_v55 }
 0x281   : > { %v4672_v58 = vpop.eup %4671 }
 0x282   : > { %v4674_v61 = vpop.eup %4673  ;;  %v822_v63 = vmul.f32 %v4672_v58, %v715_v48  ;;  %v814_v1 = vsel %vm813_vm13, %v4670_v19, %v810_v59  ;;  %vm827_vm15 = vweird.f32 %v4672_v58 }
 0x283   : > { %v792_v5 = vmul.f32 %v4674_v61, %v5259_v43  ;;  %v819_v7 = vsel %vm816_vm14, %v818_v3, %v814_v1  ;;  %vm828_vm4 = vmor %vm826_vm3, %vm827_vm15  ;;  %vm797_vm6 = vweird.f32 %v4674_v61 }
 0x284   : > { %v823_v4 = vsub.f32 1.0, %v822_v63  ;;  %v820_v14 = vmul.f32 %v5223_v45, %v819_v7  ;;  %v800_v45 = vand.u32 2147483647, %v5259_v43  ;;  %vm798_vm8 = vmor %vm796_vm7, %vm797_vm6 }
 0x285   : > { %v793_v12 = vsub.f32 1.0, %v792_v5 }
 0x286   : > { %v824_v8 = vmul.f32 %v4672_v58, %v823_v4  ;;  %v842_v21 = vpack.c.bf16 %v820_v14, %v820_v14  ;;  %vm801_vm9 = vcmp.eq.f32.partialorder %v800_v45, 8.507059e+37 }
 0x287   : > { %v794_v18 = vmul.f32 %v4674_v61, %v793_v12 }
 0x288   : > { %v825_v11 = vadd.f32 %v4672_v58, %v824_v8  ;;  %v930_v29 = vunpack.c.l.b16 %v842_v21 }
 0x289   : > { %v795_v28 = vadd.f32 %v4674_v61, %v794_v18 }
 0x28a   : > { %v829_v15 = vsel %vm828_vm4, %v4672_v58, %v825_v11 }
 0x28b   : > { %v834_v16 = vsel %vm831_vm5, %v833_v13, %v829_v15  ;;  %v799_v24 = vsel %vm798_vm8, %v4674_v61, %v795_v28 }
 0x28c   : > { %v835_v17 = vmul.f32 %v5227_v47, %v834_v16  ;;  %v804_v39 = vsel %vm801_vm9, %v803_v35, %v799_v24 }
 0x28d   : > { %v706_v20 = vpop.xlane.xlu1 %705  ;;  %v805_v48 = vmul.f32 %v5219_v37, %v804_v39  ;;  %v1029_v59 = vpop.permute.xlu0 %1028 }
 0x28e   : > { %4675 = vrcp.f32 %v706_v20  ;;  %v843_v27 = vpack.c.bf16 %v835_v17, %v835_v17  ;;  %v787_v40 = vand.u32 2147483648, %v706_v20  ;;  %v785_v46 = vand.u32 2147483647, %v706_v20 }
 0x28f   : > { %vm781_vm11 = vweird.f32 %v706_v20  ;;  %v841_v54 = vpack.c.bf16 %v805_v48, %v805_v48 }
 0x290   : > { %v931_v30 = vunpack.c.l.b16 %v843_v27  ;;  %v788_v43 = vor.u32 1.1754944e-38, %v787_v40  ;;  %vm786_vm13 = vcmp.eq.f32.partialorder %v785_v46, 8.507059e+37 }
 0x291   : > { %v903_v58 = vunpack.c.l.b16 %v841_v54 }
 0x292   : > { %v932_v32 = vpack.c.b16 %v931_v30, %v930_v29 }
 0x294   : > { %v4676_v33 = vpop.eup %4675  ;;  %4330 = vmatmul.msk.bf16.vlgmr.msra.gmra.mxu2 %vm643_vm2, %v932_v32 }
 0x295   : > { %v777_v47 = vmul.f32 %v4676_v33, %v706_v20  ;;  %vm782_vm10 = vweird.f32 %v4676_v33 }
 0x296   : > { %vm783_vm12 = vmor %vm781_vm11, %vm782_vm10 }
 0x297   : > { %v778_v38 = vsub.f32 1.0, %v777_v47 }
 0x299   : > { %v779_v44 = vmul.f32 %v4676_v33, %v778_v38 }
 0x29b   : > { %v780_v19 = vadd.f32 %v4676_v33, %v779_v44 }
 0x29d   : > { %v784_v51 = vsel %vm783_vm12, %v4676_v33, %v780_v19 }
 0x29e   : > { %v789_v52 = vsel %vm786_vm13, %v788_v43, %v784_v51 }
 0x29f   : > { %v790_v26 = vmul.f32 %v5231_v53, %v789_v52 }
 0x2a1   : > { %v840_v55 = vpack.c.bf16 %v790_v26, %v790_v26 }
 0x2a3   : > { %v902_v56 = vunpack.c.l.b16 %v840_v55 }
 0x2a4   : > { %4334 = vmatmul.msk.bf16.vlgmr.msrb.gmra.mxu2 %vm524_vm1, %v1029_v59 }
 0x2a5   : > { %v1007_v60 = vpop.permute.xlu1 %1006  ;;  %v904_v61 = vpack.c.b16 %v903_v58, %v902_v56 }
 0x2a6   : > { %v1012_v63 = vsel %vm524_vm1, %v1007_v60, 0 }
 0x2a7   : > { %4329 = vmatmul.msk.bf16.vlgmr.msra.gmra.mxu1 %vm643_vm2, %v904_v61 }
 0x2a8   : > { %1021 = vmatpush.bf16.xpose.msrb.mxu1 %v1012_v63 }
 0x2ad   : > { %v1005_v37 = vpop.permute.xlu1 %1004 }
 0x2b3   : > { %v703_v1 = vpop.xlane.xlu2 %702 }
 0x2b4   : > { %4677 = vrcp.f32 %v703_v1  ;;  %v770_v10 = vand.u32 2147483647, %v703_v1  ;;  %v772_v11 = vand.u32 2147483648, %v703_v1  ;;  %vm766_vm15 = vweird.f32 %v703_v1 }
 0x2b5   : > { %v983_v3 = vpop.permute.xlu1 %982 }
 0x2b6   : > { %v988_v53 = vsel %vm524_vm1, %v983_v3, 0  ;;  %vm771_vm4 = vcmp.eq.f32.partialorder %v770_v10, 8.507059e+37  ;;  %v773_v16 = vor.u32 1.1754944e-38, %v772_v11 }
 0x2b7   : > { %997 = vmatpush.bf16.xpose.msra.mxu0 %v988_v53  ;;  %4333 = vmatmul.msk.bf16.vlgmr.msrb.gmra.mxu1 %vm524_vm1, %v1005_v37 }
 0x2b8   : > { %v700_v4 = vpop.xlane.xlu0 %699 }
 0x2b9   : > { %4679 = vrcp.f32 %v700_v4  ;;  %v757_v17 = vand.u32 2147483648, %v700_v4  ;;  %v755_v20 = vand.u32 2147483647, %v700_v4  ;;  %vm751_vm6 = vweird.f32 %v700_v4 }
 0x2ba   : > { %v4678_v5 = vpop.eup %4677 }
 0x2bb   : > { %v762_v6 = vmul.f32 %v4678_v5, %v703_v1  ;;  %vm767_vm14 = vweird.f32 %v4678_v5  ;;  %v758_v30 = vor.u32 1.1754944e-38, %v757_v17  ;;  %vm756_vm8 = vcmp.eq.f32.partialorder %v755_v20, 8.507059e+37 }
 0x2bc   : > { %vm768_vm3 = vmor %vm766_vm15, %vm767_vm14 }
 0x2bd   : > { %v763_v7 = vsub.f32 1.0, %v762_v6  ;;  %v981_v39 = vpop.permute.xlu1 %980 }
 0x2bf   : > { %v4680_v8 = vpop.eup %4679  ;;  %v764_v12 = vmul.f32 %v4678_v5, %v763_v7 }
 0x2c0   : > { %v747_v13 = vmul.f32 %v4680_v8, %v700_v4  ;;  %vm752_vm5 = vweird.f32 %v4680_v8 }
 0x2c1   : > { %v765_v14 = vadd.f32 %v4678_v5, %v764_v12  ;;  %vm753_vm7 = vmor %vm751_vm6, %vm752_vm5 }
 0x2c2   : > { %v748_v15 = vsub.f32 1.0, %v747_v13 }
 0x2c3   : > { %v769_v21 = vsel %vm768_vm3, %v4678_v5, %v765_v14 }
 0x2c4   : > { %v749_v18 = vmul.f32 %v4680_v8, %v748_v15  ;;  %v774_v27 = vsel %vm771_vm4, %v773_v16, %v769_v21 }
 0x2c5   : > { %v775_v29 = vmul.f32 %v5244_v62, %v774_v27 }
 0x2c6   : > { %v750_v28 = vadd.f32 %v4680_v8, %v749_v18 }
 0x2c7   : > { %v839_v33 = vpack.c.bf16 %v775_v29, %v775_v29 }
 0x2c8   : > { %v754_v31 = vsel %vm753_vm7, %v4680_v8, %v750_v28 }
 0x2c9   : > { %v759_v45 = vsel %vm756_vm8, %v758_v30, %v754_v31  ;;  %v875_v35 = vunpack.c.l.b16 %v839_v33 }
 0x2ca   : > { %v760_v32 = vmul.f32 %v5248_v0, %v759_v45 }
 0x2cc   : > { %v838_v24 = vpack.c.bf16 %v760_v32, %v760_v32 }
 0x2ce   : > { %v874_v47 = vunpack.c.l.b16 %v838_v24 }
 0x2d0   : > { %v876_v38 = vpack.c.b16 %v875_v35, %v874_v47 }
 0x2d2   : > { %4328 = vmatmul.msk.bf16.vlgmr.msrb.gmra.mxu0 %vm643_vm2, %v876_v38 }
 0x2e2   : > { %4332 = vmatmul.msk.bf16.vlgmr.msra.gmra.mxu0 %vm524_vm1, %v981_v39 }
 0x2e7   : > { %v5282_v40 = vpop.f32.mrf.mxu3 }
 0x2e8   : > { %6562 = vst [vmem:[#allocation5_spill] sm:$0xff] %v5282_v40 }
 0x2ef   : > { %v5284_v62 = vpop.f32.mrf.mxu3 }
 0x2f0   : > { %6563 = vst [vmem:[#allocation6_spill] sm:$0xff] %v5284_v62 }
 0x2f7   : > { %v975_v44 = vpop.f32.mrf.mxu3 }
 0x2f8   : > { %v1052_v46 = vmul.f32 0.35355338, %v975_v44 }
 0x2fa   : > { %v1060_v19 = vsel %vm643_vm2, %v1052_v46, -inf }
 0x2fb   : > { %1061 = vmax.xlane.f32.xlu1 %v1060_v19 }
 0x2ff   : > { %v977_v0 = vpop.f32.mrf.mxu3 }
 0x300   : > { %v1053_v48 = vmul.f32 0.35355338, %v977_v0 }
 0x302   : > { %v1063_v43 = vsel %vm643_vm2, %v1053_v48, -inf }
 0x303   : > { %1064 = vmax.xlane.f32.xlu0 %v1063_v43 }
 0x314   : > { %1362 = vrot.lane.b32.xlu1 %v5147_v36, %s4986_s13 }
 0x317   : > { %v5298_v26 = vpop.f32.mrf.mxu2 }
 0x318   : > { %6566 = vst [vmem:[#allocation9_spill] sm:$0xff] %v5298_v26 }
 0x31c   : > { %1360 = vrot.lane.b32.xlu1 %v5151_v42, %s4986_s13 }
 0x31f   : > { %v5304_v56 = vpop.f32.mrf.mxu2 }
 0x320   : > { %6569 = vst [vmem:[#allocation12_spill] sm:$0xff] %v5304_v56 }
 0x324   : > { %1434 = vrot.lane.b32.xlu1 %v5173_v22, %s4986_s13  ;;  %v5294_v51 = vpop.f32.mrf.mxu1 }
 0x325   : > { %6564 = vst [vmem:[#allocation7_spill] sm:$0xff] %v5294_v51 }
 0x327   : > { %v1047_v3 = vpop.f32.mrf.mxu2 }
 0x328   : > { %v1058_v6 = vmul.f32 0.35355338, %v1047_v3 }
 0x32a   : > { %v1078_v12 = vsel %vm643_vm2, %v1058_v6, -inf }
 0x32c   : > { %v5300_v54 = vpop.f32.mrf.mxu1 }
 0x32d   : > { %6567 = vst [vmem:[#allocation10_spill] sm:$0xff] %v5300_v54 }
 0x32f   : > { %v1049_v14 = vpop.f32.mrf.mxu2 }
 0x330   : > { %v1059_v15 = vmul.f32 0.35355338, %v1049_v14 }
 0x332   : > { %v1081_v21 = vsel %vm643_vm2, %v1059_v15, -inf }
 0x334   : > { %v1023_v60 = vpop.f32.mrf.mxu1 }
 0x335   : > { %v1056_v63 = vmul.f32 0.35355338, %v1023_v60 }
 0x337   : > { %v1072_v53 = vsel %vm643_vm2, %v1056_v63, -inf }
 0x33c   : > { %v1025_v5 = vpop.f32.mrf.mxu1 }
 0x33d   : > { %v1057_v7 = vmul.f32 0.35355338, %v1025_v5 }
 0x33f   : > { %v1075_v13 = vsel %vm643_vm2, %v1057_v7, -inf }
 0x34f   : > { %v5296_v52 = vpop.f32.mrf.mxu0 }
 0x350   : > { %6565 = vst [vmem:[#allocation8_spill] sm:$0xff] %v5296_v52 }
 0x357   : > { %v5302_v55 = vpop.f32.mrf.mxu0 }
 0x358   : > { %6568 = vst [vmem:[#allocation11_spill] sm:$0xff] %v5302_v55 }
 0x35f   : > { %v999_v58 = vpop.f32.mrf.mxu0 }
 0x360   : > { %v5306_v59 = vmul.f32 0.35355338, %v999_v58 }
 0x362   : > { %v1066_v61 = vsel %vm643_vm2, %v5306_v59, -inf }
 0x363   : > { %1067 = vmax.xlane.f32.xlu2 %v1066_v61 }
 0x367   : > { %v1001_v37 = vpop.f32.mrf.mxu0 }
 0x368   : > { %v1055_v1 = vmul.f32 0.35355338, %v1001_v37 }
 0x36a   : > { %v1069_v4 = vsel %vm643_vm2, %v1055_v1, -inf }
 0x36b   : > { %1073 = vmax.xlane.f32.xlu2 %v1072_v53  ;;  %1070 = vmax.xlane.f32.xlu0 %v1069_v4 }
 0x36e   : > { %v1062_v8 = vpop.xlane.xlu1 %1061 }
 0x36f   : > { %v1084_v10 = vsub.f32 %v1052_v46, %v1062_v8 }
 0x371   : > { %v1092_v11 = vmul.f32 1.442695, %v1084_v10 }
 0x373   : > { %4681 = vpow2.f32 %v1092_v11  ;;  %1079 = vmax.xlane.f32.xlu2 %v1078_v12  ;;  %1076 = vmax.xlane.f32.xlu0 %v1075_v13 }
 0x376   : > { %v1065_v16 = vpop.xlane.xlu0 %1064 }
 0x377   : > { %v1085_v17 = vsub.f32 %v1053_v48, %v1065_v16 }
 0x379   : > { %v5314_v18 = vpop.eup %4681  ;;  %v1094_v20 = vmul.f32 1.442695, %v1085_v17 }
 0x37a   : > { %v1108_v27 = vsel %vm643_vm2, %v5314_v18, 0.0 }
 0x37b   : > { %4683 = vpow2.f32 %v1094_v20  ;;  %1082 = vmax.xlane.f32.xlu0 %v1081_v21  ;;  %1109 = vadd.xlane.f32.xlu2 %v1108_v27 }
 0x381   : > { %v5319_v28 = vpop.eup %4683 }
 0x382   : > { %v1111_v29 = vsel %vm643_vm2, %v5319_v28, 0.0 }
 0x383   : > { %1112 = vadd.xlane.f32.xlu0 %v1111_v29 }
 0x386   : > { %v5329_v33 = vpop.permute.xlu1 %1362 }
 0x38e   : > { %v5333_v48 = vpop.permute.xlu1 %1360 }
 0x393   : > { %1340 = vrot.lane.b32.xlu2 %v5192_v49, %s4985_s12 }
 0x396   : > { %v1435_v5 = vpop.permute.xlu1 %1434 }
 0x397   : > { %1265 = vrot.lane.b32.xlu0 %v5175_v23, %s4985_s12  ;;  %v1440_v12 = vsel %vm524_vm1, %v1435_v5, 0 }
 0x3d6   : > { %v5327_v30 = vpop.xlane.xlu2 %1067 }
 0x3de   : > { %v1074_v31 = vpop.xlane.xlu2 %1073  ;;  %v1071_v45 = vpop.xlane.xlu0 %1070 }
 0x3df   : > { %v1088_v32 = vsub.f32 %v1056_v63, %v1074_v31  ;;  %v1087_v47 = vsub.f32 %v1055_v1, %v1071_v45 }
 0x3e1   : > { %v1100_v24 = vmul.f32 1.442695, %v1088_v32  ;;  %v1098_v35 = vmul.f32 1.442695, %v1087_v47 }
 0x3e3   : > { %4685 = vpow2.f32 %v1100_v24 }
 0x3e4   : > { %4687 = vpow2.f32 %v1098_v35 }
 0x3e6   : > { %v1080_v38 = vpop.xlane.xlu2 %1079  ;;  %v1077_v39 = vpop.xlane.xlu0 %1076 }
 0x3e7   : > { %v1090_v44 = vsub.f32 %v1058_v6, %v1080_v38  ;;  %v1089_v0 = vsub.f32 %v1057_v7, %v1077_v39 }
 0x3e9   : > { %v5331_v46 = vpop.eup %4685  ;;  %v1104_v19 = vmul.f32 1.442695, %v1090_v44  ;;  %v1102_v58 = vmul.f32 1.442695, %v1089_v0 }
 0x3ea   : > { %v1120_v43 = vsel %vm643_vm2, %v5331_v46, 0.0  ;;  %v5337_v63 = vpop.eup %4687 }
 0x3eb   : > { %4689 = vpow2.f32 %v1104_v19  ;;  %1121 = vadd.xlane.f32.xlu0 %v1120_v43  ;;  %v1117_v53 = vsel %vm643_vm2, %v5337_v63, 0.0 }
 0x3ee   : > { %v1083_v60 = vpop.xlane.xlu0 %1082  ;;  %v1110_v61 = vpop.xlane.xlu2 %1109 }
 0x3ef   : > { %v1091_v37 = vsub.f32 %v1059_v15, %v1083_v60  ;;  %4691 = vrcp.f32 %v1110_v61  ;;  %v1143_v20 = vand.u32 2147483648, %v1110_v61  ;;  %vm1137_vm10 = vweird.f32 %v1110_v61 }
 0x3f0   : > { %4693 = vpow2.f32 %v1102_v58  ;;  %v1141_v27 = vand.u32 2147483647, %v1110_v61 }
 0x3f1   : > { %v5339_v1 = vpop.eup %4689  ;;  %v1106_v3 = vmul.f32 1.442695, %v1091_v37  ;;  %v1144_v32 = vor.u32 1.1754944e-38, %v1143_v20 }
 0x3f2   : > { %v1126_v4 = vsel %vm643_vm2, %v5339_v1, 0.0  ;;  %vm1142_vm12 = vcmp.eq.f32.partialorder %v1141_v27, 8.507059e+37 }
 0x3f3   : > { %4695 = vpow2.f32 %v1106_v3  ;;  %1118 = vadd.xlane.f32.xlu0 %v1117_v53  ;;  %1127 = vadd.xlane.f32.xlu2 %v1126_v4  ;;  %v1368_v3 = vsel %vm524_vm1, %v5329_v33, 0 }
 0x3f5   : > { %v4692_v6 = vpop.eup %4691 }
 0x3f6   : > { %v1133_v7 = vmul.f32 %v4692_v6, %v1110_v61  ;;  %v1113_v8 = vpop.xlane.xlu0 %1112  ;;  %v1341_v10 = vpop.permute.xlu2 %1340  ;;  %vm1138_vm9 = vweird.f32 %v4692_v6 }
 0x3f7   : > { %v5345_v11 = vpop.eup %4693  ;;  %4697 = vrcp.f32 %v1113_v8  ;;  %1353 = vmatpush.bf16.msra.mxu2 %v1341_v10  ;;  %vm1139_vm11 = vmor %vm1137_vm10, %vm1138_vm9  ;;  %v1158_v35 = vand.u32 2147483648, %v1113_v8  ;;  %v1156_v39 = vand.u32 2147483647, %v1113_v8  ;;  %vm1152_vm14 = vweird.f32 %v1113_v8 }
 0x3f8   : > { %v1134_v13 = vsub.f32 1.0, %v1133_v7  ;;  %v1123_v17 = vsel %vm643_vm2, %v5345_v11, 0.0 }
 0x3f9   : > { %v5348_v14 = vpop.eup %4695  ;;  %v1159_v0 = vor.u32 1.1754944e-38, %v1158_v35  ;;  %vm1157_vm3 = vcmp.eq.f32.partialorder %v1156_v39, 8.507059e+37 }
 0x3fa   : > { %v1135_v15 = vmul.f32 %v4692_v6, %v1134_v13  ;;  %v1129_v16 = vsel %vm643_vm2, %v5348_v14, 0.0 }
 0x3fb   : > { %1449 = vmatpush.bf16.xpose.msrb.mxu2 %v1440_v12  ;;  %1130 = vadd.xlane.f32.xlu1 %v1129_v16 }
 0x3fc   : > { %1124 = vadd.xlane.f32.xlu2 %v1123_v17  ;;  %v1136_v21 = vadd.f32 %v4692_v6, %v1135_v15 }
 0x3fd   : > { %v4698_v29 = vpop.eup %4697 }
 0x3fe   : > { %v1140_v31 = vsel %vm1139_vm11, %v4692_v6, %v1136_v21  ;;  %v1148_v45 = vmul.f32 %v4698_v29, %v1113_v8  ;;  %vm1153_vm13 = vweird.f32 %v4698_v29 }
 0x3ff   : > { %v1145_v47 = vsel %vm1142_vm12, %v1144_v32, %v1140_v31  ;;  %vm1154_vm15 = vmor %vm1152_vm14, %vm1153_vm13 }
 0x400   : > { %v1149_v24 = vsub.f32 1.0, %v1148_v45  ;;  %v1146_v19 = vmul.f32 %v5314_v18, %v1145_v47 }
 0x402   : > { %v1150_v38 = vmul.f32 %v4698_v29, %v1149_v24  ;;  %v1252_v61 = vpack.c.bf16 %v1146_v19, %v1146_v19 }
 0x404   : > { %v1151_v44 = vadd.f32 %v4698_v29, %v1150_v38  ;;  %v1262_v4 = vunpack.c.l.b16 %v1252_v61 }
 0x406   : > { %v1155_v43 = vsel %vm1154_vm15, %v4698_v29, %v1151_v44 }
 0x407   : > { %v1160_v58 = vsel %vm1157_vm3, %v1159_v0, %v1155_v43  ;;  %1410 = vrot.lane.b32.xlu0 %v5163_v2, %s4986_s13 }
 0x408   : > { %v1161_v60 = vmul.f32 %v5319_v28, %v1160_v58  ;;  %v1086_v28 = vsub.f32 %v5306_v59, %v5327_v30 }
 0x409   : > { %v1266_v37 = vpop.permute.xlu0 %1265 }
 0x40a   : > { %1278 = vmatpush.bf16.msrb.mxu3 %v1266_v37  ;;  %v1253_v53 = vpack.c.bf16 %v1161_v60, %v1161_v60  ;;  %v1096_v33 = vmul.f32 1.442695, %v1086_v28 }
 0x40c   : > { %v1263_v18 = vunpack.c.l.b16 %v1253_v53  ;;  %4699 = vpow2.f32 %v1096_v33 }
 0x40e   : > { %1377 = vmatpush.bf16.xpose.msra.mxu3 %v1368_v3  ;;  %v1264_v5 = vpack.c.b16 %v1263_v18, %v1262_v4 }
 0x40f   : > { %1408 = vrot.lane.b32.xlu0 %v5167_v9, %s4986_s13 }
 0x410   : > { %4335 = vmatmul.msk.bf16.vlgmr.msrb.gmra.mxu3 %vm643_vm2, %v1264_v5 }
 0x412   : > { %v5375_v6 = vpop.eup %4699 }
 0x413   : > { %v1114_v7 = vsel %vm643_vm2, %v5375_v6, 0.0 }
 0x414   : > { %1315 = vrot.lane.b32.xlu2 %v5189_v41, %s4985_s12  ;;  %1432 = vrot.lane.b32.xlu1 %v5184_v34, %s4986_s13 }
 0x417   : > { %1384 = vrot.lane.b32.xlu0 %v5159_v57, %s4986_s13 }
 0x41c   : > { %1290 = vrot.lane.b32.xlu2 %v5182_v25, %s4985_s12  ;;  %s4429_s12 = sshll.u32 %s4975_s24, 6 }
 0x420   : > { %4339 = vmatmul.msk.bf16.vlgmr.msra.gmra.mxu3 %vm524_vm1, %v5333_v48 }
 0x43e   : > { %1115 = vadd.xlane.f32.xlu1 %v1114_v7 }
 0x457   : > { %1386 = vrot.lane.b32.xlu1 %v5155_v50, %s4986_s13 }
 0x45e   : > { %v1122_v8 = vpop.xlane.xlu0 %1121 }
 0x45f   : > { %4701 = vrcp.f32 %v1122_v8  ;;  %v1201_v29 = vand.u32 2147483647, %v1122_v8  ;;  %v1203_v31 = vand.u32 2147483648, %v1122_v8  ;;  %vm1197_vm5 = vweird.f32 %v1122_v8 }
 0x461   : > { %vm1202_vm9 = vcmp.eq.f32.partialorder %v1201_v29, 8.507059e+37  ;;  %v1204_v43 = vor.u32 1.1754944e-38, %v1203_v31 }
 0x465   : > { %v4702_v10 = vpop.eup %4701 }
 0x466   : > { %v1193_v12 = vmul.f32 %v4702_v10, %v1122_v8  ;;  %v1128_v13 = vpop.xlane.xlu2 %1127  ;;  %v5383_v20 = vpop.xlane.xlu0 %1118  ;;  %vm1198_vm4 = vweird.f32 %v4702_v10 }
 0x467   : > { %4703 = vrcp.f32 %v1128_v13  ;;  %v1231_v32 = vand.u32 2147483647, %v1128_v13  ;;  %vm5386_vm7 = vmor %vm1197_vm5, %vm1198_vm4  ;;  %v1233_v38 = vand.u32 2147483648, %v1128_v13  ;;  %vm1227_vm8 = vweird.f32 %v1128_v13 }
 0x468   : > { %v1194_v48 = vsub.f32 1.0, %v1193_v12 }
 0x469   : > { %vm1232_vm11 = vcmp.eq.f32.partialorder %v1231_v32, 8.507059e+37  ;;  %v1234_v53 = vor.u32 1.1754944e-38, %v1233_v38 }
 0x46a   : > { %v1195_v59 = vmul.f32 %v4702_v10, %v1194_v48 }
 0x46c   : > { %v1196_v27 = vadd.f32 %v4702_v10, %v1195_v59 }
 0x46d   : > { %v4704_v15 = vpop.eup %4703 }
 0x46e   : > { %v5381_v16 = vpop.xlane.xlu1 %1130  ;;  %v1223_v17 = vmul.f32 %v4704_v15, %v1128_v13  ;;  %vm1228_vm6 = vweird.f32 %v4704_v15  ;;  %v1200_v39 = vsel %vm5386_vm7, %v4702_v10, %v1196_v27 }
 0x46f   : > { %v1125_v30 = vpop.xlane.xlu2 %1124  ;;  %vm5392_vm10 = vmor %vm1227_vm8, %vm1228_vm6  ;;  %v1205_v3 = vsel %vm1202_vm9, %v1204_v43, %v1200_v39  ;;  %v1246_v10 = vand.u32 2147483647, %v5381_v16  ;;  %v1248_v12 = vand.u32 2147483648, %v5381_v16  ;;  %vm1242_vm3 = vweird.f32 %v5381_v16 }
 0x470   : > { %4705 = vrcp.f32 %v1125_v30  ;;  %v1224_v21 = vsub.f32 1.0, %v1223_v17  ;;  %v1216_v4 = vand.u32 2147483647, %v1125_v30  ;;  %v1218_v18 = vand.u32 2147483648, %v1125_v30 }
 0x471   : > { %4707 = vrcp.f32 %v5381_v16  ;;  %vm1212_vm13 = vweird.f32 %v1125_v30  ;;  %v1249_v31 = vor.u32 1.1754944e-38, %v1248_v12  ;;  %vm1247_vm6 = vcmp.eq.f32.partialorder %v1246_v10, 8.507059e+37 }
 0x472   : > { %v1225_v45 = vmul.f32 %v4704_v15, %v1224_v21  ;;  %v1219_v59 = vor.u32 1.1754944e-38, %v1218_v18  ;;  %vm1217_vm4 = vcmp.eq.f32.partialorder %v1216_v4, 8.507059e+37  ;;  %4709 = vrcp.f32 %v5383_v20 }
 0x473   : > { %vm1182_vm8 = vweird.f32 %v5383_v20 }
 0x474   : > { %v1226_v35 = vadd.f32 %v4704_v15, %v1225_v45 }
 0x476   : > { %v4706_v24 = vpop.eup %4705  ;;  %v1230_v60 = vsel %vm5392_vm10, %v4704_v15, %v1226_v35  ;;  %v1206_v15 = vmul.f32 %v5331_v46, %v1205_v3 }
 0x477   : > { %v1208_v44 = vmul.f32 %v4706_v24, %v1125_v30  ;;  %v1316_v19 = vpop.permute.xlu2 %1315  ;;  %v4708_v0 = vpop.eup %4707  ;;  %vm1213_vm12 = vweird.f32 %v4706_v24  ;;  %v1235_v8 = vsel %vm1232_vm11, %v1234_v53, %v1230_v60 }
 0x478   : > { %1328 = vmatpush.bf16.msra.mxu1 %v1316_v19  ;;  %v1238_v37 = vmul.f32 %v4708_v0, %v5381_v16  ;;  %vm1243_vm14 = vweird.f32 %v4708_v0  ;;  %vm1214_vm15 = vmor %vm1212_vm13, %vm1213_vm12  ;;  %v1236_v30 = vmul.f32 %v5339_v1, %v1235_v8  ;;  %v1256_v47 = vpack.c.bf16 %v1206_v15, %v1206_v15  ;;  %v4710_v3 = vpop.eup %4709 }
 0x479   : > { %v1209_v61 = vsub.f32 1.0, %v1208_v44  ;;  %v1411_v5 = vpop.permute.xlu0 %1410  ;;  %vm1244_vm5 = vmor %vm1242_vm3, %vm1243_vm14  ;;  %v1178_v4 = vmul.f32 %v4710_v3, %v5383_v20  ;;  %vm1183_vm7 = vweird.f32 %v4710_v3  ;;  %v1186_v8 = vand.u32 2147483647, %v5383_v20 }
 0x47a   : > { %v1239_v33 = vsub.f32 1.0, %v1238_v37  ;;  %v1416_v7 = vsel %vm524_vm1, %v1411_v5, 0  ;;  %v1258_v16 = vpack.c.bf16 %v1236_v30, %v1236_v30  ;;  %vm1184_vm9 = vmor %vm1182_vm8, %vm1183_vm7 }
 0x47b   : > { %v1210_v28 = vmul.f32 %v4706_v24, %v1209_v61  ;;  %v1179_v18 = vsub.f32 1.0, %v1178_v4  ;;  %vm1187_vm10 = vcmp.eq.f32.partialorder %v1186_v8, 8.507059e+37 }
 0x47c   : > { %1425 = vmatpush.bf16.xpose.msrb.mxu1 %v1416_v7  ;;  %v1240_v48 = vmul.f32 %v4708_v0, %v1239_v33  ;;  %v1337_v43 = vunpack.c.l.b16 %v1258_v16  ;;  %v1188_v7 = vand.u32 2147483648, %v5383_v20 }
 0x47d   : > { %v1211_v13 = vadd.f32 %v4706_v24, %v1210_v28  ;;  %v1180_v5 = vmul.f32 %v4710_v3, %v1179_v18 }
 0x47e   : > { %v1241_v21 = vadd.f32 %v4708_v0, %v1240_v48  ;;  %v1189_v48 = vor.u32 1.1754944e-38, %v1188_v7 }
 0x47f   : > { %v1215_v17 = vsel %vm1214_vm15, %v4706_v24, %v1211_v13  ;;  %v1291_v27 = vpop.permute.xlu2 %1290  ;;  %v1312_v24 = vunpack.c.l.b16 %v1256_v47  ;;  %v1181_v33 = vadd.f32 %v4710_v3, %v1180_v5 }
 0x480   : > { %v1220_v29 = vsel %vm1217_vm4, %v1219_v59, %v1215_v17  ;;  %1303 = vmatpush.bf16.msrb.mxu0 %v1291_v27  ;;  %v1245_v45 = vsel %vm1244_vm5, %v4708_v0, %v1241_v21 }
 0x481   : > { %v1221_v32 = vmul.f32 %v5345_v11, %v1220_v29  ;;  %v1250_v46 = vsel %vm1247_vm6, %v1249_v31, %v1245_v45  ;;  %v1409_v11 = vpop.permute.xlu0 %1408  ;;  %v1185_v12 = vsel %vm1184_vm9, %v4710_v3, %v1181_v33 }
 0x482   : > { %v1251_v38 = vmul.f32 %v5348_v14, %v1250_v46  ;;  %v1190_v59 = vsel %vm1187_vm10, %v1189_v48, %v1185_v12 }
 0x483   : > { %v1257_v35 = vpack.c.bf16 %v1221_v32, %v1221_v32  ;;  %v1191_v29 = vmul.f32 %v5337_v63, %v1190_v59 }
 0x484   : > { %v1259_v44 = vpack.c.bf16 %v1251_v38, %v1251_v38 }
 0x485   : > { %v1313_v39 = vunpack.c.l.b16 %v1257_v35  ;;  %v1255_v47 = vpack.c.bf16 %v1191_v29, %v1191_v29 }
 0x486   : > { %v1338_v1 = vunpack.c.l.b16 %v1259_v44  ;;  %v1433_v60 = vpop.permute.xlu1 %1432 }
 0x487   : > { %v1314_v19 = vpack.c.b16 %v1313_v39, %v1312_v24  ;;  %v1288_v38 = vunpack.c.l.b16 %v1255_v47 }
 0x488   : > { %v1339_v58 = vpack.c.b16 %v1338_v1, %v1337_v43 }
 0x489   : > { %4337 = vmatmul.msk.bf16.vlgmr.msra.gmra.mxu1 %vm643_vm2, %v1314_v19  ;;  %v1385_v44 = vpop.permute.xlu0 %1384 }
 0x48a   : > { %4338 = vmatmul.msk.bf16.vlgmr.msra.gmra.mxu2 %vm643_vm2, %v1339_v58 }
 0x493   : > { %v5409_v0 = vpop.f32.mrf.mxu3 }
 0x499   : > { %4341 = vmatmul.msk.bf16.vlgmr.msrb.gmra.mxu1 %vm524_vm1, %v1409_v11 }
 0x49a   : > { %4342 = vmatmul.msk.bf16.vlgmr.msrb.gmra.mxu2 %vm524_vm1, %v1433_v60 }
 0x49b   : > { %v5413_v14 = vpop.f32.mrf.mxu3 }
 0x4a3   : > { %v1379_v61 = vpop.f32.mrf.mxu3 }
 0x4a4   : > { %v1456_v37 = vmul.f32 0.35355338, %v1379_v61 }
 0x4a6   : > { %v1464_v53 = vsel %vm643_vm2, %v1456_v37, -inf }
 0x4a7   : > { %1465 = vmax.xlane.f32.xlu2 %v1464_v53 }
 0x4ab   : > { %v1381_v59 = vpop.f32.mrf.mxu3 }
 0x4b1   : > { %v1116_v28 = vpop.xlane.xlu1 %1115 }
 0x4b2   : > { %4711 = vrcp.f32 %v1116_v28  ;;  %v1173_v17 = vand.u32 2147483648, %v1116_v28  ;;  %v1171_v27 = vand.u32 2147483647, %v1116_v28  ;;  %vm1167_vm12 = vweird.f32 %v1116_v28 }
 0x4b4   : > { %v1174_v31 = vor.u32 1.1754944e-38, %v1173_v17  ;;  %vm1172_vm14 = vcmp.eq.f32.partialorder %v1171_v27, 8.507059e+37  ;;  %v1457_v17 = vmul.f32 0.35355338, %v1381_v59 }
 0x4b8   : > { %v4712_v10 = vpop.eup %4711 }
 0x4b9   : > { %v1163_v13 = vmul.f32 %v4712_v10, %v1116_v28  ;;  %vm1168_vm11 = vweird.f32 %v4712_v10 }
 0x4ba   : > { %vm1169_vm13 = vmor %vm1167_vm12, %vm1168_vm11 }
 0x4bb   : > { %v1164_v15 = vsub.f32 1.0, %v1163_v13 }
 0x4bd   : > { %v1165_v21 = vmul.f32 %v4712_v10, %v1164_v15 }
 0x4bf   : > { %v1166_v30 = vadd.f32 %v4712_v10, %v1165_v21 }
 0x4c1   : > { %v1170_v45 = vsel %vm1169_vm13, %v4712_v10, %v1166_v30  ;;  %v1467_v30 = vsel %vm643_vm2, %v1457_v17, -inf }
 0x4c2   : > { %v1175_v20 = vsel %vm1172_vm14, %v1174_v31, %v1170_v45 }
 0x4c3   : > { %v1176_v32 = vmul.f32 %v5375_v6, %v1175_v20 }
 0x4c5   : > { %v1254_v46 = vpack.c.bf16 %v1176_v32, %v1176_v32 }
 0x4c7   : > { %v1287_v35 = vunpack.c.l.b16 %v1254_v46 }
 0x4c9   : > { %v1387_v16 = vpop.permute.xlu1 %1386  ;;  %v1289_v24 = vpack.c.b16 %v1288_v38, %v1287_v35 }
 0x4ca   : > { %v1392_v39 = vsel %vm524_vm1, %v1387_v16, 0 }
 0x4cb   : > { %4336 = vmatmul.msk.bf16.vlgmr.msrb.gmra.mxu0 %vm643_vm2, %v1289_v24 }
 0x4cc   : > { %1401 = vmatpush.bf16.xpose.msra.mxu0 %v1392_v39 }
 0x4db   : > { %4340 = vmatmul.msk.bf16.vlgmr.msra.gmra.mxu0 %vm524_vm1, %v1385_v44 }
 0x506   : > { %v5426_v63 = vpop.f32.mrf.mxu1 }
 0x50d   : > { %v5428_v19 = vpop.f32.mrf.mxu2 }
 0x50e   : > { %v5430_v43 = vpop.f32.mrf.mxu1 }
 0x515   : > { %v5432_v6 = vpop.f32.mrf.mxu2 }
 0x516   : > { %v1427_v1 = vpop.f32.mrf.mxu1 }
 0x517   : > { %v1460_v31 = vmul.f32 0.35355338, %v1427_v1 }
 0x519   : > { %v1476_v45 = vsel %vm643_vm2, %v1460_v31, -inf }
 0x51a   : > { %v1466_v58 = vpop.xlane.xlu2 %1465 }
 0x51b   : > { %v1488_v11 = vsub.f32 %v1456_v37, %v1466_v58 }
 0x51d   : > { %v1496_v60 = vmul.f32 1.442695, %v1488_v11  ;;  %v1451_v61 = vpop.f32.mrf.mxu2 }
 0x51e   : > { %v1429_v3 = vpop.f32.mrf.mxu1  ;;  %v1462_v53 = vmul.f32 0.35355338, %v1451_v61 }
 0x51f   : > { %v1461_v4 = vmul.f32 0.35355338, %v1429_v3  ;;  %4713 = vpow2.f32 %v1496_v60 }
 0x520   : > { %v1482_v18 = vsel %vm643_vm2, %v1462_v53, -inf }
 0x521   : > { %v1479_v5 = vsel %vm643_vm2, %v1461_v4, -inf  ;;  %1483 = vmax.xlane.f32.xlu1 %v1482_v18 }
 0x522   : > { %1480 = vmax.xlane.f32.xlu2 %v1479_v5 }
 0x525   : > { %v5436_v28 = vpop.eup %4713  ;;  %v1453_v33 = vpop.f32.mrf.mxu2 }
 0x526   : > { %v1463_v7 = vmul.f32 0.35355338, %v1453_v33  ;;  %v1512_v8 = vsel %vm643_vm2, %v5436_v28, 0.0 }
 0x528   : > { %v1485_v37 = vsel %vm643_vm2, %v1463_v7, -inf }
 0x529   : > { %1513 = vadd.xlane.f32.xlu1 %v1512_v8 }
 0x52a   : > { %1486 = vmax.xlane.f32.xlu2 %v1485_v37 }
 0x548   : > { %v5441_v10 = vpop.f32.mrf.mxu0 }
 0x549   : > { %6574 = vst [vmem:[#allocation13_spill] sm:$0xff] %v5441_v10 }
 0x550   : > { %v5443_v12 = vpop.f32.mrf.mxu0 }
 0x551   : > { %6575 = vst [vmem:[#allocation14_spill] sm:$0xff] %v5443_v12 }
 0x558   : > { %v1403_v13 = vpop.f32.mrf.mxu0 }
 0x559   : > { %v5445_v48 = vmul.f32 0.35355338, %v1403_v13 }
 0x55b   : > { %v1470_v15 = vsel %vm643_vm2, %v5445_v48, -inf }
 0x55c   : > { %1471 = vmax.xlane.f32.xlu0 %v1470_v15 }
 0x560   : > { %v1405_v21 = vpop.f32.mrf.mxu0 }
 0x561   : > { %v1459_v27 = vmul.f32 0.35355338, %v1405_v21 }
 0x563   : > { %v1473_v29 = vsel %vm643_vm2, %v1459_v27, -inf }
 0x564   : > { %1468 = vmax.xlane.f32.xlu0 %v1467_v30  ;;  %1474 = vmax.xlane.f32.xlu2 %v1473_v29 }
 0x56c   : > { %1477 = vmax.xlane.f32.xlu0 %v1476_v45 }
 0x580   : > { %1669 = vrot.lane.b32.xlu0 %v5175_v23, %s4986_s13 }
 0x594   : > { %v1484_v58 = vpop.xlane.xlu1 %1483 }
 0x595   : > { %v1481_v20 = vpop.xlane.xlu2 %1480 }
 0x596   : > { %v1493_v32 = vsub.f32 %v1461_v4, %v1481_v20  ;;  %v1494_v4 = vsub.f32 %v1462_v53, %v1484_v58 }
 0x598   : > { %v1506_v47 = vmul.f32 1.442695, %v1493_v32  ;;  %v1508_v33 = vmul.f32 1.442695, %v1494_v4 }
 0x59a   : > { %4715 = vpow2.f32 %v1506_v47 }
 0x59c   : > { %v1514_v29 = vpop.xlane.xlu1 %1513 }
 0x59d   : > { %v1487_v24 = vpop.xlane.xlu2 %1486  ;;  %v1547_v4 = vand.u32 2147483648, %v1514_v29  ;;  %vm1541_vm3 = vweird.f32 %v1514_v29 }
 0x59e   : > { %v1495_v1 = vsub.f32 %v1463_v7, %v1487_v24 }
 0x5a0   : > { %v5454_v46 = vpop.eup %4715  ;;  %v1510_v11 = vmul.f32 1.442695, %v1495_v1 }
 0x5a1   : > { %v1527_v35 = vsel %vm643_vm2, %v5454_v46, 0.0 }
 0x5a2   : > { %1528 = vadd.xlane.f32.xlu1 %v1527_v35 }
 0x5bb   : > { %1766 = vrot.lane.b32.xlu1 %v5147_v36, %s4987_s14 }
 0x5c3   : > { %1836 = vrot.lane.b32.xlu1 %v5184_v34, %s4987_s14 }
 0x5cf   : > { %v1472_v38 = vpop.xlane.xlu0 %1471 }
 0x5d7   : > { %v1469_v16 = vpop.xlane.xlu0 %1468 }
 0x5d8   : > { %v1489_v39 = vsub.f32 %v1457_v17, %v1469_v16  ;;  %v1475_v17 = vpop.xlane.xlu2 %1474 }
 0x5d9   : > { %v1491_v21 = vsub.f32 %v1459_v27, %v1475_v17 }
 0x5da   : > { %v1498_v44 = vmul.f32 1.442695, %v1489_v39 }
 0x5db   : > { %v1502_v30 = vmul.f32 1.442695, %v1491_v21 }
 0x5dc   : > { %4717 = vpow2.f32 %v1498_v44 }
 0x5dd   : > { %4719 = vpow2.f32 %v1510_v11 }
 0x5df   : > { %v1478_v60 = vpop.xlane.xlu0 %1477 }
 0x5e0   : > { %v1492_v61 = vsub.f32 %v1460_v31, %v1478_v60  ;;  %v1490_v31 = vsub.f32 %v5445_v48, %v1472_v38 }
 0x5e2   : > { %v5462_v3 = vpop.eup %4717  ;;  %v1504_v18 = vmul.f32 1.442695, %v1492_v61  ;;  %v1500_v32 = vmul.f32 1.442695, %v1490_v31 }
 0x5e3   : > { %v1515_v5 = vsel %vm643_vm2, %v5462_v3, 0.0  ;;  %v5466_v8 = vpop.eup %4719 }
 0x5e4   : > { %4721 = vpow2.f32 %v1504_v18  ;;  %1516 = vadd.xlane.f32.xlu0 %v1515_v5  ;;  %v1533_v13 = vsel %vm643_vm2, %v5466_v8, 0.0  ;;  %v1545_v5 = vand.u32 2147483647, %v1514_v29 }
 0x5e5   : > { %4723 = vpow2.f32 %v1508_v33 }
 0x5e6   : > { %4725 = vpow2.f32 %v1502_v30  ;;  %vm1546_vm5 = vcmp.eq.f32.partialorder %v1545_v5, 8.507059e+37 }
 0x5e7   : > { %4727 = vpow2.f32 %v1500_v32 }
 0x5e8   : > { %4729 = vrcp.f32 %v1514_v29 }
 0x5ea   : > { %v5468_v37 = vpop.eup %4721 }
 0x5eb   : > { %v1524_v7 = vsel %vm643_vm2, %v5468_v37, 0.0  ;;  %v5474_v53 = vpop.eup %4723 }
 0x5ec   : > { %1525 = vadd.xlane.f32.xlu2 %v1524_v7  ;;  %v1530_v59 = vsel %vm643_vm2, %v5474_v53, 0.0  ;;  %v5495_v20 = vpop.eup %4725 }
 0x5ed   : > { %1534 = vadd.xlane.f32.xlu1 %v1533_v13  ;;  %v1521_v47 = vsel %vm643_vm2, %v5495_v20, 0.0  ;;  %v5500_v16 = vpop.eup %4727 }
 0x5ee   : > { %v1518_v24 = vsel %vm643_vm2, %v5500_v16, 0.0  ;;  %v4730_v48 = vpop.eup %4729 }
 0x5ef   : > { %v1537_v38 = vmul.f32 %v4730_v48, %v1514_v29  ;;  %vm1542_vm15 = vweird.f32 %v4730_v48 }
 0x5f0   : > { %vm1543_vm4 = vmor %vm1541_vm3, %vm1542_vm15 }
 0x5f1   : > { %v1538_v39 = vsub.f32 1.0, %v1537_v38 }
 0x5f2   : > { %v1670_v15 = vpop.permute.xlu0 %1669 }
 0x5f3   : > { %1682 = vmatpush.bf16.msrb.mxu3 %v1670_v15  ;;  %v1539_v1 = vmul.f32 %v4730_v48, %v1538_v39 }
 0x5f4   : > { %1531 = vadd.xlane.f32.xlu2 %v1530_v59  ;;  %v1548_v59 = vor.u32 1.1754944e-38, %v1547_v4 }
 0x5f5   : > { %v1540_v61 = vadd.f32 %v4730_v48, %v1539_v1 }
 0x5f7   : > { %v1544_v7 = vsel %vm1543_vm4, %v4730_v48, %v1540_v61 }
 0x5f8   : > { %1764 = vrot.lane.b32.xlu0 %v5151_v42, %s4987_s14  ;;  %v1549_v31 = vsel %vm1546_vm5, %v1548_v59, %v1544_v7 }
 0x5f9   : > { %v1550_v48 = vmul.f32 %v5436_v28, %v1549_v31 }
 0x5fb   : > { %v1656_v59 = vpack.c.bf16 %v1550_v48, %v1550_v48 }
 0x5fd   : > { %v1666_v48 = vunpack.c.l.b16 %v1656_v59 }
 0x600   : > { %1838 = vrot.lane.b32.xlu0 %v5173_v22, %s4987_s14 }
 0x606   : > { %1719 = vrot.lane.b32.xlu1 %v5189_v41, %s4986_s13 }
 0x60c   : > { %1744 = vrot.lane.b32.xlu2 %v5192_v49, %s4986_s13 }
 0x60e   : > { %1814 = vrot.lane.b32.xlu1 %v5163_v2, %s4987_s14 }
 0x615   : > { %v5493_v45 = vpop.xlane.xlu1 %1528 }
 0x616   : > { %1812 = vrot.lane.b32.xlu1 %v5167_v9, %s4987_s14  ;;  %4731 = vrcp.f32 %v5493_v45  ;;  %vm1616_vm9 = vweird.f32 %v5493_v45  ;;  %v1620_v39 = vand.u32 2147483647, %v5493_v45 }
 0x618   : > { %vm1621_vm13 = vcmp.eq.f32.partialorder %v1620_v39, 8.507059e+37 }
 0x61c   : > { %v4732_v44 = vpop.eup %4731 }
 0x61d   : > { %v1612_v11 = vmul.f32 %v4732_v44, %v5493_v45  ;;  %vm1617_vm7 = vweird.f32 %v4732_v44 }
 0x61e   : > { %1694 = vrot.lane.b32.xlu1 %v5182_v25, %s4986_s13  ;;  %vm5519_vm11 = vmor %vm1616_vm9, %vm1617_vm7 }
 0x61f   : > { %v1613_v18 = vsub.f32 1.0, %v1612_v11 }
 0x621   : > { %v1614_v17 = vmul.f32 %v4732_v44, %v1613_v18 }
 0x623   : > { %v1615_v29 = vadd.f32 %v4732_v44, %v1614_v17 }
 0x625   : > { %v1619_v28 = vsel %vm5519_vm11, %v4732_v44, %v1615_v29 }
 0x62a   : > { %1522 = vadd.xlane.f32.xlu0 %v1521_v47 }
 0x62d   : > { %v1767_v35 = vpop.permute.xlu1 %1766 }
 0x62e   : > { %v1772_v27 = vsel %vm524_vm1, %v1767_v35, 0 }
 0x62f   : > { %1781 = vmatpush.bf16.xpose.msra.mxu3 %v1772_v27  ;;  %v1622_v27 = vand.u32 2147483648, %v5493_v45 }
 0x631   : > { %v1623_v45 = vor.u32 1.1754944e-38, %v1622_v27 }
 0x635   : > { %1519 = vadd.xlane.f32.xlu2 %v1518_v24  ;;  %v5510_v60 = vpop.permute.xlu1 %1836 }
 0x63e   : > { %1788 = vrot.lane.b32.xlu0 %v5159_v57, %s4987_s14 }
 0x64d   : > { %1790 = vrot.lane.b32.xlu2 %v5155_v50, %s4987_s14 }
 0x657   : > { %v1517_v58 = vpop.xlane.xlu0 %1516 }
 0x658   : > { %4733 = vrcp.f32 %v1517_v58  ;;  %v1562_v32 = vand.u32 2147483648, %v1517_v58  ;;  %v1560_v35 = vand.u32 2147483647, %v1517_v58  ;;  %vm1556_vm8 = vweird.f32 %v1517_v58 }
 0x65a   : > { %v1563_v1 = vor.u32 1.1754944e-38, %v1562_v32  ;;  %vm1561_vm12 = vcmp.eq.f32.partialorder %v1560_v35, 8.507059e+37  ;;  %v1624_v32 = vsel %vm1621_vm13, %v1623_v45, %v1619_v28 }
 0x65e   : > { %v4734_v33 = vpop.eup %4733 }
 0x65f   : > { %v1552_v13 = vmul.f32 %v4734_v33, %v1517_v58  ;;  %v1526_v15 = vpop.xlane.xlu2 %1525  ;;  %vm1557_vm6 = vweird.f32 %v4734_v33 }
 0x660   : > { %4735 = vrcp.f32 %v1526_v15  ;;  %v5512_v21 = vpop.xlane.xlu1 %1534  ;;  %vm1558_vm10 = vmor %vm1556_vm8, %vm1557_vm6  ;;  %v1607_v17 = vand.u32 2147483648, %v1526_v15  ;;  %v1605_v35 = vand.u32 2147483647, %v1526_v15  ;;  %vm1601_vm3 = vweird.f32 %v1526_v15 }
 0x661   : > { %v1553_v30 = vsub.f32 1.0, %v1552_v13  ;;  %4737 = vrcp.f32 %v5512_v21  ;;  %v1652_v29 = vand.u32 2147483648, %v5512_v21  ;;  %v1650_v27 = vand.u32 2147483647, %v5512_v21 }
 0x662   : > { %v1608_v61 = vor.u32 1.1754944e-38, %v1607_v17  ;;  %vm1646_vm5 = vweird.f32 %v5512_v21  ;;  %vm1606_vm6 = vcmp.eq.f32.partialorder %v1605_v35, 8.507059e+37 }
 0x663   : > { %v1554_v47 = vmul.f32 %v4734_v33, %v1553_v30  ;;  %vm1651_vm8 = vcmp.eq.f32.partialorder %v1650_v27, 8.507059e+37 }
 0x665   : > { %v1555_v24 = vadd.f32 %v4734_v33, %v1554_v47 }
 0x666   : > { %v4736_v38 = vpop.eup %4735 }
 0x667   : > { %v4738_v11 = vpop.eup %4737  ;;  %v1559_v4 = vsel %vm1558_vm10, %v4734_v33, %v1555_v24  ;;  %v1597_v18 = vmul.f32 %v4736_v38, %v1526_v15  ;;  %v5523_v5 = vpop.xlane.xlu2 %1531  ;;  %vm1602_vm14 = vweird.f32 %v4736_v38 }
 0x668   : > { %v1564_v58 = vsel %vm1561_vm12, %v1563_v1, %v1559_v4  ;;  %v1642_v7 = vmul.f32 %v4738_v11, %v5512_v21  ;;  %4739 = vrcp.f32 %v5523_v5  ;;  %vm1647_vm15 = vweird.f32 %v4738_v11  ;;  %vm1603_vm4 = vmor %vm1601_vm3, %vm1602_vm14 }
 0x669   : > { %v1598_v13 = vsub.f32 1.0, %v1597_v18  ;;  %v1565_v33 = vmul.f32 %v5462_v3, %v1564_v58  ;;  %vm1648_vm7 = vmor %vm1646_vm5, %vm1647_vm15  ;;  %vm1631_vm10 = vweird.f32 %v5523_v5 }
 0x66a   : > { %v1643_v30 = vsub.f32 1.0, %v1642_v7  ;;  %v5529_v31 = vpop.permute.xlu0 %1764  ;;  %v1625_v7 = vmul.f32 %v5454_v46, %v1624_v32 }
 0x66b   : > { %v1599_v47 = vmul.f32 %v4736_v38, %v1598_v13  ;;  %v1657_v24 = vpack.c.bf16 %v1565_v33, %v1565_v33  ;;  %v1653_v13 = vor.u32 1.1754944e-38, %v1652_v29  ;;  %v1637_v33 = vand.u32 2147483648, %v5523_v5 }
 0x66c   : > { %v1644_v44 = vmul.f32 %v4738_v11, %v1643_v30  ;;  %v1661_v32 = vpack.c.bf16 %v1625_v7, %v1625_v7 }
 0x66d   : > { %v1600_v1 = vadd.f32 %v4736_v38, %v1599_v47  ;;  %v1667_v3 = vunpack.c.l.b16 %v1657_v24  ;;  %v1638_v29 = vor.u32 1.1754944e-38, %v1637_v33 }
 0x66e   : > { %v4740_v39 = vpop.eup %4739  ;;  %v1645_v4 = vadd.f32 %v4738_v11, %v1644_v44 }
 0x66f   : > { %v1604_v18 = vsel %vm1603_vm4, %v4736_v38, %v1600_v1  ;;  %v1627_v28 = vmul.f32 %v4740_v39, %v5523_v5  ;;  %v1745_v58 = vpop.permute.xlu2 %1744  ;;  %v1668_v59 = vpack.c.b16 %v1667_v3, %v1666_v48  ;;  %v1635_v38 = vand.u32 2147483647, %v5523_v5 }
 0x670   : > { %v1609_v15 = vsel %vm1606_vm6, %v1608_v61, %v1604_v18  ;;  %v1649_v45 = vsel %vm1648_vm7, %v4738_v11, %v1645_v4  ;;  %1757 = vmatpush.bf16.msra.mxu2 %v1745_v58  ;;  %vm1632_vm9 = vweird.f32 %v4740_v39  ;;  %v1717_v61 = vunpack.c.l.b16 %v1661_v32 }
 0x671   : > { %v1628_v17 = vsub.f32 1.0, %v1627_v28  ;;  %v1610_v30 = vmul.f32 %v5468_v37, %v1609_v15  ;;  %v1654_v21 = vsel %vm1651_vm8, %v1653_v13, %v1649_v45  ;;  %4343 = vmatmul.msk.bf16.vlgmr.msrb.gmra.mxu3 %vm643_vm2, %v1668_v59  ;;  %vm1633_vm11 = vmor %vm1631_vm10, %vm1632_vm9  ;;  %vm1636_vm12 = vcmp.eq.f32.partialorder %v1635_v38, 8.507059e+37 }
 0x672   : > { %v1839_v47 = vpop.permute.xlu0 %1838  ;;  %v1655_v37 = vmul.f32 %v5466_v8, %v1654_v21 }
 0x673   : > { %v1629_v35 = vmul.f32 %v4740_v39, %v1628_v17  ;;  %v1844_v46 = vsel %vm524_vm1, %v1839_v47, 0  ;;  %v1660_v11 = vpack.c.bf16 %v1610_v30, %v1610_v30 }
 0x674   : > { %1853 = vmatpush.bf16.xpose.msrb.mxu2 %v1844_v46  ;;  %v1663_v3 = vpack.c.bf16 %v1655_v37, %v1655_v37 }
 0x675   : > { %v1630_v44 = vadd.f32 %v4740_v39, %v1629_v35  ;;  %v1716_v24 = vunpack.c.l.b16 %v1660_v11 }
 0x676   : > { %v1742_v5 = vunpack.c.l.b16 %v1663_v3 }
 0x677   : > { %v1634_v1 = vsel %vm1633_vm11, %v4740_v39, %v1630_v44  ;;  %v1718_v18 = vpack.c.b16 %v1717_v61, %v1716_v24 }
 0x678   : > { %v1639_v27 = vsel %vm1636_vm12, %v1638_v29, %v1634_v1  ;;  %v1720_v48 = vpop.permute.xlu1 %1719 }
 0x679   : > { %1732 = vmatpush.bf16.msra.mxu1 %v1720_v48  ;;  %v1640_v4 = vmul.f32 %v5474_v53, %v1639_v27 }
 0x67b   : > { %v1662_v28 = vpack.c.bf16 %v1640_v4, %v1640_v4 }
 0x67c   : > { %4345 = vmatmul.msk.bf16.vlgmr.msra.gmra.mxu1 %vm643_vm2, %v1718_v18 }
 0x67d   : > { %v1741_v58 = vunpack.c.l.b16 %v1662_v28 }
 0x67f   : > { %v1743_v7 = vpack.c.b16 %v1742_v5, %v1741_v58 }
 0x680   : > { %v1815_v8 = vpop.permute.xlu1 %1814 }
 0x681   : > { %v1820_v15 = vsel %vm524_vm1, %v1815_v8, 0  ;;  %4346 = vmatmul.msk.bf16.vlgmr.msra.gmra.mxu2 %vm643_vm2, %v1743_v7  ;;  %4347 = vmatmul.msk.bf16.vlgmr.msra.gmra.mxu3 %vm524_vm1, %v5529_v31 }
 0x682   : > { %1829 = vmatpush.bf16.xpose.msrb.mxu1 %v1820_v15 }
 0x688   : > { %v1813_v39 = vpop.permute.xlu1 %1812 }
 0x68c   : > { %4349 = vmatmul.msk.bf16.vlgmr.msrb.gmra.mxu1 %vm524_vm1, %v1813_v39 }
 0x690   : > { %v1695_v53 = vpop.permute.xlu1 %1694 }
 0x691   : > { %1707 = vmatpush.bf16.msrb.mxu0 %v1695_v53  ;;  %4350 = vmatmul.msk.bf16.vlgmr.msrb.gmra.mxu2 %vm524_vm1, %v5510_v60 }
 0x69d   : > { %v1523_v45 = vpop.xlane.xlu0 %1522 }
 0x69e   : > { %4741 = vrcp.f32 %v1523_v45  ;;  %v1592_v31 = vand.u32 2147483648, %v1523_v45  ;;  %vm1586_vm14 = vweird.f32 %v1523_v45  ;;  %v1590_v33 = vand.u32 2147483647, %v1523_v45 }
 0x6a0   : > { %v1593_v32 = vor.u32 1.1754944e-38, %v1592_v31  ;;  %vm1591_vm3 = vcmp.eq.f32.partialorder %v1590_v33, 8.507059e+37 }
 0x6a4   : > { %v4742_v13 = vpop.eup %4741 }
 0x6a5   : > { %v1582_v59 = vmul.f32 %v4742_v13, %v1523_v45  ;;  %vm1587_vm13 = vweird.f32 %v4742_v13 }
 0x6a6   : > { %vm1588_vm15 = vmor %vm1586_vm14, %vm1587_vm13 }
 0x6a7   : > { %v1583_v17 = vsub.f32 1.0, %v1582_v59 }
 0x6a8   : > { %v1520_v30 = vpop.xlane.xlu2 %1519 }
 0x6a9   : > { %v1584_v21 = vmul.f32 %v4742_v13, %v1583_v17  ;;  %4743 = vrcp.f32 %v1520_v30  ;;  %v1577_v29 = vand.u32 2147483648, %v1520_v30  ;;  %v1575_v1 = vand.u32 2147483647, %v1520_v30 }
 0x6aa   : > { %vm1571_vm5 = vweird.f32 %v1520_v30 }
 0x6ab   : > { %v1585_v38 = vadd.f32 %v4742_v13, %v1584_v21  ;;  %v1578_v61 = vor.u32 1.1754944e-38, %v1577_v29  ;;  %vm1576_vm7 = vcmp.eq.f32.partialorder %v1575_v1, 8.507059e+37 }
 0x6ad   : > { %v1589_v35 = vsel %vm1588_vm15, %v4742_v13, %v1585_v38 }
 0x6ae   : > { %v1594_v37 = vsel %vm1591_vm3, %v1593_v32, %v1589_v35 }
 0x6af   : > { %v4744_v47 = vpop.eup %4743  ;;  %v1595_v48 = vmul.f32 %v5495_v20, %v1594_v37 }
 0x6b0   : > { %v1567_v46 = vmul.f32 %v4744_v47, %v1520_v30  ;;  %v1791_v11 = vpop.permute.xlu2 %1790  ;;  %vm1572_vm4 = vweird.f32 %v4744_v47  ;;  %v1789_v15 = vpop.permute.xlu0 %1788 }
 0x6b1   : > { %v1796_v60 = vsel %vm524_vm1, %v1791_v11, 0  ;;  %vm1573_vm6 = vmor %vm1571_vm5, %vm1572_vm4  ;;  %v1659_v28 = vpack.c.bf16 %v1595_v48, %v1595_v48 }
 0x6b2   : > { %v1568_v44 = vsub.f32 1.0, %v1567_v46  ;;  %1805 = vmatpush.bf16.xpose.msra.mxu0 %v1796_v60 }
 0x6b3   : > { %v1692_v7 = vunpack.c.l.b16 %v1659_v28 }
 0x6b4   : > { %v1569_v24 = vmul.f32 %v4744_v47, %v1568_v44 }
 0x6b6   : > { %v1570_v27 = vadd.f32 %v4744_v47, %v1569_v24 }
 0x6b8   : > { %v1574_v4 = vsel %vm1573_vm6, %v4744_v47, %v1570_v27 }
 0x6b9   : > { %v1579_v3 = vsel %vm1576_vm7, %v1578_v61, %v1574_v4 }
 0x6ba   : > { %v1580_v18 = vmul.f32 %v5500_v16, %v1579_v3 }
 0x6bc   : > { %v1658_v58 = vpack.c.bf16 %v1580_v18, %v1580_v18 }
 0x6be   : > { %v1691_v5 = vunpack.c.l.b16 %v1658_v58 }
 0x6c0   : > { %v1693_v8 = vpack.c.b16 %v1692_v7, %v1691_v5 }
 0x6c2   : > { %4344 = vmatmul.msk.bf16.vlgmr.msrb.gmra.mxu0 %vm643_vm2, %v1693_v8 }
 0x6d2   : > { %4348 = vmatmul.msk.bf16.vlgmr.msra.gmra.mxu0 %vm524_vm1, %v1789_v15 }
 0x6f4   : > { %v5559_v39 = vpop.f32.mrf.mxu3 }
 0x6f9   : > { %v5561_v20 = vpop.f32.mrf.mxu1 }
 0x6fc   : > { %v5563_v53 = vpop.f32.mrf.mxu3 }
 0x701   : > { %v5565_v45 = vpop.f32.mrf.mxu1 }
 0x704   : > { %v5569_v13 = vpop.f32.mrf.mxu2  ;;  %v1783_v59 = vpop.f32.mrf.mxu3 }
 0x705   : > { %6578 = vst [vmem:[#allocation15_spill] sm:$0xff] %v5569_v13  ;;  %v1860_v17 = vmul.f32 0.35355338, %v1783_v59 }
 0x707   : > { %v1868_v30 = vsel %vm643_vm2, %v1860_v17, -inf }
 0x708   : > { %1869 = vmax.xlane.f32.xlu1 %v1868_v30 }
 0x709   : > { %v1831_v21 = vpop.f32.mrf.mxu1 }
 0x70a   : > { %v1864_v38 = vmul.f32 0.35355338, %v1831_v21 }
 0x70c   : > { %v5572_v31 = vpop.f32.mrf.mxu2  ;;  %v1880_v47 = vsel %vm643_vm2, %v1864_v38, -inf  ;;  %v1785_v28 = vpop.f32.mrf.mxu3 }
 0x70d   : > { %6579 = vst [vmem:[#allocation16_spill] sm:$0xff] %v5572_v31  ;;  %v1861_v5 = vmul.f32 0.35355338, %v1785_v28 }
 0x70f   : > { %v1871_v7 = vsel %vm643_vm2, %v1861_v5, -inf }
 0x710   : > { %1881 = vmax.xlane.f32.xlu1 %v1880_v47 }
 0x711   : > { %v1833_v35 = vpop.f32.mrf.mxu1 }
 0x712   : > { %v1865_v46 = vmul.f32 0.35355338, %v1833_v35 }
 0x714   : > { %v1883_v11 = vsel %vm643_vm2, %v1865_v46, -inf  ;;  %v1855_v44 = vpop.f32.mrf.mxu2 }
 0x715   : > { %v1866_v27 = vmul.f32 0.35355338, %v1855_v44 }
 0x717   : > { %v1886_v3 = vsel %vm643_vm2, %v1866_v27, -inf }
 0x718   : > { %1884 = vmax.xlane.f32.xlu1 %v1883_v11 }
 0x71c   : > { %v1857_v1 = vpop.f32.mrf.mxu2 }
 0x71d   : > { %v1867_v48 = vmul.f32 0.35355338, %v1857_v1 }
 0x71f   : > { %v1889_v58 = vsel %vm643_vm2, %v1867_v48, -inf }
 0x731   : > { %2170 = vrot.lane.b32.xlu1 %v5147_v36, %s4988_s15 }
 0x73f   : > { %v5580_v32 = vpop.f32.mrf.mxu0 }
 0x740   : > { %6580 = vst [vmem:[#allocation17_spill] sm:$0xff] %v5580_v32 }
 0x747   : > { %v5582_v60 = vpop.f32.mrf.mxu0 }
 0x748   : > { %6581 = vst [vmem:[#allocation18_spill] sm:$0xff] %v5582_v60 }
 0x74f   : > { %v1807_v37 = vpop.f32.mrf.mxu0 }
 0x750   : > { %v5584_v29 = vmul.f32 0.35355338, %v1807_v37 }
 0x752   : > { %v1874_v24 = vsel %vm643_vm2, %v5584_v29, -inf }
 0x753   : > { %1875 = vmax.xlane.f32.xlu2 %v1874_v24 }
 0x757   : > { %v1809_v61 = vpop.f32.mrf.mxu0 }
 0x758   : > { %v5588_v4 = vmul.f32 0.35355338, %v1809_v61 }
 0x75a   : > { %v1877_v18 = vsel %vm643_vm2, %v5588_v4, -inf }
 0x75b   : > { %1887 = vmax.xlane.f32.xlu2 %v1886_v3  ;;  %1878 = vmax.xlane.f32.xlu0 %v1877_v18 }
 0x75c   : > { %1890 = vmax.xlane.f32.xlu1 %v1889_v58 }
 0x763   : > { %1872 = vmax.xlane.f32.xlu0 %v1871_v7 }
 0x773   : > { %2073 = vrot.lane.b32.xlu2 %v5175_v23, %s4987_s14 }
 0x777   : > { %2148 = vrot.lane.b32.xlu0 %v5192_v49, %s4987_s14 }
 0x77b   : > { %v1870_v8 = vpop.xlane.xlu1 %1869 }
 0x77c   : > { %v1892_v15 = vsub.f32 %v1860_v17, %v1870_v8 }
 0x77e   : > { %v1900_v59 = vmul.f32 1.442695, %v1892_v15 }
 0x780   : > { %4745 = vpow2.f32 %v1900_v59 }
 0x783   : > { %v1882_v30 = vpop.xlane.xlu1 %1881 }
 0x784   : > { %v1896_v44 = vsub.f32 %v1864_v38, %v1882_v30 }
 0x786   : > { %v5599_v21 = vpop.eup %4745  ;;  %v1908_v24 = vmul.f32 1.442695, %v1896_v44 }
 0x787   : > { %v1916_v47 = vsel %vm643_vm2, %v5599_v21, 0.0 }
 0x788   : > { %1917 = vadd.xlane.f32.xlu1 %v1916_v47 }
 0x78b   : > { %v1885_v35 = vpop.xlane.xlu1 %1884 }
 0x78c   : > { %v1897_v11 = vsub.f32 %v1865_v46, %v1885_v35 }
 0x78e   : > { %v1910_v37 = vmul.f32 1.442695, %v1897_v11 }
 0x790   : > { %4747 = vpow2.f32 %v1910_v37 }
 0x791   : > { %4749 = vpow2.f32 %v1908_v24 }
 0x796   : > { %v5603_v1 = vpop.eup %4747 }
 0x797   : > { %v1931_v17 = vsel %vm643_vm2, %v5603_v1, 0.0  ;;  %v5607_v61 = vpop.eup %4749 }
 0x798   : > { %1932 = vadd.xlane.f32.xlu1 %v1931_v17  ;;  %v1928_v3 = vsel %vm643_vm2, %v5607_v61, 0.0 }
 0x7a1   : > { %1929 = vadd.xlane.f32.xlu0 %v1928_v3 }
 0x7a3   : > { %v2171_v46 = vpop.permute.xlu1 %2170 }
 0x7a4   : > { %v2176_v35 = vsel %vm524_vm1, %v2171_v46, 0 }
 0x7b1   : > { %2123 = vrot.lane.b32.xlu1 %v5189_v41, %s4987_s14 }
 0x7c6   : > { %v1876_v38 = vpop.xlane.xlu2 %1875 }
 0x7ce   : > { %v1888_v18 = vpop.xlane.xlu2 %1887  ;;  %v1879_v28 = vpop.xlane.xlu0 %1878 }
 0x7cf   : > { %v1898_v58 = vsub.f32 %v1866_v27, %v1888_v18  ;;  %v1891_v7 = vpop.xlane.xlu1 %1890  ;;  %v1895_v18 = vsub.f32 %v5588_v4, %v1879_v28 }
 0x7d0   : > { %v1899_v8 = vsub.f32 %v1867_v48, %v1891_v7 }
 0x7d1   : > { %v1912_v15 = vmul.f32 1.442695, %v1898_v58  ;;  %v1906_v58 = vmul.f32 1.442695, %v1895_v18 }
 0x7d2   : > { %v1914_v59 = vmul.f32 1.442695, %v1899_v8  ;;  %v1894_v8 = vsub.f32 %v5584_v29, %v1876_v38 }
 0x7d3   : > { %4751 = vpow2.f32 %v1912_v15 }
 0x7d4   : > { %4753 = vpow2.f32 %v1914_v59 }
 0x7d6   : > { %v2074_v30 = vpop.permute.xlu2 %2073  ;;  %v1873_v47 = vpop.xlane.xlu0 %1872 }
 0x7d7   : > { %v1893_v11 = vsub.f32 %v1861_v5, %v1873_v47  ;;  %2086 = vmatpush.bf16.msrb.mxu3 %v2074_v30 }
 0x7d9   : > { %v5614_v44 = vpop.eup %4751  ;;  %v1902_v37 = vmul.f32 1.442695, %v1893_v11 }
 0x7da   : > { %v1934_v24 = vsel %vm643_vm2, %v5614_v44, 0.0  ;;  %v5618_v27 = vpop.eup %4753 }
 0x7db   : > { %2185 = vmatpush.bf16.xpose.msra.mxu3 %v2176_v35  ;;  %4755 = vpow2.f32 %v1902_v37  ;;  %1935 = vadd.xlane.f32.xlu0 %v1934_v24  ;;  %v1937_v48 = vsel %vm643_vm2, %v5618_v27, 0.0  ;;  %v1904_v35 = vmul.f32 1.442695, %v1894_v8 }
 0x7dc   : > { %1938 = vadd.xlane.f32.xlu1 %v1937_v48 }
 0x7e1   : > { %v5622_v17 = vpop.eup %4755 }
 0x7e2   : > { %v1919_v5 = vsel %vm643_vm2, %v5622_v17, 0.0 }
 0x7e3   : > { %1920 = vadd.xlane.f32.xlu2 %v1919_v5 }
 0x7e9   : > { %v2149_v3 = vpop.permute.xlu0 %2148 }
 0x7ea   : > { %2161 = vmatpush.bf16.msra.mxu2 %v2149_v3 }
 0x7ef   : > { %2242 = vrot.lane.b32.xlu0 %v5173_v22, %s4988_s15 }
 0x7f5   : > { %2240 = vrot.lane.b32.xlu1 %v5184_v34, %s4988_s15 }
 0x7fb   : > { %2168 = vrot.lane.b32.xlu2 %v5151_v42, %s4988_s15  ;;  %v5634_v46 = vpop.xlane.xlu1 %1917 }
 0x7fc   : > { %vm1945_vm4 = vweird.f32 %v5634_v46 }
 0x7fd   : > { %2218 = vrot.lane.b32.xlu1 %v5163_v2, %s4988_s15 }
 0x805   : > { %2216 = vrot.lane.b32.xlu1 %v5167_v9, %s4988_s15 }
 0x80b   : > { %v1933_v7 = vpop.xlane.xlu1 %1932 }
 0x80c   : > { %4757 = vrcp.f32 %v1933_v7  ;;  %v2026_v28 = vand.u32 2147483648, %v1933_v7  ;;  %vm2020_vm9 = vweird.f32 %v1933_v7  ;;  %v2024_v48 = vand.u32 2147483647, %v1933_v7 }
 0x80d   : > { %2098 = vrot.lane.b32.xlu1 %v5182_v25, %s4987_s14  ;;  %4759 = vpow2.f32 %v1906_v58 }
 0x80e   : > { %v2027_v3 = vor.u32 1.1754944e-38, %v2026_v28  ;;  %vm2025_vm11 = vcmp.eq.f32.partialorder %v2024_v48, 8.507059e+37 }
 0x812   : > { %v4758_v15 = vpop.eup %4757 }
 0x813   : > { %v2016_v59 = vmul.f32 %v4758_v15, %v1933_v7  ;;  %v5642_v47 = vpop.eup %4759  ;;  %vm2021_vm8 = vweird.f32 %v4758_v15 }
 0x814   : > { %v1930_v30 = vpop.xlane.xlu0 %1929  ;;  %v1925_v4 = vsel %vm643_vm2, %v5642_v47, 0.0  ;;  %vm2022_vm10 = vmor %vm2020_vm9, %vm2021_vm8 }
 0x815   : > { %4761 = vrcp.f32 %v1930_v30  ;;  %v2017_v11 = vsub.f32 1.0, %v2016_v59  ;;  %v2011_v8 = vand.u32 2147483648, %v1930_v30  ;;  %v2009_v33 = vand.u32 2147483647, %v1930_v30 }
 0x816   : > { %4763 = vpow2.f32 %v1904_v35  ;;  %vm2005_vm13 = vweird.f32 %v1930_v30 }
 0x817   : > { %v2018_v37 = vmul.f32 %v4758_v15, %v2017_v11  ;;  %v2012_v7 = vor.u32 1.1754944e-38, %v2011_v8  ;;  %vm2010_vm15 = vcmp.eq.f32.partialorder %v2009_v33, 8.507059e+37  ;;  %4765 = vrcp.f32 %v5634_v46 }
 0x819   : > { %1926 = vadd.xlane.f32.xlu0 %v1925_v4  ;;  %v2019_v24 = vadd.f32 %v4758_v15, %v2018_v37 }
 0x81b   : > { %v4762_v29 = vpop.eup %4761  ;;  %v2023_v38 = vsel %vm2022_vm10, %v4758_v15, %v2019_v24 }
 0x81c   : > { %v2001_v5 = vmul.f32 %v4762_v29, %v1930_v30  ;;  %v2028_v58 = vsel %vm2025_vm11, %v2027_v3, %v2023_v38  ;;  %v5646_v59 = vpop.eup %4763  ;;  %vm2006_vm12 = vweird.f32 %v4762_v29 }
 0x81d   : > { %v2029_v35 = vmul.f32 %v5603_v1, %v2028_v58  ;;  %vm2007_vm14 = vmor %vm2005_vm13, %vm2006_vm12  ;;  %v1922_v15 = vsel %vm643_vm2, %v5646_v59, 0.0 }
 0x81e   : > { %v2002_v18 = vsub.f32 1.0, %v2001_v5 }
 0x81f   : > { %v2065_v48 = vpack.c.bf16 %v2029_v35, %v2029_v35 }
 0x820   : > { %v2003_v11 = vmul.f32 %v4762_v29, %v2002_v18 }
 0x821   : > { %v2121_v3 = vunpack.c.l.b16 %v2065_v48 }
 0x822   : > { %v2004_v16 = vadd.f32 %v4762_v29, %v2003_v11 }
 0x823   : > { %v2124_v4 = vpop.permute.xlu1 %2123 }
 0x824   : > { %v2008_v37 = vsel %vm2007_vm14, %v4762_v29, %v2004_v16  ;;  %1923 = vadd.xlane.f32.xlu2 %v1922_v15  ;;  %2136 = vmatpush.bf16.msra.mxu1 %v2124_v4  ;;  %v4766_v16 = vpop.eup %4765  ;;  %v1949_v4 = vand.u32 2147483647, %v5634_v46 }
 0x825   : > { %v2013_v28 = vsel %vm2010_vm15, %v2012_v7, %v2008_v37  ;;  %v1941_v33 = vmul.f32 %v4766_v16, %v5634_v46  ;;  %vm1946_vm3 = vweird.f32 %v4766_v16 }
 0x826   : > { %v2014_v24 = vmul.f32 %v5607_v61, %v2013_v28  ;;  %v1951_v28 = vand.u32 2147483648, %v5634_v46  ;;  %vm5662_vm5 = vmor %vm1945_vm4, %vm1946_vm3  ;;  %vm1950_vm9 = vcmp.eq.f32.partialorder %v1949_v4, 8.507059e+37 }
 0x827   : > { %v1942_v61 = vsub.f32 1.0, %v1941_v33 }
 0x828   : > { %v2064_v38 = vpack.c.bf16 %v2014_v24, %v2014_v24  ;;  %v1952_v46 = vor.u32 1.1754944e-38, %v1951_v28 }
 0x829   : > { %v1943_v18 = vmul.f32 %v4766_v16, %v1942_v61 }
 0x82a   : > { %v2120_v5 = vunpack.c.l.b16 %v2064_v38 }
 0x82b   : > { %v1944_v7 = vadd.f32 %v4766_v16, %v1943_v18 }
 0x82c   : > { %v2122_v30 = vpack.c.b16 %v2121_v3, %v2120_v5 }
 0x82d   : > { %2192 = vrot.lane.b32.xlu0 %v5159_v57, %s4988_s15 }
 0x82e   : > { %4353 = vmatmul.msk.bf16.vlgmr.msra.gmra.mxu1 %vm643_vm2, %v2122_v30  ;;  %v1948_v30 = vsel %vm5662_vm5, %v4766_v16, %v1944_v7 }
 0x83c   : > { %2194 = vrot.lane.b32.xlu2 %v5155_v50, %s4988_s15 }
 0x84e   : > { %v1936_v1 = vpop.xlane.xlu0 %1935 }
 0x84f   : > { %4767 = vrcp.f32 %v1936_v1  ;;  %v1939_v29 = vpop.xlane.xlu1 %1938  ;;  %v2039_v24 = vand.u32 2147483647, %v1936_v1  ;;  %v2041_v48 = vand.u32 2147483648, %v1936_v1  ;;  %vm2035_vm7 = vweird.f32 %v1936_v1 }
 0x850   : > { %4769 = vrcp.f32 %v1939_v29  ;;  %v2056_v33 = vand.u32 2147483648, %v1939_v29  ;;  %vm2050_vm12 = vweird.f32 %v1939_v29 }
 0x851   : > { %vm2040_vm11 = vcmp.eq.f32.partialorder %v2039_v24, 8.507059e+37  ;;  %v2042_v55 = vor.u32 1.1754944e-38, %v2041_v48 }
 0x852   : > { %v2057_v16 = vor.u32 1.1754944e-38, %v2056_v33 }
 0x855   : > { %v4768_v58 = vpop.eup %4767 }
 0x856   : > { %v2031_v8 = vmul.f32 %v4768_v58, %v1936_v1  ;;  %v1921_v11 = vpop.xlane.xlu2 %1920  ;;  %v4770_v35 = vpop.eup %4769  ;;  %vm2036_vm6 = vweird.f32 %v4768_v58 }
 0x857   : > { %4771 = vrcp.f32 %v1921_v11  ;;  %v2046_v37 = vmul.f32 %v4770_v35, %v1939_v29  ;;  %vm2051_vm8 = vweird.f32 %v4770_v35  ;;  %vm2037_vm10 = vmor %vm2035_vm7, %vm2036_vm6  ;;  %v1964_v4 = vand.u32 2147483647, %v1921_v11 }
 0x858   : > { %v2032_v15 = vsub.f32 1.0, %v2031_v8  ;;  %v2054_v8 = vand.u32 2147483647, %v1939_v29  ;;  %vm2052_vm13 = vmor %vm2050_vm12, %vm2051_vm8  ;;  %v1966_v28 = vand.u32 2147483648, %v1921_v11  ;;  %vm1960_vm3 = vweird.f32 %v1921_v11 }
 0x859   : > { %v2047_v3 = vsub.f32 1.0, %v2046_v37  ;;  %v1953_v37 = vsel %vm1950_vm9, %v1952_v46, %v1948_v30  ;;  %vm1965_vm5 = vcmp.eq.f32.partialorder %v1964_v4, 8.507059e+37 }
 0x85a   : > { %v2033_v5 = vmul.f32 %v4768_v58, %v2032_v15  ;;  %vm2055_vm14 = vcmp.eq.f32.partialorder %v2054_v8, 8.507059e+37 }
 0x85b   : > { %v2048_v18 = vmul.f32 %v4770_v35, %v2047_v3 }
 0x85c   : > { %v2034_v61 = vadd.f32 %v4768_v58, %v2033_v5 }
 0x85d   : > { %v4772_v52 = vpop.eup %4771  ;;  %v2049_v56 = vadd.f32 %v4770_v35, %v2048_v18 }
 0x85e   : > { %v2038_v26 = vsel %vm2037_vm10, %v4768_v58, %v2034_v61  ;;  %v1956_v15 = vmul.f32 %v4772_v52, %v1921_v11  ;;  %vm1961_vm15 = vweird.f32 %v4772_v52 }
 0x85f   : > { %v2043_v40 = vsel %vm2040_vm11, %v2042_v55, %v2038_v26  ;;  %v2053_v7 = vsel %vm2052_vm13, %v4770_v35, %v2049_v56  ;;  %v1954_v26 = vmul.f32 %v5599_v21, %v1953_v37  ;;  %vm1962_vm4 = vmor %vm1960_vm3, %vm1961_vm15  ;;  %v1967_v56 = vor.u32 1.1754944e-38, %v1966_v28 }
 0x860   : > { %v2044_v1 = vmul.f32 %v5614_v44, %v2043_v40  ;;  %v1957_v38 = vsub.f32 1.0, %v1956_v15  ;;  %v2058_v5 = vsel %vm2055_vm14, %v2057_v16, %v2053_v7 }
 0x861   : > { %v2243_v3 = vpop.permute.xlu0 %2242  ;;  %v2059_v29 = vmul.f32 %v5618_v27, %v2058_v5  ;;  %v2060_v46 = vpack.c.bf16 %v1954_v26, %v1954_v26 }
 0x862   : > { %v2066_v24 = vpack.c.bf16 %v2044_v1, %v2044_v1  ;;  %v1958_v48 = vmul.f32 %v4772_v52, %v1957_v38  ;;  %v2248_v58 = vsel %vm524_vm1, %v2243_v3, 0 }
 0x863   : > { %2257 = vmatpush.bf16.xpose.msrb.mxu2 %v2248_v58  ;;  %v2067_v40 = vpack.c.bf16 %v2059_v29, %v2059_v29  ;;  %v2070_v21 = vunpack.c.l.b16 %v2060_v46 }
 0x864   : > { %v2145_v55 = vunpack.c.l.b16 %v2066_v24  ;;  %v1959_v30 = vadd.f32 %v4772_v52, %v1958_v48 }
 0x865   : > { %v2146_v35 = vunpack.c.l.b16 %v2067_v40 }
 0x866   : > { %v1963_v44 = vsel %vm1962_vm4, %v4772_v52, %v1959_v30 }
 0x867   : > { %v1968_v33 = vsel %vm1965_vm5, %v1967_v56, %v1963_v44  ;;  %v2241_v18 = vpop.permute.xlu1 %2240  ;;  %v2147_v8 = vpack.c.b16 %v2146_v35, %v2145_v55 }
 0x868   : > { %v1969_v61 = vmul.f32 %v5622_v17, %v1968_v33  ;;  %v2169_v17 = vpop.permute.xlu2 %2168 }
 0x869   : > { %4354 = vmatmul.msk.bf16.vlgmr.msra.gmra.mxu2 %vm643_vm2, %v2147_v8 }
 0x86a   : > { %v2061_v15 = vpack.c.bf16 %v1969_v61, %v1969_v61 }
 0x86c   : > { %v2071_v27 = vunpack.c.l.b16 %v2061_v15 }
 0x86e   : > { %v2072_v37 = vpack.c.b16 %v2071_v27, %v2070_v21 }
 0x86f   : > { %v2219_v16 = vpop.permute.xlu1 %2218 }
 0x870   : > { %4351 = vmatmul.msk.bf16.vlgmr.msrb.gmra.mxu3 %vm643_vm2, %v2072_v37  ;;  %v2224_v11 = vsel %vm524_vm1, %v2219_v16, 0 }
 0x871   : > { %2233 = vmatpush.bf16.xpose.msrb.mxu1 %v2224_v11 }
 0x877   : > { %v2217_v52 = vpop.permute.xlu1 %2216 }
 0x878   : > { %4357 = vmatmul.msk.bf16.vlgmr.msrb.gmra.mxu1 %vm524_vm1, %v2217_v52 }
 0x879   : > { %4358 = vmatmul.msk.bf16.vlgmr.msrb.gmra.mxu2 %vm524_vm1, %v2241_v18 }
 0x87f   : > { %v2099_v1 = vpop.permute.xlu1 %2098 }
 0x880   : > { %4355 = vmatmul.msk.bf16.vlgmr.msra.gmra.mxu3 %vm524_vm1, %v2169_v17  ;;  %2111 = vmatpush.bf16.msrb.mxu0 %v2099_v1 }
 0x88c   : > { %v1927_v7 = vpop.xlane.xlu0 %1926 }
 0x88d   : > { %4773 = vrcp.f32 %v1927_v7  ;;  %v1996_v48 = vand.u32 2147483648, %v1927_v7  ;;  %vm1990_vm7 = vweird.f32 %v1927_v7  ;;  %v1994_v58 = vand.u32 2147483647, %v1927_v7 }
 0x88f   : > { %v1997_v40 = vor.u32 1.1754944e-38, %v1996_v48  ;;  %vm1995_vm9 = vcmp.eq.f32.partialorder %v1994_v58, 8.507059e+37 }
 0x893   : > { %v4774_v38 = vpop.eup %4773 }
 0x894   : > { %v1986_v5 = vmul.f32 %v4774_v38, %v1927_v7  ;;  %vm1991_vm6 = vweird.f32 %v4774_v38 }
 0x895   : > { %vm1992_vm8 = vmor %vm1990_vm7, %vm1991_vm6 }
 0x896   : > { %v1987_v4 = vsub.f32 1.0, %v1986_v5 }
 0x897   : > { %v1924_v28 = vpop.xlane.xlu2 %1923 }
 0x898   : > { %v1988_v3 = vmul.f32 %v4774_v38, %v1987_v4  ;;  %4775 = vrcp.f32 %v1924_v28  ;;  %v1981_v33 = vand.u32 2147483648, %v1924_v28  ;;  %v1979_v18 = vand.u32 2147483647, %v1924_v28 }
 0x899   : > { %vm1975_vm11 = vweird.f32 %v1924_v28 }
 0x89a   : > { %v1989_v24 = vadd.f32 %v4774_v38, %v1988_v3  ;;  %v1982_v15 = vor.u32 1.1754944e-38, %v1981_v33  ;;  %vm1980_vm13 = vcmp.eq.f32.partialorder %v1979_v18, 8.507059e+37 }
 0x89c   : > { %v1993_v26 = vsel %vm1992_vm8, %v4774_v38, %v1989_v24 }
 0x89d   : > { %v1998_v35 = vsel %vm1995_vm9, %v1997_v40, %v1993_v26 }
 0x89e   : > { %v4776_v29 = vpop.eup %4775  ;;  %v1999_v8 = vmul.f32 %v5642_v47, %v1998_v35 }
 0x89f   : > { %v1971_v55 = vmul.f32 %v4776_v29, %v1924_v28  ;;  %v2195_v30 = vpop.permute.xlu2 %2194  ;;  %vm1976_vm10 = vweird.f32 %v4776_v29  ;;  %v2193_v7 = vpop.permute.xlu0 %2192 }
 0x8a0   : > { %v2200_v56 = vsel %vm524_vm1, %v2195_v30, 0  ;;  %vm1977_vm12 = vmor %vm1975_vm11, %vm1976_vm10  ;;  %v2063_v37 = vpack.c.bf16 %v1999_v8, %v1999_v8 }
 0x8a1   : > { %v1972_v44 = vsub.f32 1.0, %v1971_v55  ;;  %2209 = vmatpush.bf16.xpose.msra.mxu0 %v2200_v56 }
 0x8a2   : > { %v2096_v52 = vunpack.c.l.b16 %v2063_v37 }
 0x8a3   : > { %v1973_v61 = vmul.f32 %v4776_v29, %v1972_v44 }
 0x8a5   : > { %v1974_v46 = vadd.f32 %v4776_v29, %v1973_v61 }
 0x8a7   : > { %v1978_v27 = vsel %vm1977_vm12, %v4776_v29, %v1974_v46 }
 0x8a8   : > { %v1983_v21 = vsel %vm1980_vm13, %v1982_v15, %v1978_v27 }
 0x8a9   : > { %v1984_v16 = vmul.f32 %v5646_v59, %v1983_v21 }
 0x8ab   : > { %v2062_v11 = vpack.c.bf16 %v1984_v16, %v1984_v16  ;;  %v5700_v55 = vpop.f32.mrf.mxu1 }
 0x8ad   : > { %v2095_v17 = vunpack.c.l.b16 %v2062_v11 }
 0x8af   : > { %v2097_v1 = vpack.c.b16 %v2096_v52, %v2095_v17 }
 0x8b1   : > { %4352 = vmatmul.msk.bf16.vlgmr.msrb.gmra.mxu0 %vm643_vm2, %v2097_v1 }
 0x8b3   : > { %v5708_v44 = vpop.f32.mrf.mxu1 }
 0x8c1   : > { %4356 = vmatmul.msk.bf16.vlgmr.msra.gmra.mxu0 %vm524_vm1, %v2193_v7 }
 0x8ec   : > { %v5684_v47 = vpop.f32.mrf.mxu2 }
 0x8f3   : > { %v5686_v38 = vpop.f32.mrf.mxu3 }
 0x8f4   : > { %6584 = vst [vmem:[#allocation19_spill] sm:$0xff] %v5686_v38  ;;  %v5688_v5 = vpop.f32.mrf.mxu2 }
 0x8f5   : > { %v2235_v61 = vpop.f32.mrf.mxu1 }
 0x8f6   : > { %v2268_v8 = vmul.f32 0.35355338, %v2235_v61 }
 0x8f8   : > { %v2284_v21 = vsel %vm643_vm2, %v2268_v8, -inf }
 0x8fb   : > { %v5692_v28 = vpop.f32.mrf.mxu3 }
 0x8fc   : > { %6585 = vst [vmem:[#allocation20_spill] sm:$0xff] %v5692_v28  ;;  %v2259_v27 = vpop.f32.mrf.mxu2 }
 0x8fd   : > { %v2237_v16 = vpop.f32.mrf.mxu1  ;;  %v2270_v11 = vmul.f32 0.35355338, %v2259_v27 }
 0x8fe   : > { %v2269_v52 = vmul.f32 0.35355338, %v2237_v16 }
 0x8ff   : > { %v2290_v1 = vsel %vm643_vm2, %v2270_v11, -inf }
 0x900   : > { %v2287_v17 = vsel %vm643_vm2, %v2269_v52, -inf }
 0x903   : > { %v2187_v3 = vpop.f32.mrf.mxu3 }
 0x904   : > { %v2264_v24 = vmul.f32 0.35355338, %v2187_v3  ;;  %v2261_v7 = vpop.f32.mrf.mxu2 }
 0x905   : > { %v2271_v3 = vmul.f32 0.35355338, %v2261_v7 }
 0x906   : > { %v2272_v48 = vsel %vm643_vm2, %v2264_v24, -inf }
 0x907   : > { %2273 = vmax.xlane.f32.xlu1 %v2272_v48  ;;  %v2293_v48 = vsel %vm643_vm2, %v2271_v3, -inf }
 0x90b   : > { %v2189_v58 = vpop.f32.mrf.mxu3 }
 0x90c   : > { %v2265_v29 = vmul.f32 0.35355338, %v2189_v58 }
 0x90e   : > { %v2275_v26 = vsel %vm643_vm2, %v2265_v29, -inf }
 0x90f   : > { %2276 = vmax.xlane.f32.xlu2 %v2275_v26 }
 0x920   : > { %2477 = vrot.lane.b32.xlu1 %v5175_v23, %s4988_s15 }
 0x92e   : > { %v5702_v30 = vpop.f32.mrf.mxu0 }
 0x92f   : > { %6586 = vst [vmem:[#allocation21_spill] sm:$0xff] %v5702_v30 }
 0x936   : > { %v5704_v40 = vpop.f32.mrf.mxu0 }
 0x937   : > { %6587 = vst [vmem:[#allocation22_spill] sm:$0xff] %v5704_v40 }
 0x93e   : > { %v2211_v35 = vpop.f32.mrf.mxu0 }
 0x93f   : > { %v5710_v33 = vmul.f32 0.35355338, %v2211_v35 }
 0x941   : > { %v2278_v18 = vsel %vm643_vm2, %v5710_v33, -inf }
 0x942   : > { %2279 = vmax.xlane.f32.xlu2 %v2278_v18 }
 0x946   : > { %v2213_v46 = vpop.f32.mrf.mxu0 }
 0x947   : > { %v5714_v15 = vmul.f32 0.35355338, %v2213_v46 }
 0x949   : > { %v2281_v37 = vsel %vm643_vm2, %v5714_v15, -inf }
 0x94a   : > { %2285 = vmax.xlane.f32.xlu1 %v2284_v21  ;;  %2282 = vmax.xlane.f32.xlu0 %v2281_v37 }
 0x952   : > { %2288 = vmax.xlane.f32.xlu1 %v2287_v17  ;;  %2291 = vmax.xlane.f32.xlu0 %v2290_v1 }
 0x95a   : > { %2294 = vmax.xlane.f32.xlu1 %v2293_v48 }
 0x966   : > { %2574 = vrot.lane.b32.xlu0 %v5147_v36, %s4989_s16 }
 0x97a   : > { %v2274_v58 = vpop.xlane.xlu1 %2273 }
 0x97b   : > { %v2296_v26 = vsub.f32 %v2264_v24, %v2274_v58 }
 0x97d   : > { %v2304_v35 = vmul.f32 1.442695, %v2296_v26 }
 0x97f   : > { %4777 = vpow2.f32 %v2304_v35 }
 0x982   : > { %v2277_v61 = vpop.xlane.xlu2 %2276 }
 0x983   : > { %v2297_v18 = vsub.f32 %v2265_v29, %v2277_v61 }
 0x985   : > { %v5724_v46 = vpop.eup %4777  ;;  %v2306_v27 = vmul.f32 1.442695, %v2297_v18 }
 0x986   : > { %v2320_v21 = vsel %vm643_vm2, %v5724_v46, 0.0 }
 0x987   : > { %4779 = vpow2.f32 %v2306_v27  ;;  %2321 = vadd.xlane.f32.xlu1 %v2320_v21 }
 0x98d   : > { %v5728_v37 = vpop.eup %4779 }
 0x98e   : > { %v2323_v16 = vsel %vm643_vm2, %v5728_v37, 0.0 }
 0x98f   : > { %2324 = vadd.xlane.f32.xlu2 %v2323_v16 }
 0x992   : > { %v2478_v17 = vpop.permute.xlu1 %2477 }
 0x993   : > { %2490 = vmatpush.bf16.msrb.mxu3 %v2478_v17 }
 0x9a0   : > { %2527 = vrot.lane.b32.xlu1 %v5189_v41, %s4988_s15 }
 0x9a8   : > { %2572 = vrot.lane.b32.xlu1 %v5151_v42, %s4989_s16 }
 0x9b0   : > { %2646 = vrot.lane.b32.xlu1 %v5173_v22, %s4989_s16 }
 0x9b5   : > { %v2280_v17 = vpop.xlane.xlu2 %2279 }
 0x9b8   : > { %2622 = vrot.lane.b32.xlu1 %v5163_v2, %s4989_s16 }
 0x9bd   : > { %v2283_v24 = vpop.xlane.xlu0 %2282  ;;  %v2286_v29 = vpop.xlane.xlu1 %2285 }
 0x9be   : > { %v2300_v1 = vsub.f32 %v2268_v8, %v2286_v29  ;;  %v2298_v8 = vsub.f32 %v5710_v33, %v2280_v17 }
 0x9c0   : > { %v2312_v7 = vmul.f32 1.442695, %v2300_v1 }
 0x9c2   : > { %4781 = vpow2.f32 %v2312_v7 }
 0x9c5   : > { %v2289_v48 = vpop.xlane.xlu1 %2288  ;;  %v2292_v58 = vpop.xlane.xlu0 %2291 }
 0x9c6   : > { %v2301_v26 = vsub.f32 %v2269_v52, %v2289_v48  ;;  %v2302_v18 = vsub.f32 %v2270_v11, %v2292_v58  ;;  %v2308_v11 = vmul.f32 1.442695, %v2298_v8 }
 0x9c8   : > { %v2314_v35 = vmul.f32 1.442695, %v2301_v26  ;;  %v5740_v61 = vpop.eup %4781  ;;  %v2316_v21 = vmul.f32 1.442695, %v2302_v18 }
 0x9c9   : > { %v2332_v27 = vsel %vm643_vm2, %v5740_v61, 0.0 }
 0x9ca   : > { %4783 = vpow2.f32 %v2314_v35  ;;  %2333 = vadd.xlane.f32.xlu2 %v2332_v27  ;;  %v2299_v35 = vsub.f32 %v5714_v15, %v2283_v24 }
 0x9cb   : > { %4785 = vpow2.f32 %v2316_v21 }
 0x9cc   : > { %v2310_v27 = vmul.f32 1.442695, %v2299_v35 }
 0x9cd   : > { %v2295_v16 = vpop.xlane.xlu1 %2294 }
 0x9ce   : > { %v2303_v56 = vsub.f32 %v2271_v3, %v2295_v16 }
 0x9d0   : > { %v5744_v59 = vpop.eup %4783  ;;  %v2318_v29 = vmul.f32 1.442695, %v2303_v56 }
 0x9d1   : > { %v2335_v52 = vsel %vm643_vm2, %v5744_v59, 0.0  ;;  %v5749_v1 = vpop.eup %4785 }
 0x9d2   : > { %2336 = vadd.xlane.f32.xlu0 %v2335_v52  ;;  %4787 = vpow2.f32 %v2318_v29  ;;  %v2338_v3 = vsel %vm643_vm2, %v5749_v1, 0.0 }
 0x9d3   : > { %4789 = vpow2.f32 %v2308_v11 }
 0x9d8   : > { %v2575_v7 = vpop.permute.xlu0 %2574  ;;  %v5754_v33 = vpop.eup %4787 }
 0x9d9   : > { %v2580_v48 = vsel %vm524_vm1, %v2575_v7, 0  ;;  %v5756_v58 = vpop.eup %4789  ;;  %v2341_v56 = vsel %vm643_vm2, %v5754_v33, 0.0 }
 0x9da   : > { %2589 = vmatpush.bf16.xpose.msra.mxu3 %v2580_v48  ;;  %2339 = vadd.xlane.f32.xlu0 %v2338_v3  ;;  %v2326_v26 = vsel %vm643_vm2, %v5756_v58, 0.0 }
 0x9e2   : > { %2342 = vadd.xlane.f32.xlu1 %v2341_v56  ;;  %2552 = vrot.lane.b32.xlu2 %v5192_v49, %s4988_s15 }
 0x9e3   : > { %2327 = vadd.xlane.f32.xlu0 %v2326_v26 }
 0x9f7   : > { %2620 = vrot.lane.b32.xlu0 %v5167_v9, %s4989_s16 }
 0x9fa   : > { %v2322_v18 = vpop.xlane.xlu1 %2321 }
 0x9fb   : > { %4791 = vrcp.f32 %v2322_v18  ;;  %2644 = vrot.lane.b32.xlu1 %v5184_v34, %s4989_s16  ;;  %v2355_v29 = vand.u32 2147483648, %v2322_v18  ;;  %vm2349_vm15 = vweird.f32 %v2322_v18  ;;  %v2353_v24 = vand.u32 2147483647, %v2322_v18 }
 0x9fc   : > { %4793 = vpow2.f32 %v2310_v27 }
 0x9fd   : > { %v2356_v56 = vor.u32 1.1754944e-38, %v2355_v29  ;;  %vm2354_vm4 = vcmp.eq.f32.partialorder %v2353_v24, 8.507059e+37 }
 0xa01   : > { %v4792_v21 = vpop.eup %4791 }
 0xa02   : > { %v2345_v16 = vmul.f32 %v4792_v21, %v2322_v18  ;;  %v2325_v17 = vpop.xlane.xlu2 %2324  ;;  %vm2350_vm14 = vweird.f32 %v4792_v21  ;;  %v5771_v11 = vpop.eup %4793 }
 0xa03   : > { %4795 = vrcp.f32 %v2325_v17  ;;  %2502 = vrot.lane.b32.xlu1 %v5182_v25, %s4988_s15  ;;  %vm2351_vm3 = vmor %vm2349_vm15, %vm2350_vm14  ;;  %v2329_v26 = vsel %vm643_vm2, %v5771_v11, 0.0  ;;  %vm2364_vm6 = vweird.f32 %v2325_v17  ;;  %s4172_s15 = scalar_lea.hbm %s6549_s6, %s4429_s12 }
 0xa04   : > { %v2346_v8 = vsub.f32 1.0, %v2345_v16  ;;  %v2370_v16 = vand.u32 2147483648, %v2325_v17 }
 0xa06   : > { %v2347_v52 = vmul.f32 %v4792_v21, %v2346_v8 }
 0xa08   : > { %v2348_v15 = vadd.f32 %v4792_v21, %v2347_v52  ;;  %v2368_v52 = vand.u32 2147483647, %v2325_v17 }
 0xa09   : > { %v4796_v7 = vpop.eup %4795 }
 0xa0a   : > { %v2352_v48 = vsel %vm2351_vm3, %v4792_v21, %v2348_v15  ;;  %v2360_v3 = vmul.f32 %v4796_v7, %v2325_v17  ;;  %vm2365_vm5 = vweird.f32 %v4796_v7  ;;  %v2371_v21 = vor.u32 1.1754944e-38, %v2370_v16 }
 0xa0b   : > { %2596 = vrot.lane.b32.xlu1 %v5159_v57, %s4989_s16  ;;  %2330 = vadd.xlane.f32.xlu2 %v2329_v26  ;;  %v2357_v27 = vsel %vm2354_vm4, %v2356_v56, %v2352_v48  ;;  %vm2366_vm7 = vmor %vm2364_vm6, %vm2365_vm5  ;;  %vm2369_vm8 = vcmp.eq.f32.partialorder %v2368_v52, 8.507059e+37 }
 0xa0c   : > { %v2361_v35 = vsub.f32 1.0, %v2360_v3  ;;  %v2358_v18 = vmul.f32 %v5724_v46, %v2357_v27 }
 0xa0e   : > { %v2362_v8 = vmul.f32 %v4796_v7, %v2361_v35  ;;  %v2464_v51 = vpack.c.bf16 %v2358_v18, %v2358_v18 }
 0xa10   : > { %v2363_v4 = vadd.f32 %v4796_v7, %v2362_v8  ;;  %v2474_v48 = vunpack.c.l.b16 %v2464_v51 }
 0xa12   : > { %v2367_v29 = vsel %vm2366_vm7, %v4796_v7, %v2363_v4  ;;  %v2528_v15 = vpop.permute.xlu1 %2527 }
 0xa13   : > { %v2372_v62 = vsel %vm2369_vm8, %v2371_v21, %v2367_v29  ;;  %2540 = vmatpush.bf16.msra.mxu1 %v2528_v15 }
 0xa14   : > { %v2373_v24 = vmul.f32 %v5728_v37, %v2372_v62 }
 0xa16   : > { %v2465_v3 = vpack.c.bf16 %v2373_v24, %v2373_v24 }
 0xa18   : > { %v2475_v56 = vunpack.c.l.b16 %v2465_v3 }
 0xa1a   : > { %v2573_v26 = vpop.permute.xlu1 %2572  ;;  %v2476_v35 = vpack.c.b16 %v2475_v56, %v2474_v48 }
 0xa1c   : > { %4359 = vmatmul.msk.bf16.vlgmr.msrb.gmra.mxu3 %vm643_vm2, %v2476_v35 }
 0xa22   : > { %v2647_v46 = vpop.permute.xlu1 %2646 }
 0xa23   : > { %2598 = vrot.lane.b32.xlu2 %v5155_v50, %s4989_s16  ;;  %v2652_v16 = vsel %vm524_vm1, %v2647_v46, 0 }
 0xa2a   : > { %v2623_v17 = vpop.permute.xlu1 %2622 }
 0xa2b   : > { %v2628_v4 = vsel %vm524_vm1, %v2623_v17, 0  ;;  %2881 = vrot.lane.b32.xlu2 %v5175_v23, %s4989_s16 }
 0xa2c   : > { %4363 = vmatmul.msk.bf16.vlgmr.msra.gmra.mxu3 %vm524_vm1, %v2573_v26  ;;  %2637 = vmatpush.bf16.xpose.msrb.mxu1 %v2628_v4 }
 0xa3d   : > { %v2334_v62 = vpop.xlane.xlu2 %2333 }
 0xa3e   : > { %4797 = vrcp.f32 %v2334_v62  ;;  %v2415_v18 = vand.u32 2147483648, %v2334_v62  ;;  %vm2409_vm10 = vweird.f32 %v2334_v62  ;;  %v2413_v29 = vand.u32 2147483647, %v2334_v62 }
 0xa40   : > { %v2416_v56 = vor.u32 1.1754944e-38, %v2415_v18  ;;  %vm2414_vm12 = vcmp.eq.f32.partialorder %v2413_v29, 8.507059e+37 }
 0xa44   : > { %v4798_v51 = vpop.eup %4797 }
 0xa45   : > { %v2405_v37 = vmul.f32 %v4798_v51, %v2334_v62  ;;  %v2553_v7 = vpop.permute.xlu2 %2552  ;;  %v2337_v27 = vpop.xlane.xlu0 %2336  ;;  %vm2410_vm9 = vweird.f32 %v4798_v51 }
 0xa46   : > { %4799 = vrcp.f32 %v2337_v27  ;;  %2565 = vmatpush.bf16.msra.mxu2 %v2553_v7  ;;  %vm2411_vm11 = vmor %vm2409_vm10, %vm2410_vm9  ;;  %v2430_v46 = vand.u32 2147483648, %v2337_v27  ;;  %v2428_v4 = vand.u32 2147483647, %v2337_v27  ;;  %vm2424_vm14 = vweird.f32 %v2337_v27 }
 0xa47   : > { %v2406_v8 = vsub.f32 1.0, %v2405_v37 }
 0xa48   : > { %v2431_v62 = vor.u32 1.1754944e-38, %v2430_v46  ;;  %vm2429_vm3 = vcmp.eq.f32.partialorder %v2428_v4, 8.507059e+37 }
 0xa49   : > { %v2407_v52 = vmul.f32 %v4798_v51, %v2406_v8 }
 0xa4a   : > { %2661 = vmatpush.bf16.xpose.msrb.mxu2 %v2652_v16 }
 0xa4b   : > { %v2408_v21 = vadd.f32 %v4798_v51, %v2407_v52 }
 0xa4c   : > { %v4800_v15 = vpop.eup %4799 }
 0xa4d   : > { %v2412_v24 = vsel %vm2411_vm11, %v4798_v51, %v2408_v21  ;;  %v2420_v3 = vmul.f32 %v4800_v15, %v2337_v27  ;;  %v2340_v48 = vpop.xlane.xlu0 %2339  ;;  %vm2425_vm13 = vweird.f32 %v4800_v15 }
 0xa4e   : > { %4801 = vrcp.f32 %v2340_v48  ;;  %v2417_v35 = vsel %vm2414_vm12, %v2416_v56, %v2412_v24  ;;  %vm2426_vm15 = vmor %vm2424_vm14, %vm2425_vm13  ;;  %vm2439_vm5 = vweird.f32 %v2340_v48 }
 0xa4f   : > { %v2421_v26 = vsub.f32 1.0, %v2420_v3  ;;  %v2418_v37 = vmul.f32 %v5740_v61, %v2417_v35  ;;  %v2443_v61 = vand.u32 2147483647, %v2340_v48 }
 0xa51   : > { %v2422_v17 = vmul.f32 %v4800_v15, %v2421_v26  ;;  %v2468_v21 = vpack.c.bf16 %v2418_v37, %v2418_v37  ;;  %v2445_v26 = vand.u32 2147483648, %v2340_v48  ;;  %vm2444_vm7 = vcmp.eq.f32.partialorder %v2443_v61, 8.507059e+37 }
 0xa53   : > { %v2423_v7 = vadd.f32 %v4800_v15, %v2422_v17  ;;  %v2524_v27 = vunpack.c.l.b16 %v2468_v21 }
 0xa54   : > { %v4802_v16 = vpop.eup %4801 }
 0xa55   : > { %v2343_v8 = vpop.xlane.xlu1 %2342  ;;  %v2427_v51 = vsel %vm2426_vm15, %v4800_v15, %v2423_v7  ;;  %v2435_v52 = vmul.f32 %v4802_v16, %v2340_v48  ;;  %vm2440_vm4 = vweird.f32 %v4802_v16  ;;  %v2446_v7 = vor.u32 1.1754944e-38, %v2445_v26 }
 0xa56   : > { %4803 = vrcp.f32 %v2343_v8  ;;  %v2432_v18 = vsel %vm2429_vm3, %v2431_v62, %v2427_v51  ;;  %vm2441_vm6 = vmor %vm2439_vm5, %vm2440_vm4  ;;  %vm2454_vm9 = vweird.f32 %v2343_v8 }
 0xa57   : > { %v2433_v29 = vmul.f32 %v5744_v59, %v2432_v18  ;;  %v2436_v24 = vsub.f32 1.0, %v2435_v52  ;;  %v2460_v59 = vand.u32 2147483648, %v2343_v8  ;;  %v2458_v52 = vand.u32 2147483647, %v2343_v8 }
 0xa59   : > { %v2469_v3 = vpack.c.bf16 %v2433_v29, %v2433_v29  ;;  %v2437_v56 = vmul.f32 %v4802_v16, %v2436_v24  ;;  %v2461_v48 = vor.u32 1.1754944e-38, %v2460_v59  ;;  %vm2459_vm11 = vcmp.eq.f32.partialorder %v2458_v52, 8.507059e+37 }
 0xa5b   : > { %v2525_v17 = vunpack.c.l.b16 %v2469_v3  ;;  %v2438_v54 = vadd.f32 %v4802_v16, %v2437_v56 }
 0xa5c   : > { %v4804_v35 = vpop.eup %4803 }
 0xa5d   : > { %v2450_v15 = vmul.f32 %v4804_v35, %v2343_v8  ;;  %v2526_v46 = vpack.c.b16 %v2525_v17, %v2524_v27  ;;  %v2442_v4 = vsel %vm2441_vm6, %v4802_v16, %v2438_v54  ;;  %vm2455_vm8 = vweird.f32 %v4804_v35  ;;  %v2328_v16 = vpop.xlane.xlu0 %2327 }
 0xa5e   : > { %v2447_v62 = vsel %vm2444_vm7, %v2446_v7, %v2442_v4  ;;  %vm2456_vm10 = vmor %vm2454_vm9, %vm2455_vm8  ;;  %4805 = vrcp.f32 %v2328_v16  ;;  %vm2379_vm13 = vweird.f32 %v2328_v16 }
 0xa5f   : > { %v2451_v37 = vsub.f32 1.0, %v2450_v15  ;;  %4361 = vmatmul.msk.bf16.vlgmr.msra.gmra.mxu1 %vm643_vm2, %v2526_v46  ;;  %v2448_v18 = vmul.f32 %v5749_v1, %v2447_v62  ;;  %v2383_v62 = vand.u32 2147483647, %v2328_v16 }
 0xa61   : > { %v2452_v51 = vmul.f32 %v4804_v35, %v2451_v37  ;;  %v2470_v54 = vpack.c.bf16 %v2448_v18, %v2448_v18  ;;  %v2385_v37 = vand.u32 2147483648, %v2328_v16  ;;  %vm2384_vm15 = vcmp.eq.f32.partialorder %v2383_v62, 8.507059e+37 }
 0xa63   : > { %v2453_v21 = vadd.f32 %v4804_v35, %v2452_v51  ;;  %v2549_v26 = vunpack.c.l.b16 %v2470_v54 }
 0xa64   : > { %v4806_v1 = vpop.eup %4805 }
 0xa65   : > { %v2457_v29 = vsel %vm2456_vm10, %v4804_v35, %v2453_v21  ;;  %v2375_v35 = vmul.f32 %v4806_v1, %v2328_v16  ;;  %vm2380_vm12 = vweird.f32 %v4806_v1  ;;  %v2386_v21 = vor.u32 1.1754944e-38, %v2385_v37 }
 0xa66   : > { %v2462_v24 = vsel %vm2459_vm11, %v2461_v48, %v2457_v29  ;;  %vm2381_vm14 = vmor %vm2379_vm13, %vm2380_vm12 }
 0xa67   : > { %v2463_v3 = vmul.f32 %v5754_v33, %v2462_v24  ;;  %v2376_v46 = vsub.f32 1.0, %v2375_v35 }
 0xa69   : > { %v2471_v56 = vpack.c.bf16 %v2463_v3, %v2463_v3  ;;  %v2621_v15 = vpop.permute.xlu0 %2620  ;;  %v2377_v4 = vmul.f32 %v4806_v1, %v2376_v46 }
 0xa6b   : > { %v2550_v61 = vunpack.c.l.b16 %v2471_v56  ;;  %v2378_v33 = vadd.f32 %v4806_v1, %v2377_v4 }
 0xa6d   : > { %v2551_v27 = vpack.c.b16 %v2550_v61, %v2549_v26  ;;  %v2645_v17 = vpop.permute.xlu1 %2644  ;;  %v2382_v51 = vsel %vm2381_vm14, %v4806_v1, %v2378_v33 }
 0xa6e   : > { %v2387_v24 = vsel %vm2384_vm15, %v2386_v21, %v2382_v51 }
 0xa6f   : > { %4362 = vmatmul.msk.bf16.vlgmr.msra.gmra.mxu2 %vm643_vm2, %v2551_v27  ;;  %4365 = vmatmul.msk.bf16.vlgmr.msrb.gmra.mxu1 %vm524_vm1, %v2621_v15  ;;  %v2388_v26 = vmul.f32 %v5756_v58, %v2387_v24 }
 0xa71   : > { %v2466_v1 = vpack.c.bf16 %v2388_v26, %v2388_v26 }
 0xa73   : > { %v2499_v46 = vunpack.c.l.b16 %v2466_v1 }
 0xa75   : > { %v2503_v8 = vpop.permute.xlu1 %2502 }
 0xa76   : > { %2515 = vmatpush.bf16.msrb.mxu0 %v2503_v8 }
 0xa7e   : > { %v2331_v7 = vpop.xlane.xlu2 %2330 }
 0xa7f   : > { %4366 = vmatmul.msk.bf16.vlgmr.msrb.gmra.mxu2 %vm524_vm1, %v2645_v17  ;;  %4807 = vrcp.f32 %v2331_v7  ;;  %v2400_v54 = vand.u32 2147483648, %v2331_v7  ;;  %v2398_v56 = vand.u32 2147483647, %v2331_v7  ;;  %vm2394_vm4 = vweird.f32 %v2331_v7 }
 0xa81   : > { %v2401_v16 = vor.u32 1.1754944e-38, %v2400_v54  ;;  %vm2399_vm6 = vcmp.eq.f32.partialorder %v2398_v56, 8.507059e+37 }
 0xa85   : > { %v4808_v59 = vpop.eup %4807 }
 0xa86   : > { %v2390_v52 = vmul.f32 %v4808_v59, %v2331_v7  ;;  %v2599_v18 = vpop.permute.xlu2 %2598  ;;  %vm2395_vm3 = vweird.f32 %v4808_v59  ;;  %v2597_v7 = vpop.permute.xlu1 %2596 }
 0xa87   : > { %v2604_v48 = vsel %vm524_vm1, %v2599_v18, 0  ;;  %vm2396_vm5 = vmor %vm2394_vm4, %vm2395_vm3 }
 0xa88   : > { %v2391_v29 = vsub.f32 1.0, %v2390_v52  ;;  %2613 = vmatpush.bf16.xpose.msra.mxu0 %v2604_v48 }
 0xa8a   : > { %v2392_v3 = vmul.f32 %v4808_v59, %v2391_v29 }
 0xa8c   : > { %v2393_v61 = vadd.f32 %v4808_v59, %v2392_v3 }
 0xa8e   : > { %v2397_v27 = vsel %vm2396_vm5, %v4808_v59, %v2393_v61  ;;  %v2882_v17 = vpop.permute.xlu2 %2881 }
 0xa8f   : > { %v2402_v15 = vsel %vm2399_vm6, %v2401_v16, %v2397_v27  ;;  %2894 = vmatpush.bf16.msrb.mxu3 %v2882_v17 }
 0xa90   : > { %v2403_v8 = vmul.f32 %v5771_v11, %v2402_v15 }
 0xa92   : > { %v2467_v35 = vpack.c.bf16 %v2403_v8, %v2403_v8 }
 0xa94   : > { %v2500_v4 = vunpack.c.l.b16 %v2467_v35 }
 0xa96   : > { %v2501_v33 = vpack.c.b16 %v2500_v4, %v2499_v46 }
 0xa98   : > { %4360 = vmatmul.msk.bf16.vlgmr.msrb.gmra.mxu0 %vm643_vm2, %v2501_v33 }
 0xa9f   : > { %v5799_v37 = vpop.f32.mrf.mxu3 }
 0xaa7   : > { %v5801_v58 = vpop.f32.mrf.mxu3 }
 0xaa8   : > { %4364 = vmatmul.msk.bf16.vlgmr.msra.gmra.mxu0 %vm524_vm1, %v2597_v7 }
 0xaaf   : > { %v2591_v59 = vpop.f32.mrf.mxu3 }
 0xab0   : > { %v2668_v51 = vmul.f32 0.35355338, %v2591_v59 }
 0xab2   : > { %v2676_v11 = vsel %vm643_vm2, %v2668_v51, -inf }
 0xab3   : > { %2677 = vmax.xlane.f32.xlu1 %v2676_v11 }
 0xab7   : > { %v2593_v52 = vpop.f32.mrf.mxu3 }
 0xab8   : > { %v2669_v18 = vmul.f32 0.35355338, %v2593_v52 }
 0xaba   : > { %v2679_v21 = vsel %vm643_vm2, %v2669_v18, -inf }
 0xabb   : > { %2680 = vmax.xlane.f32.xlu0 %v2679_v21 }
 0xadc   : > { %v5808_v48 = vpop.f32.mrf.mxu1 }
 0xae4   : > { %v5810_v29 = vpop.f32.mrf.mxu1 }
 0xaec   : > { %v2639_v54 = vpop.f32.mrf.mxu1 }
 0xaed   : > { %v2672_v3 = vmul.f32 0.35355338, %v2639_v54 }
 0xaef   : > { %v2688_v56 = vsel %vm643_vm2, %v2672_v3, -inf }
 0xaf0   : > { %2689 = vmax.xlane.f32.xlu0 %v2688_v56 }
 0xaf2   : > { %v5815_v26 = vpop.f32.mrf.mxu2 }
 0xaf3   : > { %6588 = vst [vmem:[#allocation23_spill] sm:$0xff] %v5815_v26 }
 0xaf4   : > { %v2641_v61 = vpop.f32.mrf.mxu1 }
 0xaf5   : > { %v5817_v16 = vmul.f32 0.35355338, %v2641_v61 }
 0xaf7   : > { %v2691_v27 = vsel %vm643_vm2, %v5817_v16, -inf }
 0xaf8   : > { %2692 = vmax.xlane.f32.xlu2 %v2691_v27 }
 0xafa   : > { %v5821_v17 = vpop.f32.mrf.mxu2 }
 0xafb   : > { %6589 = vst [vmem:[#allocation24_spill] sm:$0xff] %v5821_v17 }
 0xb02   : > { %v2663_v1 = vpop.f32.mrf.mxu2 }
 0xb03   : > { %v5825_v8 = vmul.f32 0.35355338, %v2663_v1 }
 0xb05   : > { %v2694_v35 = vsel %vm643_vm2, %v5825_v8, -inf }
 0xb06   : > { %2695 = vmax.xlane.f32.xlu2 %v2694_v35 }
 0xb0a   : > { %v2665_v56 = vpop.f32.mrf.mxu2 }
 0xb0b   : > { %v2675_v61 = vmul.f32 0.35355338, %v2665_v56 }
 0xb0d   : > { %v2697_v15 = vsel %vm643_vm2, %v2675_v61, -inf }
 0xb15   : > { %v5829_v46 = vpop.f32.mrf.mxu0 }
 0xb16   : > { %6590 = vst [vmem:[#allocation25_spill] sm:$0xff] %v5829_v46 }
 0xb1d   : > { %v5831_v4 = vpop.f32.mrf.mxu0 }
 0xb1e   : > { %6591 = vst [vmem:[#allocation26_spill] sm:$0xff] %v5831_v4 }
 0xb25   : > { %v2615_v7 = vpop.f32.mrf.mxu0 }
 0xb26   : > { %v2678_v59 = vpop.xlane.xlu1 %2677  ;;  %v2670_v11 = vmul.f32 0.35355338, %v2615_v7 }
 0xb27   : > { %v2700_v52 = vsub.f32 %v2668_v51, %v2678_v59 }
 0xb28   : > { %v2682_v54 = vsel %vm643_vm2, %v2670_v11, -inf }
 0xb29   : > { %v2708_v21 = vmul.f32 1.442695, %v2700_v52  ;;  %2683 = vmax.xlane.f32.xlu1 %v2682_v54 }
 0xb2b   : > { %4809 = vpow2.f32 %v2708_v21 }
 0xb2d   : > { %v2617_v27 = vpop.f32.mrf.mxu0 }
 0xb2e   : > { %v2671_v1 = vmul.f32 0.35355338, %v2617_v27  ;;  %v2681_v7 = vpop.xlane.xlu0 %2680 }
 0xb2f   : > { %v2701_v54 = vsub.f32 %v2669_v18, %v2681_v7 }
 0xb30   : > { %v2685_v62 = vsel %vm643_vm2, %v2671_v1, -inf }
 0xb31   : > { %v5836_v35 = vpop.eup %4809  ;;  %2698 = vmax.xlane.f32.xlu1 %v2697_v15  ;;  %2686 = vmax.xlane.f32.xlu0 %v2685_v62  ;;  %v2710_v56 = vmul.f32 1.442695, %v2701_v54 }
 0xb32   : > { %v2724_v51 = vsel %vm643_vm2, %v5836_v35, 0.0 }
 0xb33   : > { %2725 = vadd.xlane.f32.xlu2 %v2724_v51 }
 0xb4a   : > { %2956 = vrot.lane.b32.xlu1 %v5192_v49, %s4989_s16 }
 0xb4b   : > { %2931 = vrot.lane.b32.xlu2 %v5189_v41, %s4989_s16 }
 0xb63   : > { %v2690_v59 = vpop.xlane.xlu0 %2689 }
 0xb64   : > { %v2704_v52 = vsub.f32 %v2672_v3, %v2690_v59 }
 0xb66   : > { %v2716_v21 = vmul.f32 1.442695, %v2704_v52 }
 0xb68   : > { %4811 = vpow2.f32 %v2716_v21 }
 0xb69   : > { %4813 = vpow2.f32 %v2710_v56 }
 0xb6b   : > { %v2693_v33 = vpop.xlane.xlu2 %2692 }
 0xb6c   : > { %v2705_v24 = vsub.f32 %v5817_v16, %v2693_v33 }
 0xb6e   : > { %v5846_v27 = vpop.eup %4811 }
 0xb6f   : > { %v2736_v62 = vsel %vm643_vm2, %v5846_v27, 0.0  ;;  %v5850_v15 = vpop.eup %4813 }
 0xb70   : > { %v2727_v51 = vsel %vm643_vm2, %v5850_v15, 0.0 }
 0xb74   : > { %2737 = vadd.xlane.f32.xlu1 %v2736_v62 }
 0xb79   : > { %v2696_v3 = vpop.xlane.xlu2 %2695 }
 0xb7c   : > { %2728 = vadd.xlane.f32.xlu1 %v2727_v51 }
 0xb95   : > { %2976 = vrot.lane.b32.xlu1 %v5151_v42, %s4990_s17 }
 0xb9c   : > { %v2684_v18 = vpop.xlane.xlu1 %2683 }
 0xb9d   : > { %v2702_v7 = vsub.f32 %v2670_v11, %v2684_v18  ;;  %3026 = vrot.lane.b32.xlu1 %v5163_v2, %s4990_s17  ;;  %v2718_v18 = vmul.f32 1.442695, %v2705_v24 }
 0xb9f   : > { %v2712_v59 = vmul.f32 1.442695, %v2702_v7  ;;  %v2706_v7 = vsub.f32 %v5825_v8, %v2696_v3 }
 0xba1   : > { %4815 = vpow2.f32 %v2712_v59 }
 0xba4   : > { %v2687_v52 = vpop.xlane.xlu0 %2686  ;;  %v2699_v21 = vpop.xlane.xlu1 %2698 }
 0xba5   : > { %v2703_v54 = vsub.f32 %v2671_v1, %v2687_v52  ;;  %v2707_v56 = vsub.f32 %v2675_v61, %v2699_v21  ;;  %2906 = vrot.lane.b32.xlu1 %v5182_v25, %s4989_s16 }
 0xba6   : > { %v2726_v62 = vpop.xlane.xlu2 %2725 }
 0xba7   : > { %v5860_v51 = vpop.eup %4815  ;;  %v2714_v60 = vmul.f32 1.442695, %v2703_v54  ;;  %v2722_v32 = vmul.f32 1.442695, %v2707_v56  ;;  %vm2753_vm8 = vweird.f32 %v2726_v62 }
 0xba8   : > { %v2730_v11 = vsel %vm643_vm2, %v5860_v51, 0.0 }
 0xba9   : > { %4817 = vpow2.f32 %v2714_v60  ;;  %2731 = vadd.xlane.f32.xlu0 %v2730_v11  ;;  %v2720_v60 = vmul.f32 1.442695, %v2706_v7 }
 0xbaa   : > { %4819 = vpow2.f32 %v2722_v32 }
 0xbab   : > { %4821 = vpow2.f32 %v2718_v18 }
 0xbac   : > { %4823 = vpow2.f32 %v2720_v60 }
 0xbad   : > { %3335 = vrot.lane.b32.xlu1 %v5189_v41, %s4990_s17  ;;  %4825 = vrcp.f32 %v2726_v62 }
 0xbae   : > { %v2932_v61 = vpop.permute.xlu2 %2931 }
 0xbaf   : > { %2944 = vmatpush.bf16.msra.mxu1 %v2932_v61  ;;  %v5867_v1 = vpop.eup %4817 }
 0xbb0   : > { %v5870_v16 = vpop.eup %4819  ;;  %v2733_v33 = vsel %vm643_vm2, %v5867_v1, 0.0 }
 0xbb1   : > { %2734 = vadd.xlane.f32.xlu0 %v2733_v33  ;;  %v2745_v32 = vsel %vm643_vm2, %v5870_v16, 0.0  ;;  %v5876_v24 = vpop.eup %4821  ;;  %v2759_v33 = vand.u32 2147483648, %v2726_v62 }
 0xbb2   : > { %2746 = vadd.xlane.f32.xlu2 %v2745_v32  ;;  %v2739_v59 = vsel %vm643_vm2, %v5876_v24, 0.0  ;;  %v5880_v8 = vpop.eup %4823  ;;  %v2757_v32 = vand.u32 2147483647, %v2726_v62 }
 0xbb3   : > { %v2742_v3 = vsel %vm643_vm2, %v5880_v8, 0.0  ;;  %v4826_v21 = vpop.eup %4825 }
 0xbb4   : > { %v2749_v54 = vmul.f32 %v4826_v21, %v2726_v62  ;;  %vm2754_vm7 = vweird.f32 %v4826_v21  ;;  %vm2758_vm10 = vcmp.eq.f32.partialorder %v2757_v32, 8.507059e+37 }
 0xbb5   : > { %vm2755_vm9 = vmor %vm2753_vm8, %vm2754_vm7 }
 0xbb6   : > { %v2750_v11 = vsub.f32 1.0, %v2749_v54 }
 0xbb8   : > { %v2751_v18 = vmul.f32 %v4826_v21, %v2750_v11 }
 0xbb9   : > { %2740 = vadd.xlane.f32.xlu0 %v2739_v59 }
 0xbba   : > { %v2752_v7 = vadd.f32 %v4826_v21, %v2751_v18 }
 0xbbc   : > { %v2957_v52 = vpop.permute.xlu1 %2956  ;;  %v2756_v59 = vsel %vm2755_vm9, %v4826_v21, %v2752_v7 }
 0xbbd   : > { %2969 = vmatpush.bf16.msra.mxu2 %v2957_v52 }
 0xbc1   : > { %2743 = vadd.xlane.f32.xlu0 %v2742_v3  ;;  %v2760_v3 = vor.u32 1.1754944e-38, %v2759_v33 }
 0xbc3   : > { %v2761_v4 = vsel %vm2758_vm10, %v2760_v3, %v2756_v59 }
 0xbc4   : > { %v2762_v11 = vmul.f32 %v5836_v35, %v2761_v4 }
 0xbc6   : > { %v2868_v12 = vpack.c.bf16 %v2762_v11, %v2762_v11 }
 0xbc8   : > { %v2878_v33 = vunpack.c.l.b16 %v2868_v12 }
 0xbca   : > { %3050 = vrot.lane.b32.xlu2 %v5173_v22, %s4990_s17 }
 0xbd2   : > { %3048 = vrot.lane.b32.xlu2 %v5184_v34, %s4990_s17 }
 0xbd5   : > { %2978 = vrot.lane.b32.xlu0 %v5147_v36, %s4990_s17 }
 0xbda   : > { %3002 = vrot.lane.b32.xlu2 %v5155_v50, %s4990_s17 }
 0xbdd   : > { %3024 = vrot.lane.b32.xlu0 %v5167_v9, %s4990_s17 }
 0xbe5   : > { %3000 = vrot.lane.b32.xlu0 %v5159_v57, %s4990_s17 }
 0xbe7   : > { %v5896_v56 = vpop.xlane.xlu1 %2737 }
 0xbe8   : > { %vm2813_vm8 = vweird.f32 %v5896_v56 }
 0xbed   : > { %3285 = vrot.lane.b32.xlu0 %v5175_v23, %s4990_s17 }
 0xbef   : > { %v2729_v61 = vpop.xlane.xlu1 %2728 }
 0xbf0   : > { %4827 = vrcp.f32 %v2729_v61  ;;  %v2774_v54 = vand.u32 2147483648, %v2729_v61  ;;  %v2772_v40 = vand.u32 2147483647, %v2729_v61  ;;  %vm2768_vm12 = vweird.f32 %v2729_v61 }
 0xbf1   : > { %4829 = vrcp.f32 %v5896_v56 }
 0xbf2   : > { %v2775_v18 = vor.u32 1.1754944e-38, %v2774_v54  ;;  %vm2773_vm14 = vcmp.eq.f32.partialorder %v2772_v40, 8.507059e+37 }
 0xbf6   : > { %v4828_v60 = vpop.eup %4827 }
 0xbf7   : > { %v2764_v52 = vmul.f32 %v4828_v60, %v2729_v61  ;;  %vm2769_vm11 = vweird.f32 %v4828_v60 }
 0xbf8   : > { %vm2770_vm13 = vmor %vm2768_vm12, %vm2769_vm11 }
 0xbf9   : > { %v2765_v46 = vsub.f32 1.0, %v2764_v52 }
 0xbfb   : > { %v2766_v30 = vmul.f32 %v4828_v60, %v2765_v46 }
 0xbfd   : > { %v2767_v13 = vadd.f32 %v4828_v60, %v2766_v30 }
 0xbff   : > { %v2771_v31 = vsel %vm2770_vm13, %v4828_v60, %v2767_v13 }
 0xc00   : > { %v2776_v62 = vsel %vm2773_vm14, %v2775_v18, %v2771_v31  ;;  %v4830_v31 = vpop.eup %4829 }
 0xc01   : > { %v2777_v21 = vmul.f32 %v5850_v15, %v2776_v62  ;;  %v2809_v12 = vmul.f32 %v4830_v31, %v5896_v56  ;;  %vm2814_vm5 = vweird.f32 %v4830_v31 }
 0xc02   : > { %vm5920_vm9 = vmor %vm2813_vm8, %vm2814_vm5 }
 0xc03   : > { %v2869_v7 = vpack.c.bf16 %v2777_v21, %v2777_v21  ;;  %v2810_v3 = vsub.f32 1.0, %v2809_v12 }
 0xc05   : > { %v2879_v32 = vunpack.c.l.b16 %v2869_v7  ;;  %v2811_v7 = vmul.f32 %v4830_v31, %v2810_v3 }
 0xc07   : > { %v2880_v59 = vpack.c.b16 %v2879_v32, %v2878_v33  ;;  %v5902_v52 = vpop.permute.xlu1 %2976 }
 0xc09   : > { %4367 = vmatmul.msk.bf16.vlgmr.msrb.gmra.mxu3 %vm643_vm2, %v2880_v59 }
 0xc0f   : > { %v3027_v46 = vpop.permute.xlu1 %3026 }
 0xc10   : > { %v3032_v30 = vsel %vm524_vm1, %v3027_v46, 0 }
 0xc11   : > { %3041 = vmatpush.bf16.xpose.msrb.mxu1 %v3032_v30 }
 0xc17   : > { %v2907_v4 = vpop.permute.xlu1 %2906 }
 0xc18   : > { %2919 = vmatpush.bf16.msrb.mxu0 %v2907_v4 }
 0xc1c   : > { %v2732_v13 = vpop.xlane.xlu0 %2731 }
 0xc1d   : > { %4831 = vrcp.f32 %v2732_v13  ;;  %v2789_v11 = vand.u32 2147483648, %v2732_v13  ;;  %vm2783_vm3 = vweird.f32 %v2732_v13  ;;  %v2787_v62 = vand.u32 2147483647, %v2732_v13 }
 0xc1f   : > { %v2790_v30 = vor.u32 1.1754944e-38, %v2789_v11  ;;  %vm2788_vm6 = vcmp.eq.f32.partialorder %v2787_v62, 8.507059e+37  ;;  %v2817_v11 = vand.u32 2147483647, %v5896_v56 }
 0xc21   : > { %vm2818_vm13 = vcmp.eq.f32.partialorder %v2817_v11, 8.507059e+37 }
 0xc23   : > { %v4832_v40 = vpop.eup %4831 }
 0xc24   : > { %v2779_v35 = vmul.f32 %v4832_v40, %v2732_v13  ;;  %v2735_v15 = vpop.xlane.xlu0 %2734  ;;  %vm2784_vm15 = vweird.f32 %v4832_v40  ;;  %v2812_v13 = vadd.f32 %v4830_v31, %v2811_v7 }
 0xc25   : > { %4833 = vrcp.f32 %v2735_v15  ;;  %v5908_v61 = vpop.xlane.xlu2 %2746  ;;  %vm2785_vm4 = vmor %vm2783_vm3, %vm2784_vm15  ;;  %v2804_v3 = vand.u32 2147483648, %v2735_v15  ;;  %vm2798_vm10 = vweird.f32 %v2735_v15 }
 0xc26   : > { %v2780_v60 = vsub.f32 1.0, %v2779_v35  ;;  %4835 = vrcp.f32 %v5908_v61  ;;  %v2819_v35 = vand.u32 2147483648, %v5896_v56  ;;  %vm2858_vm3 = vweird.f32 %v5908_v61 }
 0xc28   : > { %v2781_v54 = vmul.f32 %v4832_v40, %v2780_v60 }
 0xc2a   : > { %v2782_v18 = vadd.f32 %v4832_v40, %v2781_v54 }
 0xc2b   : > { %v4834_v21 = vpop.eup %4833 }
 0xc2c   : > { %v5911_v33 = vpop.eup %4835  ;;  %v2786_v32 = vsel %vm2785_vm4, %v4832_v40, %v2782_v18  ;;  %v2794_v59 = vmul.f32 %v4834_v21, %v2735_v15  ;;  %v2741_v46 = vpop.xlane.xlu0 %2740  ;;  %vm2799_vm7 = vweird.f32 %v4834_v21  ;;  %v2802_v40 = vand.u32 2147483647, %v2735_v15 }
 0xc2d   : > { %v2854_v4 = vmul.f32 %v5911_v33, %v5908_v61  ;;  %4837 = vrcp.f32 %v2741_v46  ;;  %v3051_v12 = vpop.permute.xlu2 %3050  ;;  %v2791_v54 = vsel %vm2788_vm6, %v2790_v30, %v2786_v32  ;;  %v2820_v30 = vor.u32 1.1754944e-38, %v2819_v35  ;;  %vm2800_vm11 = vmor %vm2798_vm10, %vm2799_vm7 }
 0xc2e   : > { %v2795_v60 = vsub.f32 1.0, %v2794_v59  ;;  %v3056_v10 = vsel %vm524_vm1, %v3051_v12, 0  ;;  %v2792_v62 = vmul.f32 %v5860_v51, %v2791_v54  ;;  %v2816_v59 = vsel %vm5920_vm9, %v4830_v31, %v2812_v13 }
 0xc2f   : > { %v2855_v18 = vsub.f32 1.0, %v2854_v4  ;;  %3065 = vmatpush.bf16.xpose.msrb.mxu2 %v3056_v10  ;;  %v2805_v10 = vor.u32 1.1754944e-38, %v2804_v3  ;;  %vm2803_vm12 = vcmp.eq.f32.partialorder %v2802_v40, 8.507059e+37  ;;  %vm2859_vm14 = vweird.f32 %v5911_v33 }
 0xc30   : > { %v2796_v26 = vmul.f32 %v4834_v21, %v2795_v60  ;;  %v2870_v51 = vpack.c.bf16 %v2792_v62, %v2792_v62  ;;  %v2832_v31 = vand.u32 2147483647, %v2741_v46  ;;  %v2834_v35 = vand.u32 2147483648, %v2741_v46  ;;  %vm5937_vm4 = vmor %vm2858_vm3, %vm2859_vm14 }
 0xc31   : > { %v2856_v56 = vmul.f32 %v5911_v33, %v2855_v18  ;;  %v2862_v40 = vand.u32 2147483647, %v5908_v61  ;;  %v2864_v18 = vand.u32 2147483648, %v5908_v61  ;;  %vm2828_vm5 = vweird.f32 %v2741_v46 }
 0xc32   : > { %v2797_v7 = vadd.f32 %v4834_v21, %v2796_v26  ;;  %v2821_v26 = vsel %vm2818_vm13, %v2820_v30, %v2816_v59  ;;  %v2903_v11 = vunpack.c.l.b16 %v2870_v51  ;;  %vm2833_vm7 = vcmp.eq.f32.partialorder %v2832_v31, 8.507059e+37 }
 0xc33   : > { %v4838_v32 = vpop.eup %4837  ;;  %v2857_v13 = vadd.f32 %v5911_v33, %v2856_v56  ;;  %v2822_v3 = vmul.f32 %v5846_v27, %v2821_v26  ;;  %v2835_v59 = vor.u32 1.1754944e-38, %v2834_v35  ;;  %v2865_v56 = vor.u32 1.1754944e-38, %v2864_v18 }
 0xc34   : > { %v2801_v4 = vsel %vm2800_vm11, %v4834_v21, %v2797_v7  ;;  %v2824_v12 = vmul.f32 %v4838_v32, %v2741_v46  ;;  %v2744_v60 = vpop.xlane.xlu0 %2743  ;;  %vm2829_vm15 = vweird.f32 %v4838_v32  ;;  %vm2863_vm8 = vcmp.eq.f32.partialorder %v2862_v40, 8.507059e+37 }
 0xc35   : > { %v2806_v38 = vsel %vm2803_vm12, %v2805_v10, %v2801_v4  ;;  %4839 = vrcp.f32 %v2744_v60  ;;  %v5928_v28 = vpop.permute.xlu2 %3048  ;;  %vm2830_vm6 = vmor %vm2828_vm5, %vm2829_vm15  ;;  %v2861_v27 = vsel %vm5937_vm4, %v5911_v33, %v2857_v13  ;;  %v2872_v61 = vpack.c.bf16 %v2822_v3, %v2822_v3 }
 0xc36   : > { %v2807_v15 = vmul.f32 %v5867_v1, %v2806_v38  ;;  %v2825_v17 = vsub.f32 1.0, %v2824_v12  ;;  %v2849_v31 = vand.u32 2147483648, %v2744_v60  ;;  %v2847_v33 = vand.u32 2147483647, %v2744_v60 }
 0xc37   : > { %vm2843_vm10 = vweird.f32 %v2744_v60 }
 0xc38   : > { %v2871_v21 = vpack.c.bf16 %v2807_v15, %v2807_v15  ;;  %v2826_v54 = vmul.f32 %v4838_v32, %v2825_v17  ;;  %v2866_v17 = vsel %vm2863_vm8, %v2865_v56, %v2861_v27  ;;  %vm2848_vm12 = vcmp.eq.f32.partialorder %v2847_v33, 8.507059e+37 }
 0xc39   : > { %v2867_v13 = vmul.f32 %v5870_v16, %v2866_v17 }
 0xc3a   : > { %v2904_v38 = vunpack.c.l.b16 %v2871_v21  ;;  %v2827_v62 = vadd.f32 %v4838_v32, %v2826_v54 }
 0xc3b   : > { %v4840_v7 = vpop.eup %4839  ;;  %v2875_v1 = vpack.c.bf16 %v2867_v13, %v2867_v13 }
 0xc3c   : > { %v2905_v30 = vpack.c.b16 %v2904_v38, %v2903_v11  ;;  %v2831_v10 = vsel %vm2830_vm6, %v4838_v32, %v2827_v62  ;;  %v2839_v4 = vmul.f32 %v4840_v7, %v2744_v60  ;;  %vm2844_vm9 = vweird.f32 %v4840_v7  ;;  %v3336_v38 = vpop.permute.xlu1 %3335 }
 0xc3d   : > { %v2836_v12 = vsel %vm2833_vm7, %v2835_v59, %v2831_v10  ;;  %v3003_v26 = vpop.permute.xlu2 %3002  ;;  %v2928_v32 = vunpack.c.l.b16 %v2872_v61  ;;  %vm2845_vm11 = vmor %vm2843_vm10, %vm2844_vm9  ;;  %v2954_v27 = vunpack.c.l.b16 %v2875_v1 }
 0xc3e   : > { %v2837_v51 = vmul.f32 %v5876_v24, %v2836_v12  ;;  %v2840_v15 = vsub.f32 1.0, %v2839_v4  ;;  %v3008_v46 = vsel %vm524_vm1, %v3003_v26, 0  ;;  %4368 = vmatmul.msk.bf16.vlgmr.msrb.gmra.mxu0 %vm643_vm2, %v2905_v30  ;;  %v2850_v24 = vor.u32 1.1754944e-38, %v2849_v31 }
 0xc3f   : > { %3017 = vmatpush.bf16.xpose.msra.mxu0 %v3008_v46 }
 0xc40   : > { %v2873_v35 = vpack.c.bf16 %v2837_v51, %v2837_v51  ;;  %v2841_v21 = vmul.f32 %v4840_v7, %v2840_v15 }
 0xc42   : > { %v2929_v54 = vunpack.c.l.b16 %v2873_v35  ;;  %v2842_v3 = vadd.f32 %v4840_v7, %v2841_v21 }
 0xc44   : > { %v2930_v40 = vpack.c.b16 %v2929_v54, %v2928_v32  ;;  %v2846_v18 = vsel %vm2845_vm11, %v4840_v7, %v2842_v3 }
 0xc45   : > { %v2851_v11 = vsel %vm2848_vm12, %v2850_v24, %v2846_v18 }
 0xc46   : > { %v2852_v62 = vmul.f32 %v5880_v8, %v2851_v11  ;;  %4369 = vmatmul.msk.bf16.vlgmr.msra.gmra.mxu1 %vm643_vm2, %v2930_v40 }
 0xc47   : > { %3348 = vmatpush.bf16.msra.mxu1 %v3336_v38  ;;  %v2979_v59 = vpop.permute.xlu0 %2978 }
 0xc48   : > { %v2874_v30 = vpack.c.bf16 %v2852_v62, %v2852_v62  ;;  %v2984_v16 = vsel %vm524_vm1, %v2979_v59, 0 }
 0xc49   : > { %2993 = vmatpush.bf16.xpose.msra.mxu3 %v2984_v16 }
 0xc4a   : > { %v2953_v60 = vunpack.c.l.b16 %v2874_v30 }
 0xc4c   : > { %v2955_v10 = vpack.c.b16 %v2954_v27, %v2953_v60 }
 0xc4e   : > { %4370 = vmatmul.msk.bf16.vlgmr.msra.gmra.mxu2 %vm643_vm2, %v2955_v10 }
 0xc4f   : > { %v3025_v7 = vpop.permute.xlu0 %3024 }
 0xc50   : > { %4371 = vmatmul.msk.bf16.vlgmr.msra.gmra.mxu3 %vm524_vm1, %v5902_v52 }
 0xc56   : > { %4373 = vmatmul.msk.bf16.vlgmr.msrb.gmra.mxu1 %vm524_vm1, %v3025_v7 }
 0xc57   : > { %v3001_v8 = vpop.permute.xlu0 %3000 }
 0xc58   : > { %4372 = vmatmul.msk.bf16.vlgmr.msra.gmra.mxu0 %vm524_vm1, %v3001_v8 }
 0xc5e   : > { %4374 = vmatmul.msk.bf16.vlgmr.msrb.gmra.mxu2 %vm524_vm1, %v5928_v28 }
 0xc5f   : > { %v3286_v4 = vpop.permute.xlu0 %3285 }
 0xc60   : > { %3298 = vmatpush.bf16.msrb.mxu3 %v3286_v4 }
 0xc8c   : > { %v5958_v61 = vpop.f32.mrf.mxu3 }
 0xc94   : > { %v5960_v56 = vpop.f32.mrf.mxu3 }
 0xcbb   : > { %v5964_v26 = vpop.f32.mrf.mxu0 }
 0xcc3   : > { %v5966_v52 = vpop.f32.mrf.mxu0  ;;  %v5968_v51 = vpop.f32.mrf.mxu1 }
 0xccb   : > { %v5972_v46 = vpop.f32.mrf.mxu1 }
 0xcd1   : > { %v5976_v17 = vpop.f32.mrf.mxu2 }
 0xcd3   : > { %v3043_v31 = vpop.f32.mrf.mxu1  ;;  %v2995_v13 = vpop.f32.mrf.mxu3 }
 0xcd4   : > { %v3076_v35 = vmul.f32 0.35355338, %v3043_v31  ;;  %v3072_v40 = vmul.f32 0.35355338, %v2995_v13 }
 0xcd5   : > { %v3019_v21 = vpop.f32.mrf.mxu0 }
 0xcd6   : > { %v3074_v33 = vmul.f32 0.35355338, %v3019_v21  ;;  %v3092_v32 = vsel %vm643_vm2, %v3076_v35, -inf  ;;  %v3080_v38 = vsel %vm643_vm2, %v3072_v40, -inf }
 0xcd7   : > { %3093 = vmax.xlane.f32.xlu0 %v3092_v32 }
 0xcd8   : > { %v3086_v54 = vsel %vm643_vm2, %v3074_v33, -inf }
 0xcd9   : > { %v5980_v3 = vpop.f32.mrf.mxu2  ;;  %3087 = vmax.xlane.f32.xlu1 %v3086_v54 }
 0xcdb   : > { %v2997_v62 = vpop.f32.mrf.mxu3  ;;  %v3045_v59 = vpop.f32.mrf.mxu1 }
 0xcdc   : > { %v3073_v30 = vmul.f32 0.35355338, %v2997_v62  ;;  %v3077_v16 = vmul.f32 0.35355338, %v3045_v59 }
 0xcdd   : > { %v3021_v18 = vpop.f32.mrf.mxu0 }
 0xcde   : > { %v3075_v11 = vmul.f32 0.35355338, %v3021_v18  ;;  %v3095_v27 = vsel %vm643_vm2, %v3077_v16, -inf  ;;  %v3083_v60 = vsel %vm643_vm2, %v3073_v30, -inf }
 0xce0   : > { %v3089_v1 = vsel %vm643_vm2, %v3075_v11, -inf }
 0xce1   : > { %3081 = vmax.xlane.f32.xlu1 %v3080_v38  ;;  %3090 = vmax.xlane.f32.xlu2 %v3089_v1  ;;  %v3067_v10 = vpop.f32.mrf.mxu2 }
 0xce2   : > { %v5990_v7 = vmul.f32 0.35355338, %v3067_v10 }
 0xce4   : > { %v3098_v8 = vsel %vm643_vm2, %v5990_v7, -inf }
 0xce9   : > { %3096 = vmax.xlane.f32.xlu1 %v3095_v27  ;;  %3084 = vmax.xlane.f32.xlu2 %v3083_v60  ;;  %v3069_v4 = vpop.f32.mrf.mxu2 }
 0xcea   : > { %v3079_v31 = vmul.f32 0.35355338, %v3069_v4 }
 0xceb   : > { %3382 = vrot.lane.b32.xlu0 %v5147_v36, %s4991_s18 }
 0xcec   : > { %v3101_v21 = vsel %vm643_vm2, %v3079_v31, -inf }
 0xcf1   : > { %3099 = vmax.xlane.f32.xlu2 %v3098_v8 }
 0xd09   : > { %3360 = vrot.lane.b32.xlu2 %v5192_v49, %s4990_s17 }
 0xd15   : > { %3102 = vmax.xlane.f32.xlu0 %v3101_v21 }
 0xd29   : > { %3430 = vrot.lane.b32.xlu0 %v5163_v2, %s4991_s18 }
 0xd4a   : > { %v3094_v54 = vpop.xlane.xlu0 %3093 }
 0xd4b   : > { %v3108_v27 = vsub.f32 %v3076_v35, %v3094_v54 }
 0xd4c   : > { %v3088_v32 = vpop.xlane.xlu1 %3087 }
 0xd4d   : > { %v3106_v13 = vsub.f32 %v3074_v33, %v3088_v32  ;;  %v3120_v2 = vmul.f32 1.442695, %v3108_v27 }
 0xd4f   : > { %v3116_v36 = vmul.f32 1.442695, %v3106_v13 }
 0xd51   : > { %4841 = vpow2.f32 %v3116_v36 }
 0xd54   : > { %v3091_v18 = vpop.xlane.xlu2 %3090  ;;  %v3082_v38 = vpop.xlane.xlu1 %3081 }
 0xd55   : > { %v3107_v1 = vsub.f32 %v3075_v11, %v3091_v18  ;;  %v3104_v62 = vsub.f32 %v3072_v40, %v3082_v38 }
 0xd57   : > { %v5999_v59 = vpop.eup %4841  ;;  %v3118_v60 = vmul.f32 1.442695, %v3107_v1  ;;  %v3112_v10 = vmul.f32 1.442695, %v3104_v62 }
 0xd58   : > { %v3134_v8 = vsel %vm643_vm2, %v5999_v59, 0.0 }
 0xd59   : > { %4843 = vpow2.f32 %v3118_v60  ;;  %3135 = vadd.xlane.f32.xlu1 %v3134_v8 }
 0xd5a   : > { %4845 = vpow2.f32 %v3112_v10 }
 0xd5b   : > { %4847 = vpow2.f32 %v3120_v2 }
 0xd5c   : > { %v3085_v33 = vpop.xlane.xlu2 %3084  ;;  %v3097_v4 = vpop.xlane.xlu1 %3096 }
 0xd5d   : > { %v3105_v21 = vsub.f32 %v3073_v30, %v3085_v33  ;;  %v3109_v32 = vsub.f32 %v3077_v16, %v3097_v4  ;;  %v3383_v13 = vpop.permute.xlu0 %3382 }
 0xd5e   : > { %v3388_v11 = vsel %vm524_vm1, %v3383_v13, 0 }
 0xd5f   : > { %v6004_v40 = vpop.eup %4843  ;;  %v3114_v35 = vmul.f32 1.442695, %v3105_v21  ;;  %v3122_v36 = vmul.f32 1.442695, %v3109_v32  ;;  %3397 = vmatpush.bf16.xpose.msra.mxu3 %v3388_v11 }
 0xd60   : > { %v6006_v54 = vpop.eup %4845  ;;  %v3137_v18 = vsel %vm643_vm2, %v6004_v40, 0.0 }
 0xd61   : > { %4849 = vpow2.f32 %v3114_v35  ;;  %3138 = vadd.xlane.f32.xlu2 %v3137_v18  ;;  %v3128_v30 = vsel %vm643_vm2, %v6006_v54, 0.0  ;;  %v6012_v38 = vpop.eup %4847 }
 0xd62   : > { %4851 = vpow2.f32 %v3122_v36  ;;  %3129 = vadd.xlane.f32.xlu0 %v3128_v30  ;;  %v3140_v27 = vsel %vm643_vm2, %v6012_v38, 0.0 }
 0xd64   : > { %v3100_v16 = vpop.xlane.xlu2 %3099 }
 0xd65   : > { %v3110_v13 = vsub.f32 %v5990_v7, %v3100_v16 }
 0xd67   : > { %v6014_v1 = vpop.eup %4849 }
 0xd68   : > { %v6016_v62 = vpop.eup %4851  ;;  %v3131_v60 = vsel %vm643_vm2, %v6014_v1, 0.0 }
 0xd69   : > { %3141 = vadd.xlane.f32.xlu2 %v3140_v27  ;;  %3132 = vadd.xlane.f32.xlu1 %v3131_v60  ;;  %v3143_v10 = vsel %vm643_vm2, %v6016_v62, 0.0 }
 0xd6a   : > { %3144 = vadd.xlane.f32.xlu0 %v3143_v10 }
 0xd6c   : > { %v3361_v8 = vpop.permute.xlu2 %3360 }
 0xd6d   : > { %3373 = vmatpush.bf16.msra.mxu2 %v3361_v8 }
 0xd7e   : > { %3454 = vrot.lane.b32.xlu0 %v5173_v22, %s4991_s18 }
 0xd82   : > { %3380 = vrot.lane.b32.xlu1 %v5151_v42, %s4991_s18  ;;  %v3124_v42 = vmul.f32 1.442695, %v3110_v13 }
 0xd86   : > { %3452 = vrot.lane.b32.xlu0 %v5184_v34, %s4991_s18 }
 0xd88   : > { %v3103_v2 = vpop.xlane.xlu0 %3102 }
 0xd89   : > { %v3111_v33 = vsub.f32 %v3079_v31, %v3103_v2 }
 0xd8b   : > { %v3126_v4 = vmul.f32 1.442695, %v3111_v33 }
 0xd8d   : > { %4853 = vpow2.f32 %v3126_v4 }
 0xd8e   : > { %4855 = vpow2.f32 %v3124_v42 }
 0xd93   : > { %v6030_v21 = vpop.eup %4853 }
 0xd94   : > { %v3149_v32 = vsel %vm643_vm2, %v6030_v21, 0.0  ;;  %v6036_v35 = vpop.eup %4855 }
 0xd95   : > { %3150 = vadd.xlane.f32.xlu2 %v3149_v32  ;;  %v3146_v34 = vsel %vm643_vm2, %v6036_v35, 0.0 }
 0xd9b   : > { %v3431_v11 = vpop.permute.xlu0 %3430 }
 0xd9c   : > { %v3436_v22 = vsel %vm524_vm1, %v3431_v11, 0 }
 0xd9d   : > { %3445 = vmatpush.bf16.xpose.msrb.mxu1 %v3436_v22 }
 0xdac   : > { %3147 = vadd.xlane.f32.xlu1 %v3146_v34 }
 0xdad   : > { %3428 = vrot.lane.b32.xlu2 %v5167_v9, %s4991_s18 }
 0xdb5   : > { %3406 = vrot.lane.b32.xlu2 %v5155_v50, %s4991_s18 }
 0xdc5   : > { %3310 = vrot.lane.b32.xlu1 %v5182_v25, %s4990_s17  ;;  %s4998_s17 = smov 56  }
 0xdcc   : > { %v3136_v7 = vpop.xlane.xlu1 %3135 }
 0xdcd   : > { %4857 = vrcp.f32 %v3136_v7  ;;  %3404 = vrot.lane.b32.xlu1 %v5159_v57, %s4991_s18  ;;  %v3193_v9 = vand.u32 2147483648, %v3136_v7  ;;  %v3191_v60 = vand.u32 2147483647, %v3136_v7  ;;  %vm3187_vm14 = vweird.f32 %v3136_v7 }
 0xdcf   : > { %v3194_v33 = vor.u32 1.1754944e-38, %v3193_v9  ;;  %vm3192_vm3 = vcmp.eq.f32.partialorder %v3191_v60, 8.507059e+37 }
 0xdd3   : > { %v4858_v31 = vpop.eup %4857 }
 0xdd4   : > { %v3183_v36 = vmul.f32 %v4858_v31, %v3136_v7  ;;  %v3139_v18 = vpop.xlane.xlu2 %3138  ;;  %vm3188_vm13 = vweird.f32 %v4858_v31 }
 0xdd5   : > { %4859 = vrcp.f32 %v3139_v18  ;;  %v3130_v30 = vpop.xlane.xlu0 %3129  ;;  %vm3189_vm15 = vmor %vm3187_vm14, %vm3188_vm13  ;;  %v3206_v42 = vand.u32 2147483647, %v3139_v18  ;;  %v3208_v7 = vand.u32 2147483648, %v3139_v18  ;;  %vm3202_vm5 = vweird.f32 %v3139_v18 }
 0xdd6   : > { %v3184_v16 = vsub.f32 1.0, %v3183_v36  ;;  %4861 = vrcp.f32 %v3130_v30  ;;  %vm3157_vm7 = vweird.f32 %v3130_v30 }
 0xdd7   : > { %vm3207_vm6 = vcmp.eq.f32.partialorder %v3206_v42, 8.507059e+37 }
 0xdd8   : > { %v3185_v27 = vmul.f32 %v4858_v31, %v3184_v16 }
 0xdda   : > { %v3186_v50 = vadd.f32 %v4858_v31, %v3185_v27  ;;  %v3163_v27 = vand.u32 2147483648, %v3130_v30 }
 0xddb   : > { %v4860_v10 = vpop.eup %4859 }
 0xddc   : > { %v6048_v8 = vpop.eup %4861  ;;  %v3190_v2 = vsel %vm3189_vm15, %v4858_v31, %v3186_v50  ;;  %v3198_v57 = vmul.f32 %v4860_v10, %v3139_v18  ;;  %v3142_v4 = vpop.xlane.xlu2 %3141  ;;  %vm3203_vm4 = vweird.f32 %v4860_v10  ;;  %v3161_v31 = vand.u32 2147483647, %v3130_v30 }
 0xddd   : > { %v3153_v32 = vmul.f32 %v6048_v8, %v3130_v30  ;;  %4863 = vrcp.f32 %v3142_v4  ;;  %v6051_v13 = vpop.xlane.xlu0 %3144  ;;  %v3195_v11 = vsel %vm3192_vm3, %v3194_v33, %v3190_v2  ;;  %v6053_v34 = vpop.xlane.xlu1 %3132  ;;  %vm3204_vm8 = vmor %vm3202_vm5, %vm3203_vm4  ;;  %v3209_v33 = vor.u32 1.1754944e-38, %v3208_v7 }
 0xdde   : > { %v3199_v22 = vsub.f32 1.0, %v3198_v57  ;;  %4865 = vrcp.f32 %v6051_v13  ;;  %v3196_v9 = vmul.f32 %v5999_v59, %v3195_v11  ;;  %vm3158_vm9 = vweird.f32 %v6048_v8 }
 0xddf   : > { %v3154_v36 = vsub.f32 1.0, %v3153_v32  ;;  %4867 = vrcp.f32 %v6053_v34  ;;  %v3221_v32 = vand.u32 2147483647, %v3142_v4  ;;  %vm6061_vm10 = vcmp.eq.f32.partialorder %v3161_v31, 8.507059e+37  ;;  %vm6067_vm12 = vmor %vm3157_vm7, %vm3158_vm9 }
 0xde0   : > { %v3200_v16 = vmul.f32 %v4860_v10, %v3199_v22  ;;  %v3164_v59 = vor.u32 1.1754944e-38, %v3163_v27  ;;  %vm3217_vm11 = vweird.f32 %v3142_v4  ;;  %v3223_v42 = vand.u32 2147483648, %v3142_v4 }
 0xde1   : > { %v3155_v60 = vmul.f32 %v6048_v8, %v3154_v36  ;;  %vm3232_vm13 = vweird.f32 %v6051_v13  ;;  %vm6076_vm15 = vcmp.eq.f32.partialorder %v3221_v32, 8.507059e+37  ;;  %v3238_v12 = vand.u32 2147483648, %v6051_v13 }
 0xde2   : > { %v3201_v50 = vadd.f32 %v4860_v10, %v3200_v16  ;;  %v3274_v16 = vpack.c.bf16 %v3196_v9, %v3196_v9 }
 0xde3   : > { %v4864_v2 = vpop.eup %4863  ;;  %v3156_v57 = vadd.f32 %v6048_v8, %v3155_v60  ;;  %v3239_v15 = vor.u32 1.1754944e-38, %v3238_v12 }
 0xde4   : > { %v3205_v22 = vsel %vm3204_vm8, %v4860_v10, %v3201_v50  ;;  %v3213_v11 = vmul.f32 %v4864_v2, %v3142_v4  ;;  %v4866_v36 = vpop.eup %4865  ;;  %vm3218_vm14 = vweird.f32 %v4864_v2  ;;  %vm3172_vm8 = vweird.f32 %v6053_v34 }
 0xde5   : > { %v3210_v18 = vsel %vm3207_vm6, %v3209_v33, %v3205_v22  ;;  %v3228_v10 = vmul.f32 %v4866_v36, %v6051_v13  ;;  %v4868_v31 = vpop.eup %4867  ;;  %v3160_v27 = vsel %vm6067_vm12, %v6048_v8, %v3156_v57  ;;  %vm3233_vm3 = vweird.f32 %v4866_v36  ;;  %vm3219_vm4 = vmor %vm3217_vm11, %vm3218_vm14 }
 0xde6   : > { %v3211_v24 = vmul.f32 %v6004_v40, %v3210_v18  ;;  %v3214_v60 = vsub.f32 1.0, %v3213_v11  ;;  %v3236_v40 = vand.u32 2147483647, %v6051_v13  ;;  %v3168_v22 = vmul.f32 %v4868_v31, %v6053_v34  ;;  %vm3234_vm6 = vmor %vm3232_vm13, %vm3233_vm3 }
 0xde7   : > { %v3229_v33 = vsub.f32 1.0, %v3228_v10  ;;  %v6082_v11 = vunpack.c.l.b16 %v3274_v16  ;;  %v3224_v18 = vor.u32 1.1754944e-38, %v3223_v42  ;;  %v3165_v28 = vsel %vm6061_vm10, %v3164_v59, %v3160_v27 }
 0xde8   : > { %v3275_v30 = vpack.c.bf16 %v3211_v24, %v3211_v24  ;;  %v3215_v50 = vmul.f32 %v4864_v2, %v3214_v60  ;;  %v3169_v32 = vsub.f32 1.0, %v3168_v22  ;;  %vm3173_vm5 = vweird.f32 %v4868_v31 }
 0xde9   : > { %v3230_v57 = vmul.f32 %v4866_v36, %v3229_v33  ;;  %v3176_v24 = vand.u32 2147483647, %v6053_v34  ;;  %v3178_v16 = vand.u32 2147483648, %v6053_v34  ;;  %vm3237_vm7 = vcmp.eq.f32.partialorder %v3236_v40, 8.507059e+37  ;;  %vm3174_vm9 = vmor %vm3172_vm8, %vm3173_vm5 }
 0xdea   : > { %v6085_v7 = vunpack.c.l.b16 %v3275_v30  ;;  %v3216_v8 = vadd.f32 %v4864_v2, %v3215_v50  ;;  %v3170_v30 = vmul.f32 %v4868_v31, %v3169_v32  ;;  %v3166_v4 = vmul.f32 %v6006_v54, %v3165_v28 }
 0xdeb   : > { %v3231_v10 = vadd.f32 %v4866_v36, %v3230_v57  ;;  %v3179_v22 = vor.u32 1.1754944e-38, %v3178_v16  ;;  %vm3177_vm10 = vcmp.eq.f32.partialorder %v3176_v24, 8.507059e+37 }
 0xdec   : > { %v3309_v42 = vpack.c.b16 %v6085_v7, %v6082_v11  ;;  %v3220_v60 = vsel %vm3219_vm4, %v4864_v2, %v3216_v8  ;;  %v3171_v33 = vadd.f32 %v4868_v31, %v3170_v30  ;;  %v3272_v34 = vpack.c.bf16 %v3166_v4, %v3166_v4 }
 0xded   : > { %v3225_v50 = vsel %vm6076_vm15, %v3224_v18, %v3220_v60  ;;  %v3235_v27 = vsel %vm3234_vm6, %v4866_v36, %v3231_v10 }
 0xdee   : > { %v3226_v59 = vmul.f32 %v6012_v38, %v3225_v50  ;;  %v3240_v2 = vsel %vm3237_vm7, %v3239_v15, %v3235_v27  ;;  %v3175_v8 = vsel %vm3174_vm9, %v4868_v31, %v3171_v33  ;;  %v3282_v32 = vunpack.c.l.b16 %v3272_v34 }
 0xdef   : > { %v3241_v18 = vmul.f32 %v6016_v62, %v3240_v2  ;;  %v3180_v40 = vsel %vm3177_vm10, %v3179_v22, %v3175_v8 }
 0xdf0   : > { %v3276_v9 = vpack.c.bf16 %v3226_v59, %v3226_v59  ;;  %v3455_v13 = vpop.permute.xlu0 %3454  ;;  %v3181_v54 = vmul.f32 %v6014_v1, %v3180_v40 }
 0xdf1   : > { %v3460_v12 = vsel %vm524_vm1, %v3455_v13, 0  ;;  %v3277_v28 = vpack.c.bf16 %v3241_v18, %v3241_v18 }
 0xdf2   : > { %v3332_v57 = vunpack.c.l.b16 %v3276_v9  ;;  %3469 = vmatpush.bf16.xpose.msrb.mxu2 %v3460_v12  ;;  %v3273_v36 = vpack.c.bf16 %v3181_v54, %v3181_v54 }
 0xdf3   : > { %v3333_v38 = vunpack.c.l.b16 %v3277_v28 }
 0xdf4   : > { %v3283_v16 = vunpack.c.l.b16 %v3273_v36  ;;  %v3381_v31 = vpop.permute.xlu1 %3380 }
 0xdf5   : > { %v3334_v60 = vpack.c.b16 %v3333_v38, %v3332_v57 }
 0xdf6   : > { %v3284_v10 = vpack.c.b16 %v3283_v16, %v3282_v32 }
 0xdf7   : > { %4377 = vmatmul.msk.bf16.vlgmr.msra.gmra.mxu1 %vm643_vm2, %v3334_v60 }
 0xdf8   : > { %4375 = vmatmul.msk.bf16.vlgmr.msrb.gmra.mxu3 %vm643_vm2, %v3284_v10 }
 0xe08   : > { %v3151_v62 = vpop.xlane.xlu2 %3150  ;;  %4379 = vmatmul.msk.bf16.vlgmr.msra.gmra.mxu3 %vm524_vm1, %v3381_v31 }
 0xe09   : > { %4869 = vrcp.f32 %v3151_v62  ;;  %v3268_v27 = vand.u32 2147483648, %v3151_v62  ;;  %vm3262_vm12 = vweird.f32 %v3151_v62  ;;  %v3266_v33 = vand.u32 2147483647, %v3151_v62 }
 0xe0b   : > { %v3269_v18 = vor.u32 1.1754944e-38, %v3268_v27  ;;  %vm3267_vm14 = vcmp.eq.f32.partialorder %v3266_v33, 8.507059e+37 }
 0xe0f   : > { %v4870_v1 = vpop.eup %4869 }
 0xe10   : > { %v3429_v24 = vpop.permute.xlu2 %3428  ;;  %v3258_v30 = vmul.f32 %v4870_v1, %v3151_v62  ;;  %vm3263_vm11 = vweird.f32 %v4870_v1 }
 0xe11   : > { %4381 = vmatmul.msk.bf16.vlgmr.msrb.gmra.mxu1 %vm524_vm1, %v3429_v24  ;;  %vm3264_vm13 = vmor %vm3262_vm12, %vm3263_vm11 }
 0xe12   : > { %v3259_v50 = vsub.f32 1.0, %v3258_v30 }
 0xe14   : > { %v3260_v15 = vmul.f32 %v4870_v1, %v3259_v50 }
 0xe16   : > { %v3261_v59 = vadd.f32 %v4870_v1, %v3260_v15 }
 0xe18   : > { %v3265_v22 = vsel %vm3264_vm13, %v4870_v1, %v3261_v59  ;;  %v3407_v62 = vpop.permute.xlu2 %3406 }
 0xe19   : > { %v3270_v13 = vsel %vm3267_vm14, %v3269_v18, %v3265_v22  ;;  %v3412_v30 = vsel %vm524_vm1, %v3407_v62, 0 }
 0xe1a   : > { %v3271_v57 = vmul.f32 %v6030_v21, %v3270_v13  ;;  %v3453_v21 = vpop.permute.xlu0 %3452 }
 0xe1c   : > { %v3279_v32 = vpack.c.bf16 %v3271_v57, %v3271_v57 }
 0xe1e   : > { %v3358_v10 = vunpack.c.l.b16 %v3279_v32 }
 0xe1f   : > { %v3148_v4 = vpop.xlane.xlu1 %3147 }
 0xe20   : > { %4871 = vrcp.f32 %v3148_v4  ;;  %v3253_v40 = vand.u32 2147483648, %v3148_v4  ;;  %v3251_v34 = vand.u32 2147483647, %v3148_v4  ;;  %vm3247_vm3 = vweird.f32 %v3148_v4 }
 0xe22   : > { %v3254_v54 = vor.u32 1.1754944e-38, %v3253_v40  ;;  %vm3252_vm5 = vcmp.eq.f32.partialorder %v3251_v34, 8.507059e+37 }
 0xe26   : > { %v4872_v2 = vpop.eup %4871 }
 0xe27   : > { %v3243_v9 = vmul.f32 %v4872_v2, %v3148_v4  ;;  %vm3248_vm15 = vweird.f32 %v4872_v2 }
 0xe28   : > { %vm3249_vm4 = vmor %vm3247_vm3, %vm3248_vm15 }
 0xe29   : > { %v3244_v8 = vsub.f32 1.0, %v3243_v9 }
 0xe2b   : > { %v3245_v12 = vmul.f32 %v4872_v2, %v3244_v8 }
 0xe2d   : > { %v3246_v28 = vadd.f32 %v4872_v2, %v3245_v12 }
 0xe2f   : > { %v3250_v38 = vsel %vm3249_vm4, %v4872_v2, %v3246_v28 }
 0xe30   : > { %v3255_v36 = vsel %vm3252_vm5, %v3254_v54, %v3250_v38 }
 0xe31   : > { %v3256_v60 = vmul.f32 %v6036_v35, %v3255_v36 }
 0xe33   : > { %v3278_v16 = vpack.c.bf16 %v3256_v60, %v3256_v60 }
 0xe35   : > { %v3357_v31 = vunpack.c.l.b16 %v3278_v16 }
 0xe37   : > { %v3359_v24 = vpack.c.b16 %v3358_v10, %v3357_v31  ;;  %v3311_v1 = vpop.permute.xlu1 %3310 }
 0xe38   : > { %3323 = vmatpush.bf16.msrb.mxu0 %v3311_v1 }
 0xe39   : > { %4378 = vmatmul.msk.bf16.vlgmr.msra.gmra.mxu2 %vm643_vm2, %v3359_v24 }
 0xe3b   : > { %4376 = vmatmul.msk.bf16.vlgmr.msrb.gmra.mxu0 %vm643_vm2, %v3309_v42 }
 0xe3c   : > { %3421 = vmatpush.bf16.xpose.msra.mxu0 %v3412_v30 }
 0xe3f   : > { %v3405_v35 = vpop.permute.xlu1 %3404 }
 0xe49   : > { %4382 = vmatmul.msk.bf16.vlgmr.msrb.gmra.mxu2 %vm524_vm1, %v3453_v21 }
 0xe4b   : > { %4380 = vmatmul.msk.bf16.vlgmr.msra.gmra.mxu0 %vm524_vm1, %v3405_v35 }
 0xe74   : > { %v6121_v50 = vpop.f32.mrf.mxu1 }
 0xe7b   : > { %v6123_v15 = vpop.f32.mrf.mxu3 }
 0xe7c   : > { %v6125_v4 = vpop.f32.mrf.mxu1 }
 0xe7d   : > { %v4533_v59 = vpack.i.bf16 %v6125_v4, %v6121_v50 }
 0xe83   : > { %v6129_v27 = vpop.f32.mrf.mxu3 }
 0xe84   : > { %v4563_v11 = vpack.i.bf16 %v6129_v27, %v6123_v15  ;;  %v6624_v27 = vld [vmem:[#allocation25_spill] sm:$0xff] }
 0xe8b   : > { %v3399_v7 = vpop.f32.mrf.mxu3 }
 0xe8c   : > { %v6133_v42 = vmul.f32 0.35355338, %v3399_v7 }
 0xe8e   : > { %v3447_v33 = vpop.f32.mrf.mxu1  ;;  %v3484_v22 = vsel %vm643_vm2, %v6133_v42, -inf }
 0xe8f   : > { %v3480_v2 = vmul.f32 0.35355338, %v3447_v33  ;;  %3485 = vmax.xlane.f32.xlu0 %v3484_v22 }
 0xe91   : > { %v3496_v9 = vsel %vm643_vm2, %v3480_v2, -inf }
 0xe92   : > { %3497 = vmax.xlane.f32.xlu1 %v3496_v9 }
 0xe93   : > { %v3401_v31 = vpop.f32.mrf.mxu3 }
 0xe94   : > { %v3477_v30 = vmul.f32 0.35355338, %v3401_v31 }
 0xe96   : > { %v3449_v18 = vpop.f32.mrf.mxu1  ;;  %v3487_v35 = vsel %vm643_vm2, %v3477_v30, -inf }
 0xe97   : > { %v3481_v8 = vmul.f32 0.35355338, %v3449_v18 }
 0xe99   : > { %v3499_v13 = vsel %vm643_vm2, %v3481_v8, -inf }
 0xe9a   : > { %3500 = vmax.xlane.f32.xlu0 %v3499_v13 }
 0xeb8   : > { %v6139_v40 = vpop.f32.mrf.mxu0 }
 0xebc   : > { %v6141_v12 = vpop.f32.mrf.mxu2 }
 0xec0   : > { %v6143_v34 = vpop.f32.mrf.mxu0 }
 0xec1   : > { %v4638_v57 = vpack.i.bf16 %v6143_v34, %v6139_v40 }
 0xec4   : > { %v6147_v28 = vpop.f32.mrf.mxu2 }
 0xec5   : > { %v4593_v54 = vpack.i.bf16 %v6147_v28, %v6141_v12 }
 0xec8   : > { %v3423_v38 = vpop.f32.mrf.mxu0 }
 0xec9   : > { %v3478_v36 = vmul.f32 0.35355338, %v3423_v38 }
 0xecb   : > { %v3490_v32 = vsel %vm643_vm2, %v3478_v36, -inf }
 0xecc   : > { %v3471_v60 = vpop.f32.mrf.mxu2  ;;  %3491 = vmax.xlane.f32.xlu0 %v3490_v32 }
 0xecd   : > { %v3482_v7 = vmul.f32 0.35355338, %v3471_v60 }
 0xecf   : > { %v3502_v33 = vsel %vm643_vm2, %v3482_v7, -inf }
 0xed0   : > { %v3425_v16 = vpop.f32.mrf.mxu0 }
 0xed1   : > { %v3479_v10 = vmul.f32 0.35355338, %v3425_v16 }
 0xed3   : > { %v3493_v62 = vsel %vm643_vm2, %v3479_v10, -inf }
 0xed4   : > { %v3473_v24 = vpop.f32.mrf.mxu2  ;;  %3494 = vmax.xlane.f32.xlu2 %v3493_v62 }
 0xed5   : > { %v3483_v1 = vmul.f32 0.35355338, %v3473_v24 }
 0xed7   : > { %v3505_v21 = vsel %vm643_vm2, %v3483_v1, -inf }
 0xed8   : > { %3506 = vmax.xlane.f32.xlu1 %v3505_v21 }
 0xedc   : > { %3488 = vmax.xlane.f32.xlu2 %v3487_v35 }
 0xee4   : > { %3503 = vmax.xlane.f32.xlu2 %v3502_v33 }
 0xefc   : > { %3689 = vrot.lane.b32.xlu2 %v5175_v23, %s4991_s18 }
 0xf02   : > { %v3486_v32 = vpop.xlane.xlu0 %3485 }
 0xf05   : > { %v3498_v22 = vpop.xlane.xlu1 %3497 }
 0xf06   : > { %v3512_v9 = vsub.f32 %v3480_v2, %v3498_v22  ;;  %v3508_v2 = vsub.f32 %v6133_v42, %v3486_v32 }
 0xf08   : > { %v3524_v18 = vmul.f32 1.442695, %v3512_v9 }
 0xf0a   : > { %4873 = vpow2.f32 %v3524_v18 }
 0xf0d   : > { %v3501_v16 = vpop.xlane.xlu0 %3500 }
 0xf0e   : > { %v3513_v31 = vsub.f32 %v3481_v8, %v3501_v16 }
 0xf10   : > { %v6158_v13 = vpop.eup %4873  ;;  %v3526_v21 = vmul.f32 1.442695, %v3513_v31 }
 0xf11   : > { %v3544_v38 = vsel %vm643_vm2, %v6158_v13, 0.0 }
 0xf25   : > { %3545 = vadd.xlane.f32.xlu2 %v3544_v38 }
 0xf3f   : > { %v3492_v62 = vpop.xlane.xlu0 %3491 }
 0xf40   : > { %v3510_v60 = vsub.f32 %v3478_v36, %v3492_v62  ;;  %v3516_v36 = vmul.f32 1.442695, %v3508_v2 }
 0xf42   : > { %v3520_v24 = vmul.f32 1.442695, %v3510_v60 }
 0xf44   : > { %4875 = vpow2.f32 %v3520_v24 }
 0xf45   : > { %4877 = vpow2.f32 %v3526_v21 }
 0xf47   : > { %v3495_v35 = vpop.xlane.xlu2 %3494 }
 0xf48   : > { %v3511_v23 = vsub.f32 %v3479_v10, %v3495_v35 }
 0xf4a   : > { %v6162_v33 = vpop.eup %4875  ;;  %v3522_v22 = vmul.f32 1.442695, %v3511_v23 }
 0xf4b   : > { %v3507_v9 = vpop.xlane.xlu1 %3506  ;;  %v3538_v18 = vsel %vm643_vm2, %v6162_v33, 0.0  ;;  %v6167_v62 = vpop.eup %4877 }
 0xf4c   : > { %4879 = vpow2.f32 %v3522_v22  ;;  %v3515_v38 = vsub.f32 %v3483_v1, %v3507_v9  ;;  %3539 = vadd.xlane.f32.xlu1 %v3538_v18  ;;  %v3547_v32 = vsel %vm643_vm2, %v6167_v62, 0.0 }
 0xf4e   : > { %v3530_v8 = vmul.f32 1.442695, %v3515_v38 }
 0xf4f   : > { %v3489_v16 = vpop.xlane.xlu2 %3488 }
 0xf50   : > { %4881 = vpow2.f32 %v3530_v8  ;;  %v3509_v10 = vsub.f32 %v3477_v30, %v3489_v16  ;;  %v6602_v8 = vpack.i.bf16 %v5565_v45, %v5561_v20  ;;  %v4538_v20 = vpack.i.bf16 %v5413_v14, %v5409_v0  ;;  %v6611_v0 = vld [vmem:[#allocation24_spill] sm:$0xff]  ;;  %v6612_v14 = vld [vmem:[#allocation23_spill] sm:$0xff] }
 0xf51   : > { %4883 = vpow2.f32 %v3516_v36  ;;  %v4518_v36 = vpack.i.bf16 %v5708_v44, %v5700_v55  ;;  %v4568_v45 = vpack.i.bf16 %v5432_v6, %v5428_v19  ;;  %v6608_v55 = vld [vmem:[#allocation20_spill] sm:$0xff]  ;;  %v6609_v44 = vld [vmem:[#allocation19_spill] sm:$0xff]  ;;  %v6614_v19 = vld [vmem:[#allocation13_spill] sm:$0xff] }
 0xf52   : > { %v6169_v60 = vpop.eup %4879  ;;  %v3518_v42 = vmul.f32 1.442695, %v3509_v10  ;;  %v6615_v6 = vld [vmem:[#allocation14_spill] sm:$0xff] }
 0xf53   : > { %v3541_v31 = vsel %vm643_vm2, %v6169_v60, 0.0 }
 0xf54   : > { %4885 = vpow2.f32 %v3518_v42  ;;  %3548 = vadd.xlane.f32.xlu1 %v3547_v32  ;;  %3542 = vadd.xlane.f32.xlu0 %v3541_v31 }
 0xf56   : > { %v6175_v1 = vpop.eup %4881 }
 0xf57   : > { %v3504_v24 = vpop.xlane.xlu2 %3503  ;;  %v3553_v21 = vsel %vm643_vm2, %v6175_v1, 0.0  ;;  %v6179_v30 = vpop.eup %4883 }
 0xf58   : > { %v3514_v35 = vsub.f32 %v3482_v7, %v3504_v24  ;;  %3554 = vadd.xlane.f32.xlu2 %v3553_v21  ;;  %v3532_v22 = vsel %vm643_vm2, %v6179_v30, 0.0 }
 0xf5a   : > { %v6181_v23 = vpop.eup %4885  ;;  %v3528_v2 = vmul.f32 1.442695, %v3514_v35 }
 0xf5b   : > { %v3535_v9 = vsel %vm643_vm2, %v6181_v23, 0.0 }
 0xf5c   : > { %4887 = vpow2.f32 %v3528_v2  ;;  %3533 = vadd.xlane.f32.xlu1 %v3532_v22  ;;  %3536 = vadd.xlane.f32.xlu0 %v3535_v9 }
 0xf5f   : > { %v3690_v18 = vpop.permute.xlu2 %3689 }
 0xf60   : > { %3702 = vmatpush.bf16.msrb.mxu3 %v3690_v18 }
 0xf62   : > { %v6187_v38 = vpop.eup %4887 }
 0xf63   : > { %v3550_v7 = vsel %vm643_vm2, %v6187_v38, 0.0 }
 0xf64   : > { %3551 = vadd.xlane.f32.xlu0 %v3550_v7 }
 0xf70   : > { %3714 = vrot.lane.b32.xlu2 %v5182_v25, %s4991_s18  ;;  %v4508_v25 = vpack.i.bf16 %v5430_v43, %v5426_v63  ;;  %v6604_v63 = vpack.i.bf16 %v5810_v29, %v5808_v48  ;;  %v6605_v43 = vpack.i.bf16 %v5801_v58, %v5799_v37  ;;  %v6610_v37 = vpack.i.bf16 %v6608_v55, %v6609_v44  ;;  %v6616_v58 = vld [vmem:[#allocation16_spill] sm:$0xff]  ;;  %v6617_v48 = vld [vmem:[#allocation15_spill] sm:$0xff] }
 0xf71   : > { %v6618_v29 = vpack.i.bf16 %v6616_v58, %v6617_v48 }
 0xf75   : > { %3739 = vrot.lane.b32.xlu1 %v5189_v41, %s4991_s18  ;;  %v6603_v41 = vpack.i.bf16 %v5972_v46, %v5968_v51  ;;  %v6620_v51 = vld [vmem:[#allocation22_spill] sm:$0xff]  ;;  %v6621_v46 = vld [vmem:[#allocation21_spill] sm:$0xff] }
 0xf76   : > { %v6622_v50 = vpack.i.bf16 %v6620_v51, %v6621_v46 }
 0xf78   : > { %3764 = vrot.lane.b32.xlu0 %v5192_v49, %s4991_s18  ;;  %4519 = vrot.lane.b32.xlu2 %v4518_v36, %s4992_s19  ;;  %v4543_v49 = vpack.i.bf16 %v5563_v53, %v5559_v39  ;;  %v6606_v39 = vpack.i.bf16 %v5960_v56, %v5958_v61  ;;  %v6607_v53 = vpack.i.bf16 %v5688_v5, %v5684_v47 }
 0xf79   : > { %v6613_v47 = vpack.i.bf16 %v6611_v0, %v6612_v14  ;;  %v4598_v5 = vpack.i.bf16 %v6615_v6, %v6614_v19  ;;  %v6619_v56 = vpack.i.bf16 %v5980_v3, %v5976_v17 }
 0xf7d   : > { %4514 = vrot.lane.b32.xlu1 %v6602_v8, %s4993_s20 }
 0xf80   : > { %4509 = vrot.lane.b32.xlu0 %v4508_v25, %s4994_s28  ;;  %4534 = vrot.lane.b32.xlu2 %v4533_v59, %s4995_s30  ;;  %v6623_v59 = vld [vmem:[#allocation26_spill] sm:$0xff] }
 0xf85   : > { %4529 = vrot.lane.b32.xlu1 %v6603_v41, %s4996_s8 }
 0xf88   : > { %4524 = vrot.lane.b32.xlu0 %v6604_v63, %s4997_s27  ;;  %4544 = vrot.lane.b32.xlu2 %v4543_v49, %s4993_s20 }
 0xf8d   : > { %4554 = vrot.lane.b32.xlu1 %v6605_v43, %s4997_s27 }
 0xf90   : > { %4539 = vrot.lane.b32.xlu0 %v4538_v20, %s4994_s28  ;;  %4559 = vrot.lane.b32.xlu2 %v6606_v39, %s4996_s8 }
 0xf95   : > { %4579 = vrot.lane.b32.xlu1 %v6607_v53, %s4992_s19 }
 0xf98   : > { %4549 = vrot.lane.b32.xlu0 %v6610_v37, %s4992_s19  ;;  %4569 = vrot.lane.b32.xlu2 %v4568_v45, %s4994_s28  ;;  %v3546_v61 = vpop.xlane.xlu2 %3545 }
 0xf99   : > { %4889 = vrcp.f32 %v3546_v61  ;;  %v3627_v3 = vand.u32 2147483648, %v3546_v61  ;;  %vm3621_vm7 = vweird.f32 %v3546_v61  ;;  %v3625_v16 = vand.u32 2147483647, %v3546_v61 }
 0xf9b   : > { %v3628_v32 = vor.u32 1.1754944e-38, %v3627_v3  ;;  %vm3626_vm9 = vcmp.eq.f32.partialorder %v3625_v16, 8.507059e+37 }
 0xf9d   : > { %4594 = vrot.lane.b32.xlu1 %v4593_v54, %s4995_s30 }
 0xf9f   : > { %v4890_v15 = vpop.eup %4889 }
 0xfa0   : > { %4564 = vrot.lane.b32.xlu0 %v4563_v11, %s4995_s30  ;;  %4584 = vrot.lane.b32.xlu2 %v6613_v47, %s4997_s27  ;;  %v3617_v4 = vmul.f32 %v4890_v15, %v3546_v61  ;;  %v6625_v11 = vpack.i.bf16 %v6623_v59, %v6624_v27  ;;  %vm3622_vm6 = vweird.f32 %v4890_v15 }
 0xfa1   : > { %vm3623_vm8 = vmor %vm3621_vm7, %vm3622_vm6 }
 0xfa2   : > { %v3618_v12 = vsub.f32 1.0, %v3617_v4 }
 0xfa4   : > { %v3619_v28 = vmul.f32 %v4890_v15, %v3618_v12 }
 0xfa6   : > { %v3620_v17 = vadd.f32 %v4890_v15, %v3619_v28 }
 0xfa8   : > { %4574 = vrot.lane.b32.xlu0 %v6618_v29, %s4993_s20  ;;  %4599 = vrot.lane.b32.xlu2 %v4598_v5, %s4994_s28  ;;  %v3624_v10 = vsel %vm3623_vm8, %v4890_v15, %v3620_v17 }
 0xfa9   : > { %v3629_v35 = vsel %vm3626_vm9, %v3628_v32, %v3624_v10 }
 0xfaa   : > { %v6272_v34 = vmul.f32 %v6158_v13, %v3629_v35 }
 0xfac   : > { %v3680_v8 = vpack.c.bf16 %v6272_v34, %v6272_v34 }
 0xfb0   : > { %4589 = vrot.lane.b32.xlu0 %v6619_v56, %s4996_s8  ;;  %4619 = vrot.lane.b32.xlu2 %v6622_v50, %s4992_s19 }
 0xfb8   : > { %4624 = vrot.lane.b32.xlu0 %v6625_v11, %s4997_s27  ;;  %4639 = vrot.lane.b32.xlu2 %v4638_v57, %s4995_s30  ;;  %s4925_s27 = scalar_lea.hbm %s6549_s6, 128 }
 0xfbf   : > { %v3540_v54 = vpop.xlane.xlu1 %3539 }
 0xfc0   : > { %4891 = vrcp.f32 %v3540_v54  ;;  %v3597_v2 = vand.u32 2147483648, %v3540_v54  ;;  %v3595_v9 = vand.u32 2147483647, %v3540_v54  ;;  %vm3591_vm11 = vweird.f32 %v3540_v54 }
 0xfc2   : > { %v3598_v41 = vor.u32 1.1754944e-38, %v3597_v2  ;;  %vm3596_vm13 = vcmp.eq.f32.partialorder %v3595_v9, 8.507059e+37 }
 0xfc6   : > { %v4892_v42 = vpop.eup %4891 }
 0xfc7   : > { %v3587_v31 = vmul.f32 %v4892_v42, %v3540_v54  ;;  %v3543_v24 = vpop.xlane.xlu0 %3542  ;;  %v3549_v21 = vpop.xlane.xlu1 %3548  ;;  %vm3592_vm10 = vweird.f32 %v4892_v42 }
 0xfc8   : > { %4893 = vrcp.f32 %v3543_v24  ;;  %vm3593_vm12 = vmor %vm3591_vm11, %vm3592_vm10  ;;  %v3610_v43 = vand.u32 2147483647, %v3543_v24  ;;  %vm3606_vm14 = vweird.f32 %v3543_v24  ;;  %v3612_v45 = vand.u32 2147483648, %v3543_v24 }
 0xfc9   : > { %v3588_v40 = vsub.f32 1.0, %v3587_v31  ;;  %4895 = vrcp.f32 %v3549_v21  ;;  %v3640_v37 = vand.u32 2147483647, %v3549_v21  ;;  %v3642_v0 = vand.u32 2147483648, %v3549_v21 }
 0xfca   : > { %vm3636_vm3 = vweird.f32 %v3549_v21  ;;  %vm6290_vm4 = vcmp.eq.f32.partialorder %v3610_v43, 8.507059e+37  ;;  %v3613_v46 = vor.u32 1.1754944e-38, %v3612_v45 }
 0xfcb   : > { %v3589_v57 = vmul.f32 %v4892_v42, %v3588_v40  ;;  %v6274_v22 = vpop.xlane.xlu2 %3554  ;;  %vm6297_vm7 = vcmp.eq.f32.partialorder %v3640_v37, 8.507059e+37  ;;  %v3643_v15 = vor.u32 1.1754944e-38, %v3642_v0 }
 0xfcc   : > { %4897 = vrcp.f32 %v6274_v22  ;;  %v3670_v61 = vand.u32 2147483647, %v6274_v22  ;;  %v3672_v56 = vand.u32 2147483648, %v6274_v22  ;;  %vm3666_vm9 = vweird.f32 %v6274_v22 }
 0xfcd   : > { %v3590_v18 = vadd.f32 %v4892_v42, %v3589_v57 }
 0xfce   : > { %v4894_v7 = vpop.eup %4893  ;;  %vm6317_vm10 = vcmp.eq.f32.partialorder %v3670_v61, 8.507059e+37 }
 0xfcf   : > { %v4896_v36 = vpop.eup %4895  ;;  %v3594_v25 = vsel %vm3593_vm12, %v4892_v42, %v3590_v18  ;;  %v3602_v13 = vmul.f32 %v4894_v7, %v3543_v24  ;;  %v6279_v49 = vpop.xlane.xlu0 %3536  ;;  %vm3607_vm15 = vweird.f32 %v4894_v7  ;;  %v3673_v42 = vor.u32 1.1754944e-38, %v3672_v56 }
 0xfd0   : > { %v6281_v63 = vpop.xlane.xlu1 %3533  ;;  %v3632_v20 = vmul.f32 %v4896_v36, %v3549_v21  ;;  %4899 = vrcp.f32 %v6279_v49  ;;  %v3599_v39 = vsel %vm3596_vm13, %v3598_v41, %v3594_v25  ;;  %vm3637_vm5 = vweird.f32 %v4896_v36  ;;  %vm3608_vm6 = vmor %vm3606_vm14, %vm3607_vm15 }
 0xfd1   : > { %v3603_v53 = vsub.f32 1.0, %v3602_v13  ;;  %4901 = vrcp.f32 %v6281_v63  ;;  %v3600_v6 = vmul.f32 %v6162_v33, %v3599_v39  ;;  %vm6302_vm8 = vmor %vm3636_vm3, %vm3637_vm5  ;;  %v3580_v31 = vand.u32 2147483647, %v6279_v49 }
 0xfd2   : > { %v6284_v55 = vpop.eup %4897  ;;  %v3633_v44 = vsub.f32 1.0, %v3632_v20  ;;  %v3582_v21 = vand.u32 2147483648, %v6279_v49  ;;  %vm3576_vm13 = vweird.f32 %v6279_v49  ;;  %v3565_v18 = vand.u32 2147483647, %v6281_v63 }
 0xfd3   : > { %v3604_v14 = vmul.f32 %v4894_v7, %v3603_v53  ;;  %v3662_v47 = vmul.f32 %v6284_v55, %v6274_v22  ;;  %v3715_v19 = vpop.permute.xlu2 %3714  ;;  %v3678_v54 = vpack.c.bf16 %v3600_v6, %v3600_v6  ;;  %vm3667_vm11 = vweird.f32 %v6284_v55 }
 0xfd4   : > { %v3634_v58 = vmul.f32 %v4896_v36, %v3633_v44  ;;  %3727 = vmatpush.bf16.msrb.mxu0 %v3715_v19  ;;  %vm6333_vm14 = vmor %vm3666_vm9, %vm3667_vm11  ;;  %v3567_v13 = vand.u32 2147483648, %v6281_v63  ;;  %vm3581_vm3 = vcmp.eq.f32.partialorder %v3580_v31, 8.507059e+37  ;;  %v3583_v20 = vor.u32 1.1754944e-38, %v3582_v21  ;;  %v4426_v31 = vld [vmem:[%s6547_s4 + $0x8] sm:$0xff] }
 0xfd5   : > { %v3605_v48 = vadd.f32 %v4894_v7, %v3604_v14  ;;  %v3663_v29 = vsub.f32 1.0, %v3662_v47  ;;  %v3711_v2 = vunpack.c.l.b16 %v3678_v54  ;;  %vm3561_vm5 = vweird.f32 %v6281_v63 }
 0xfd6   : > { %v4900_v51 = vpop.eup %4899  ;;  %v3635_v50 = vadd.f32 %v4896_v36, %v3634_v58  ;;  %v3568_v14 = vor.u32 1.1754944e-38, %v3567_v13  ;;  %v3736_v33 = vunpack.c.l.b16 %v3680_v8  ;;  %v6638_v25 = vpack.i.bf16 %v5966_v52, %v5964_v26 }
 0xfd7   : > { %v3609_v4 = vsel %vm3608_vm6, %v4894_v7, %v3605_v48  ;;  %v3664_v27 = vmul.f32 %v6284_v55, %v3663_v29  ;;  %v3572_v11 = vmul.f32 %v4900_v51, %v6279_v49  ;;  %v6309_v12 = vpop.xlane.xlu0 %3551  ;;  %v4902_v28 = vpop.eup %4901  ;;  %vm3577_vm12 = vweird.f32 %v4900_v51 }
 0xfd8   : > { %v3614_v17 = vsel %vm6290_vm4, %v3613_v46, %v3609_v4  ;;  %v3639_v3 = vsel %vm6302_vm8, %v4896_v36, %v3635_v50  ;;  %4903 = vrcp.f32 %v6309_v12  ;;  %v3557_v35 = vmul.f32 %v4902_v28, %v6281_v63  ;;  %vm3578_vm15 = vmor %vm3576_vm13, %vm3577_vm12 }
 0xfd9   : > { %v3615_v16 = vmul.f32 %v6169_v60, %v3614_v17  ;;  %v3573_v32 = vsub.f32 1.0, %v3572_v11  ;;  %v3644_v24 = vsel %vm6297_vm7, %v3643_v15, %v3639_v3  ;;  %v3665_v60 = vadd.f32 %v6284_v55, %v3664_v27 }
 0xfda   : > { %v3558_v9 = vsub.f32 1.0, %v3557_v35  ;;  %v3645_v36 = vmul.f32 %v6167_v62, %v3644_v24  ;;  %vm3562_vm4 = vweird.f32 %v4902_v28  ;;  %vm3566_vm6 = vcmp.eq.f32.partialorder %v3565_v18, 8.507059e+37 }
 0xfdb   : > { %v3679_v40 = vpack.c.bf16 %v3615_v16, %v3615_v16  ;;  %v3574_v57 = vmul.f32 %v4900_v51, %v3573_v32  ;;  %v3669_v62 = vsel %vm6333_vm14, %v6284_v55, %v3665_v60  ;;  %vm3563_vm7 = vmor %vm3561_vm5, %vm3562_vm4  ;;  %v3655_v6 = vand.u32 2147483647, %v6309_v12  ;;  %v4428_v16 = vld [vmem:[%s6547_s4 + $0x18] sm:$0xff]  ;;  %v4520_v13 = vpop.permute.xlu2 %4519 }
 0xfdc   : > { %v3559_v49 = vmul.f32 %v4902_v28, %v3558_v9  ;;  %v3681_v37 = vpack.c.bf16 %v3645_v36, %v3645_v36  ;;  %v3674_v19 = vsel %vm6317_vm10, %v3673_v42, %v3669_v62  ;;  %v3657_v5 = vand.u32 2147483648, %v6309_v12  ;;  %4434 = vmatpush.bf16.msra.mxu3 %v4428_v16  ;;  %4125 = vmatpush.bf16.msra.mxu0 %v4428_v16  ;;  %v6637_v9 = vld [vmem:[#allocation18_spill] sm:$0xff] }
 0xfdd   : > { %v3712_v7 = vunpack.c.l.b16 %v3679_v40  ;;  %v3575_v41 = vadd.f32 %v4900_v51, %v3574_v57  ;;  %v3675_v61 = vmul.f32 %v6175_v1, %v3674_v19  ;;  %vm3651_vm9 = vweird.f32 %v6309_v12 }
 0xfde   : > { %v4904_v43 = vpop.eup %4903  ;;  %v3560_v44 = vadd.f32 %v4902_v28, %v3559_v49  ;;  %v3658_v50 = vor.u32 1.1754944e-38, %v3657_v5  ;;  %vm3656_vm11 = vcmp.eq.f32.partialorder %v3655_v6, 8.507059e+37  ;;  %v6640_v5 = vld [vmem:[#allocation7_spill] sm:$0xff]  ;;  %vm4024_vm12 = vcmask 195584  }
 0xfdf   : > { %v3713_v39 = vpack.c.b16 %v3712_v7, %v3711_v2  ;;  %v3579_v53 = vsel %vm3578_vm15, %v4900_v51, %v3575_v41  ;;  %v3647_v22 = vmul.f32 %v4904_v43, %v6309_v12  ;;  %vm3652_vm8 = vweird.f32 %v4904_v43  ;;  %v6636_v2 = vld [vmem:[#allocation17_spill] sm:$0xff] }
 0xfe0   : > { %v3584_v45 = vsel %vm3581_vm3, %v3583_v20, %v3579_v53  ;;  %v3564_v55 = vsel %vm3563_vm7, %v4902_v28, %v3560_v44  ;;  %vm3653_vm10 = vmor %vm3651_vm9, %vm3652_vm8  ;;  %v3683_v11 = vpack.c.bf16 %v3675_v61, %v3675_v61  ;;  %v4613_v18 = vpack.i.bf16 %v6637_v9, %v6636_v2  ;;  %v4425_v44 = vld [vmem:[%s6547_s4] sm:$0xff] }
 0xfe1   : > { %v3585_v0 = vmul.f32 %v6181_v23, %v3584_v45  ;;  %v3648_v47 = vsub.f32 1.0, %v3647_v22  ;;  %4384 = vmatmul.msk.bf16.vlgmr.msrb.gmra.mxu0 %vm643_vm2, %v3713_v39  ;;  %v3569_v48 = vsel %vm3566_vm6, %v3568_v14, %v3564_v55  ;;  %v3737_v23 = vunpack.c.l.b16 %v3681_v37  ;;  %v6639_v55 = vld [vmem:[#allocation10_spill] sm:$0xff] }
 0xfe2   : > { %v3570_v29 = vmul.f32 %v6179_v30, %v3569_v48  ;;  %v3762_v34 = vunpack.c.l.b16 %v3683_v11  ;;  %vm4033_vm13 = vcmask 261120   ;;  %vm4042_vm14 = vcmask 326656  }
 0xfe3   : > { %v3677_v58 = vpack.c.bf16 %v3585_v0, %v3585_v0  ;;  %v3649_v63 = vmul.f32 %v4904_v43, %v3648_v47  ;;  %v3738_v30 = vpack.c.b16 %v3737_v23, %v3736_v33  ;;  %v6375_v49 = vpop.permute.xlu2 %4534  ;;  %vm4051_vm15 = vcmask 392192  }
 0xfe4   : > { %v3676_v46 = vpack.c.bf16 %v3570_v29, %v3570_v29  ;;  %v4522_v29 = vunpack.i.h.bf16 %v4520_v13  ;;  %vm4060_vm3 = vcmask 457728  }
 0xfe5   : > { %v3650_v56 = vadd.f32 %v4904_v43, %v3649_v63  ;;  %v3687_v51 = vunpack.c.l.b16 %v3677_v58 }
 0xfe6   : > { %v3686_v59 = vunpack.c.l.b16 %v3676_v46 }
 0xfe7   : > { %v3654_v15 = vsel %vm3653_vm10, %v4904_v43, %v3650_v56  ;;  %v3740_v4 = vpop.permute.xlu1 %3739 }
 0xfe8   : > { %v3659_v27 = vsel %vm3656_vm11, %v3658_v50, %v3654_v15  ;;  %3752 = vmatpush.bf16.msra.mxu1 %v3740_v4  ;;  %v3688_v28 = vpack.c.b16 %v3687_v51, %v3686_v59  ;;  %v4521_v50 = vunpack.i.l.bf16 %v4520_v13 }
 0xfe9   : > { %v3660_v1 = vmul.f32 %v6187_v38, %v3659_v27  ;;  %v4427_v38 = vld [vmem:[%s6547_s4 + $0x10] sm:$0xff]  ;;  %v4537_v27 = vunpack.i.h.bf16 %v6375_v49 }
 0xfea   : > { %v3765_v12 = vpop.permute.xlu0 %3764  ;;  %4383 = vmatmul.msk.bf16.vlgmr.msrb.gmra.mxu3 %vm643_vm2, %v3688_v28  ;;  %4126 = vmatpush.bf16.msra.mxu0 %v4427_v38 }
 0xfeb   : > { %v3682_v54 = vpack.c.bf16 %v3660_v1, %v3660_v1  ;;  %3777 = vmatpush.bf16.msra.mxu2 %v3765_v12  ;;  %4385 = vmatmul.msk.bf16.vlgmr.msra.gmra.mxu1 %vm643_vm2, %v3738_v30  ;;  %v4545_v53 = vpop.permute.xlu2 %4544  ;;  %v4536_v1 = vunpack.i.l.bf16 %v6375_v49 }
 0xfec   : > { %4435 = vmatpush.bf16.msra.mxu3 %v4427_v38  ;;  %v4547_v38 = vunpack.i.h.bf16 %v4545_v53 }
 0xfed   : > { %v3761_v8 = vunpack.c.l.b16 %v3682_v54 }
 0xfee   : > { %4127 = vmatpush.bf16.msra.mxu0 %v4426_v31 }
 0xfef   : > { %v3763_v17 = vpack.c.b16 %v3762_v34, %v3761_v8  ;;  %v4515_v20 = vpop.permute.xlu1 %4514  ;;  %v6641_v8 = vld [vmem:[#allocation6_spill] sm:$0xff] }
 0xff0   : > { %4436 = vmatpush.bf16.msra.mxu3 %v4426_v31  ;;  %v4517_v48 = vunpack.i.h.bf16 %v4515_v20  ;;  %v4516_v63 = vunpack.i.l.bf16 %v4515_v20 }
 0xff1   : > { %4386 = vmatmul.msk.bf16.vlgmr.msra.gmra.mxu2 %vm643_vm2, %v3763_v17 }
 0xff2   : > { %v4510_v41 = vpop.permute.xlu0 %4509  ;;  %4128 = vmatpush.bf16.msra.mxu0 %v4425_v44 }
 0xff3   : > { %v6382_v37 = vpop.permute.xlu2 %4559  ;;  %v4512_v47 = vunpack.i.h.bf16 %v4510_v41  ;;  %v4511_v19 = vunpack.i.l.bf16 %v4510_v41 }
 0xff4   : > { %4437 = vmatpush.bf16.msra.mxu3 %v4425_v44  ;;  %v4562_v31 = vunpack.i.h.bf16 %v6382_v37  ;;  %v6643_v44 = vld [vmem:[#allocation12_spill] sm:$0xff] }
 0xff5   : > { %v4013_v6 = vsel %vm524_vm1, %v6639_v55, %v4512_v47  ;;  %v4012_v58 = vsel %vm524_vm1, %v6640_v5, %v4511_v19 }
 0xff6   : > { %v4020_v23 = vsel %vm643_vm2, %v4012_v58, %v4516_v63  ;;  %v4021_v61 = vsel %vm643_vm2, %v4013_v6, %v4517_v48 }
 0xff7   : > { %v4530_v62 = vpop.permute.xlu1 %4529  ;;  %v4029_v30 = vsel %vm4024_vm12, %v4020_v23, %v4521_v50  ;;  %v4030_v11 = vsel %vm4024_vm12, %v4021_v61, %v4522_v29 }
 0xff8   : > { %v4532_v54 = vunpack.i.h.bf16 %v4530_v62  ;;  %v4531_v34 = vunpack.i.l.bf16 %v4530_v62 }
 0xffa   : > { %v4525_v43 = vpop.permute.xlu0 %4524 }
 0xffb   : > { %v6388_v0 = vpop.permute.xlu2 %4569  ;;  %v4527_v56 = vunpack.i.h.bf16 %v4525_v43  ;;  %v4526_v51 = vunpack.i.l.bf16 %v4525_v43 }
 0xffd   : > { %v4038_v28 = vsel %vm4033_vm13, %v4029_v30, %v4526_v51  ;;  %v4039_v12 = vsel %vm4033_vm13, %v4030_v11, %v4527_v56 }
 0xfff   : > { %v6377_v45 = vpop.permute.xlu1 %4554 }
0x1000   : > { %v4557_v20 = vunpack.i.h.bf16 %v6377_v45  ;;  %v4556_v49 = vunpack.i.l.bf16 %v6377_v45 }
0x1002   : > { %v4540_v39 = vpop.permute.xlu0 %4539 }
0x1003   : > { %v4542_v33 = vunpack.i.h.bf16 %v4540_v39  ;;  %v4541_v15 = vunpack.i.l.bf16 %v4540_v39  ;;  %v6400_v4 = vpop.permute.xlu2 %4584 }
0x1004   : > { %v4587_v30 = vunpack.i.h.bf16 %v6400_v4 }
0x1005   : > { %v4009_v17 = vsel %vm524_vm1, %v6641_v8, %v4542_v33 }
0x1007   : > { %v6386_v52 = vpop.permute.xlu1 %4579 }
0x1008   : > { %v4582_v48 = vunpack.i.h.bf16 %v6386_v52 }
0x100a   : > { %v4550_v22 = vpop.permute.xlu0 %4549 }
0x100b   : > { %v4600_v39 = vpop.permute.xlu2 %4599 }
0x100f   : > { %v6398_v46 = vpop.permute.xlu1 %4594 }
0x1012   : > { %v6384_v26 = vpop.permute.xlu0 %4564 }
0x1013   : > { %v4567_v63 = vunpack.i.h.bf16 %v6384_v26  ;;  %v4566_v29 = vunpack.i.l.bf16 %v6384_v26  ;;  %v4586_v26 = vunpack.i.l.bf16 %v6400_v4 }
0x101a   : > { %v6390_v14 = vpop.permute.xlu0 %4574 }
0x101b   : > { %v4577_v9 = vunpack.i.h.bf16 %v6390_v14 }
0x1022   : > { %v6402_v59 = vpop.permute.xlu0 %4589 }
0x1023   : > { %v4592_v33 = vunpack.i.h.bf16 %v6402_v59 }
0x102a   : > { %v6436_v19 = vpop.permute.xlu0 %4624 }
0x105e   : > { %v3729_v35 = vpop.f32.mrf.mxu0 }
0x1066   : > { %v3731_v7 = vpop.f32.mrf.mxu0 }
0x1067   : > { %v4643_v36 = vpack.i.bf16 %v3731_v7, %v3729_v35  ;;  %v4572_v35 = vunpack.i.h.bf16 %v6388_v0 }
0x1068   : > { %v3754_v3 = vpop.f32.mrf.mxu1 }
0x106d   : > { %v3704_v10 = vpop.f32.mrf.mxu3 }
0x1070   : > { %v3756_v42 = vpop.f32.mrf.mxu1 }
0x1071   : > { %v4603_v32 = vpack.i.bf16 %v3756_v42, %v3754_v3  ;;  %v6642_v3 = vld [vmem:[#allocation5_spill] sm:$0xff]  ;;  %v4552_v42 = vunpack.i.h.bf16 %v4550_v22 }
0x1072   : > { %v4008_v16 = vsel %vm524_vm1, %v6642_v3, %v4541_v15  ;;  %v4591_v15 = vunpack.i.l.bf16 %v6402_v59 }
0x1073   : > { %4604 = vrot.lane.b32.xlu1 %v4603_v32, %s4998_s17  ;;  %v4551_v32 = vunpack.i.l.bf16 %v4550_v22  ;;  %v4561_v22 = vunpack.i.l.bf16 %v6382_v37  ;;  %v4581_v37 = vunpack.i.l.bf16 %v6386_v52 }
0x1074   : > { %v3779_v24 = vpop.f32.mrf.mxu2 }
0x1075   : > { %v3706_v21 = vpop.f32.mrf.mxu3 }
0x1076   : > { %v4608_v40 = vpack.i.bf16 %v3706_v21, %v3704_v10  ;;  %v4546_v10 = vunpack.i.l.bf16 %v4545_v53  ;;  %v4048_v21 = vsel %vm4042_vm14, %v4039_v12, %v4532_v54 }
0x1077   : > { %v4057_v43 = vsel %vm4051_vm15, %v4048_v21, %v4537_v27 }
0x107b   : > { %4609 = vrot.lane.b32.xlu1 %v4608_v40, %s4998_s17  ;;  %v4571_v40 = vunpack.i.l.bf16 %v6388_v0  ;;  %v4015_v0 = vsel %vm524_vm1, %v6643_v44, %v4572_v35 }
0x107c   : > { %v3781_v60 = vpop.f32.mrf.mxu2  ;;  %v4023_v58 = vsel %vm643_vm2, %v4015_v0, %v4577_v9  ;;  %v6645_v9 = vld [vmem:[#allocation11_spill] sm:$0xff] }
0x107d   : > { %v4628_v57 = vpack.i.bf16 %v3781_v60, %v3779_v24  ;;  %v4047_v24 = vsel %vm4042_vm14, %v4038_v28, %v4531_v34  ;;  %v4016_v60 = vsel %vm643_vm2, %v4008_v16, %v4546_v10  ;;  %v4032_v51 = vsel %vm4024_vm12, %v4023_v58, %v4582_v48 }
0x107e   : > { %v4056_v13 = vsel %vm4051_vm15, %v4047_v24, %v4536_v1  ;;  %v4041_v34 = vsel %vm4033_vm13, %v4032_v51, %v4587_v30  ;;  %v4597_v10 = vunpack.i.h.bf16 %v6398_v46 }
0x107f   : > { %4629 = vrot.lane.b32.xlu0 %v4628_v57, %s4998_s17  ;;  %v4017_v57 = vsel %vm643_vm2, %v4009_v17, %v4547_v38  ;;  %v4620_v17 = vpop.permute.xlu2 %4619  ;;  %v4050_v16 = vsel %vm4042_vm14, %v4041_v34, %v4592_v33 }
0x1080   : > { %v4026_v41 = vsel %vm4024_vm12, %v4017_v57, %v4552_v42  ;;  %v4596_v42 = vunpack.i.l.bf16 %v6398_v46  ;;  %v4059_v21 = vsel %vm4051_vm15, %v4050_v16, %v4597_v10 }
0x1081   : > { %v4035_v45 = vsel %vm4033_vm13, %v4026_v41, %v4557_v20 }
0x1082   : > { %v4044_v61 = vsel %vm4042_vm14, %v4035_v45, %v4562_v31  ;;  %v4601_v31 = vunpack.i.l.bf16 %v4600_v39 }
0x1083   : > { %4614 = vrot.lane.b32.xlu1 %v4613_v18, %s4993_s20  ;;  %v4576_v18 = vunpack.i.l.bf16 %v6390_v14  ;;  %v6644_v14 = vld [vmem:[#allocation9_spill] sm:$0xff]  ;;  %v4053_v1 = vsel %vm4051_vm15, %v4044_v61, %v4567_v63  ;;  %s267_s20 = sand.u32 1, %s4967_s22  }
0x1084   : > { %v4014_v47 = vsel %vm524_vm1, %v6644_v14, %v4571_v40  ;;  %s4260_s30 = sshll.u32 %s267_s20, 6  ;;  %s4159_s24 = scalar_lea.sflag [#allocation3], %s267_s20 }
0x1085   : > { %v4022_v5 = vsel %vm643_vm2, %v4014_v47, %v4576_v18  ;;  %s269_s11 = scalar_lea.vmem [#allocation2], %s4260_s30 }
0x1086   : > { %v4031_v56 = vsel %vm4024_vm12, %v4022_v5, %v4581_v37  ;;  %s4173_s16 = sshll.u32 %s269_s11, 4  ;;  %s4174_s16 = int_to_ptr.vmem [resolvable:$true] %s4173_s16 }
0x1087   : > { %4644 = vrot.lane.b32.xlu0 %v4643_v36, %s4998_s17  ;;  %v4040_v54 = vsel %vm4033_vm13, %v4031_v56, %v4586_v26  ;;  %v4640_v20 = vpop.permute.xlu2 %4639  ;;  %v4648_v56 = vld [vmem:[%s6548_s5] ss:$0 sm:$0xff]  ;;  %s4175_s17 = sshll.u32 %s4172_s15, 4  ;;  %s4176_s17 = int_to_ptr.hbm [resolvable:$true] %s4175_s17 }
0x1088   : > { %v4049_v3 = vsel %vm4042_vm14, %v4040_v54, %v4591_v15  ;;  %v4642_v47 = vunpack.i.h.bf16 %v4640_v20  ;;  %s4919_s18 = sshra.s32 %s4176_s17, 4  ;;  %s4920_s18 = int_to_ptr.hbm [resolvable:$true] %s4919_s18 }
0x1089   : > { %v4058_v24 = vsel %vm4051_vm15, %v4049_v3, %v4596_v42  ;;  %s4921_s19 = scalar_lea.hbm %s4920_s18, 64  ;;  %p4926_p1 = scmp.lt.s32.totalorder %s4920_s18, %s6549_s6 }
0x108a   : > { %p4922_p12 = scmp.ne.s32.totalorder %s4920_s18, %s4921_s19  ;;  %p4927_p2 = scmp.lt.s32.totalorder %s4925_s27, %s4921_s19 }
0x108b   : > { %4634 = vrot.lane.b32.xlu1 %v6638_v25, %s4996_s8  ;;  %v4025_v25 = vsel %vm4024_vm12, %v4016_v60, %v4551_v32  ;;  %v4602_v32 = vunpack.i.h.bf16 %v4600_v39 }
0x108c   : > { %v4034_v6 = vsel %vm4033_vm13, %v4025_v25, %v4556_v49  ;;  %p4923_p13 = pnand %p4922_p12, %p5075_p4  ;;  %p4928_p3 = por %p4927_p2, %p4926_p1 }
0x108d   : > { %v4043_v23 = vsel %vm4042_vm14, %v4034_v6, %v4561_v22  ;;  %v4011_v18 = vsel %vm524_vm1, %v6645_v9, %v4602_v32 }
0x108e   : > { %v4052_v11 = vsel %vm4051_vm15, %v4043_v23, %v4566_v29  ;;  %p4924_p0 = pneg %p4923_p13 }
0x1090   : > { %p4929_p5 = pnand %p4928_p3, %p4924_p0 }
0x10e5   : > { %v4605_v2 = vpop.permute.xlu1 %4604 }
0x10e6   : > { %v4607_v7 = vunpack.i.h.bf16 %v4605_v2  ;;  %v4606_v36 = vunpack.i.l.bf16 %v4605_v2 }
0x10e8   : > { %v4065_v62 = vsel %vm4060_vm3, %v4056_v13, %v4606_v36  ;;  %v4066_v53 = vsel %vm4060_vm3, %v4057_v43, %v4607_v7  ;;  %v6646_v7 = vld [vmem:[#allocation8_spill] sm:$0xff]  ;;  %v4622_v13 = vunpack.i.h.bf16 %v4620_v17  ;;  %v4621_v43 = vunpack.i.l.bf16 %v4620_v17 }
0x10e9   : > { %v4071_v55 = vpack.c.bf16 %v4066_v53, %v4065_v62  ;;  %v4010_v46 = vsel %vm524_vm1, %v6646_v7, %v4601_v31  ;;  %v4627_v62 = vunpack.i.h.bf16 %v6436_v19  ;;  %v4626_v53 = vunpack.i.l.bf16 %v6436_v19 }
0x10eb   : > { %4405 = vmatmul.msk.bf16.vlgmr.msra.gmra.mxu3 %vm326_vm0, %v4071_v55  ;;  %v4641_v55 = vunpack.i.l.bf16 %v4640_v20 }
0x10ed   : > { %v4610_v50 = vpop.permute.xlu1 %4609 }
0x10ee   : > { %v4612_v52 = vunpack.i.h.bf16 %v4610_v50  ;;  %v4611_v27 = vunpack.i.l.bf16 %v4610_v50 }
0x10f0   : > { %v4061_v28 = vsel %vm4060_vm3, %v4052_v11, %v4611_v27  ;;  %v4062_v12 = vsel %vm4060_vm3, %v4053_v1, %v4612_v52 }
0x10f1   : > { %v4069_v8 = vpack.c.bf16 %v4062_v12, %v4061_v28  ;;  %v4630_v59 = vpop.permute.xlu0 %4629 }
0x10f2   : > { %v4632_v4 = vunpack.i.h.bf16 %v4630_v59  ;;  %v4631_v38 = vunpack.i.l.bf16 %v4630_v59 }
0x10f3   : > { %4403 = vmatmul.msk.bf16.vlgmr.msra.gmra.mxu0 %vm326_vm0, %v4069_v8 }
0x10f4   : > { %v4067_v40 = vsel %vm4060_vm3, %v4058_v24, %v4631_v38  ;;  %v4068_v60 = vsel %vm4060_vm3, %v4059_v21, %v4632_v4 }
0x10f5   : > { %v4615_v35 = vpop.permute.xlu1 %4614  ;;  %v4072_v36 = vpack.c.bf16 %v4068_v60, %v4067_v40 }
0x10f6   : > { %v4617_v57 = vunpack.i.h.bf16 %v4615_v35  ;;  %v4616_v2 = vunpack.i.l.bf16 %v4615_v35 }
0x10f8   : > { %v4019_v25 = vsel %vm643_vm2, %v4011_v18, %v4617_v57  ;;  %v4018_v41 = vsel %vm643_vm2, %v4010_v46, %v4616_v2 }
0x10f9   : > { %v4028_v49 = vsel %vm4024_vm12, %v4019_v25, %v4622_v13  ;;  %v4027_v39 = vsel %vm4024_vm12, %v4018_v41, %v4621_v43  ;;  %v4645_v22 = vpop.permute.xlu0 %4644 }
0x10fa   : > { %v4036_v6 = vsel %vm4033_vm13, %v4027_v39, %v4626_v53  ;;  %v4037_v45 = vsel %vm4033_vm13, %v4028_v49, %v4627_v62  ;;  %v4647_v5 = vunpack.i.h.bf16 %v4645_v22  ;;  %v4646_v58 = vunpack.i.l.bf16 %v4645_v22 }
0x10fb   : > { %4406 = vmatmul.msk.bf16.gmra.mxu3 %vm326_vm0, %v4072_v36 }
0x10fd   : > { %v4635_v44 = vpop.permute.xlu1 %4634 }
0x10fe   : > { %v4637_v0 = vunpack.i.h.bf16 %v4635_v44  ;;  %v4636_v14 = vunpack.i.l.bf16 %v4635_v44 }
0x1100   : > { %v4045_v48 = vsel %vm4042_vm14, %v4036_v6, %v4636_v14  ;;  %v4046_v37 = vsel %vm4042_vm14, %v4037_v45, %v4637_v0 }
0x1101   : > { %v4054_v19 = vsel %vm4051_vm15, %v4045_v48, %v4641_v55  ;;  %v4055_v63 = vsel %vm4051_vm15, %v4046_v37, %v4642_v47 }
0x1102   : > { %v4063_v29 = vsel %vm4060_vm3, %v4054_v19, %v4646_v58  ;;  %v4064_v23 = vsel %vm4060_vm3, %v4055_v63, %v4647_v5 }
0x1103   : > { %v4070_v61 = vpack.c.bf16 %v4064_v23, %v4063_v29 }
0x1105   : > { %4404 = vmatmul.msk.bf16.gmra.mxu0 %vm326_vm0, %v4070_v61 }
0x116e   : > { %v4140_v51 = vpop.f32.mrf.mxu3 }
0x116f   : > { %v4141_v50 = vadd.f32 %v4648_v56, %v4140_v51 }
0x1170   : > { %v4130_v33 = vpop.f32.mrf.mxu0 }
0x1171   : > { %4154 = vst.msk [vmem:[%s269_s11 + $0x20] sm:$0xff] %vm326_vm0, %v4141_v50  ;;  %v4131_v15 = vadd.f32 %v4648_v56, %v4130_v33 }
0x1173   : > { %4150 = vst.msk [vmem:[%s269_s11] sm:$0xff] %vm326_vm0, %v4131_v15 }
0x1176   : > { %v4142_v52 = vpop.f32.mrf.mxu3 }
0x1177   : > { %v4143_v27 = vadd.f32 %v4648_v56, %v4142_v52 }
0x1178   : > { %v4132_v30 = vpop.f32.mrf.mxu0 }
0x1179   : > { %4155 = vst.msk [vmem:[%s269_s11 + $0x28] sm:$0xff] %vm326_vm0, %v4143_v27  ;;  %v4133_v26 = vadd.f32 %v4648_v56, %v4132_v30 }
0x117b   : > { %4151 = vst.msk [vmem:[%s269_s11 + $0x8] sm:$0xff] %vm326_vm0, %v4133_v26 }
0x117e   : > { %v4145_v11 = vpop.f32.mrf.mxu3 }
0x117f   : > { %v4146_v1 = vadd.f32 %v4648_v56, %v4145_v11 }
0x1181   : > { %4156 = vst.msk [vmem:[%s269_s11 + $0x30] sm:$0xff] %vm326_vm0, %v4146_v1 }
0x1182   : > { %v4135_v28 = vpop.f32.mrf.mxu0 }
0x1183   : > { %v4136_v12 = vadd.f32 %v4648_v56, %v4135_v28 }
0x1185   : > { %4152 = vst.msk [vmem:[%s269_s11 + $0x10] sm:$0xff] %vm326_vm0, %v4136_v12 }
0x1186   : > { %v4147_v54 = vpop.f32.mrf.mxu3 }
0x1187   : > { %v4148_v34 = vadd.f32 %v4648_v56, %v4147_v54 }
0x1189   : > { %4157 = vst.msk [vmem:[%s269_s11 + $0x38] sm:$0xff] %vm326_vm0, %v4148_v34 }
0x118a   : > { %v4137_v8 = vpop.f32.mrf.mxu0 }
0x118b   : > { %v4138_v59 = vadd.f32 %v4648_v56, %v4137_v8 }
0x118d   : > { %4153 = vst.msk [vmem:[%s269_s11 + $0x18] sm:$0xff] %vm326_vm0, %v4138_v59 }
0x118e   : > { %4932 = shalt.err (!%p4929_p5)
}
0x118f   : > { %s4999_s20 = smov 128  }
0x1190   : > { %4438 = dma.vmem_to_hbm [thread:$0]  (%p5075_p4), %s4174_s16, 1024, %s4176_s17, %s4159_s24, %s4999_s20, %s4999_s20, %s4994_s28  }
0x1191 PF: > { %p4444_p6 = scmp.ge.s32.totalorder %s4983_s26, 2  ;;  %s4190_s11 = sand.u32 1, %s4963_s21  }
0x1192   : > { %s4191_s14 = scalar_lea.sflag [#allocation3], %s4190_s11 }
0x1193   : > { %p4441_p7 = pnand %p4444_p6, %p5082_p8 }
0x1195   : > { %p4442_p9 = pneg %p4441_p7 }
0x1197   : > { %4958 = dma.done.wait (%p4442_p9), %s4191_s14, 1024  }
0x1198   : > { %4960 = vsyncadd (%p4442_p9), %s4191_s14, 4294966272  ;;  %s19_s26 = sadd.s32 1, %s4983_s26   ;;  %s6647_s21 = smov %s4967_s22 }
0x1199   : > { %p16_p10 = scmp.ge.s32.totalorder %s19_s26, 4   ;;  %s6648_s22 = smov %s4971_s23 }
0x119a   : > { %s6649_s23 = smov %s5088_s10  ;;  %s6650_s24 = smov %s4979_s25 }
0x119b   : > { %s6651_s25 = smov %s6653_s29  ;;  %18 = sbr.rel (!%p16_p10) target bundleno = 4 (0x4), region = 79 }
0x11a0   :  { %4197 = vsyncpa [#allocation3], 1 }
0x11a1   :  { %4199 = vsyncpa [#allocation3 + $0x1], 1 }

</bundles_post_ra>
